<compile_context>
chip_gen: v6e
topology: v6e:2x2x1
jax: 0.10.0
libtpu: 0.0.40
codegen_flags: <defaults>
</compile_context>

<pallas_src>
import jax
import jax.numpy as jnp
from jax import lax
from jax.experimental import pallas as pl
from jax.experimental.pallas import tpu as pltpu


def _round_up(x, m):
    return (x + m - 1) // m * m


def _sigmoid(x):
    # sigma(x) = 0.5 * (tanh(x/2) + 1): a single EUP transcendental per element.
    return 0.5 * jnp.tanh(0.5 * x) + 0.5


def _make_kernel(T, TB, BB, Hp, unroll, mask_tail):
    def kernel(x_ref, wih_ref, whh_ref, b_ref, wfc_ref, bfc_ref,
               out_ref, h_scr, c_scr, g_scr):
        t = pl.program_id(1)
        nt = pl.num_programs(1)

        @pl.when(t == 0)
        def _init():
            h_scr[...] = jnp.zeros_like(h_scr)
            c_scr[...] = jnp.zeros_like(c_scr)

        # Hoisted input projection for the whole time block: one MXU matmul
        # (M = TB*BB) with the fused, pre-scaled (b_ih + b_hh) bias folded in.
        g_scr[...] = (
            jnp.dot(x_ref[0], wih_ref[...], preferred_element_type=jnp.float32)
            + b_ref[...]).astype(g_scr.dtype)

        def step(s, carry):
            h, c = carry                                  # h: bf16, c: f32
            row = pl.multiple_of(s * BB, 8)               # sublane-aligned slab
            gates = (g_scr[pl.ds(row, BB), :]
                     + jnp.dot(h, whh_ref[...],
                               preferred_element_type=jnp.float32))
            # Sigmoid-gate rows were pre-scaled by 0.5 on the host, so a single
            # tanh over the whole (BB, 4Hp) slab yields all four gates.
            tg = jnp.tanh(gates)
            i = tg[:, 0 * Hp:1 * Hp] * 0.5 + 0.5
            f = tg[:, 1 * Hp:2 * Hp] * 0.5 + 0.5
            g = tg[:, 2 * Hp:3 * Hp]
            o = tg[:, 3 * Hp:4 * Hp] * 0.5 + 0.5
            c_new = f * c + i * g
            h_new = (o * jnp.tanh(c_new)).astype(h_scr.dtype)
            if mask_tail:                                 # static: only if T % TB != 0
                valid = (t * TB + s) < T
                h_new = jnp.where(valid, h_new, h)
                c_new = jnp.where(valid, c_new, c)
            return h_new, c_new

        h_fin, c_fin = lax.fori_loop(0, TB, step, (h_scr[...], c_scr[...]),
                                     unroll=unroll)
        h_scr[...] = h_fin                                # one store per state/block
        c_scr[...] = c_fin

        @pl.when(t == nt - 1)
        def _finalize():
            logits = jnp.dot(h_fin, wfc_ref[...],
                             preferred_element_type=jnp.float32) + bfc_ref[...]
            out_ref[...] = _sigmoid(logits)

    return kernel


def candle_lstm_forward(x, params, *, batch_block=None, time_block=None,
                        single_buffer_weights=True):
    """x: (B, T, D) float32.  Returns sigmoid(fc(lstm(x)[:, -1, :])) -> (B, O)."""
    w_ih, w_hh, b_ih, b_hh, w_fc, b_fc = params
    B, T, D = x.shape
    H = w_hh.shape[1]               # w_hh: (4H, H)
    O = w_fc.shape[0]               # w_fc: (O, H)

    Bp = _round_up(B, 8)            # sublane padding
    Hp = _round_up(H, 128)          # lane padding -> aligned gate slices

    # ---- batch blocking: >=2 blocks feeds both v7x TCs (no-op on 1-TC chips) --
    if batch_block is None:
        BB = Bp // 2 if (Bp % 16 == 0) else Bp
    else:
        BB = batch_block
    NB = Bp // BB

    # ---- time blocking: target one full MXU M-tile, cap by VMEM and T --------
    if time_block is None:
        tb_mxu = -(-256 // BB)                               # M = TB*BB >= 256
        tb_vmem = max(1, (8 << 20) // (BB * 4 * Hp * 2))     # bf16 g_scr <= 8 MiB
        TB = max(1, min(tb_mxu, tb_vmem, T))
    else:
        TB = time_block
    Tn = -(-T // TB)                 # number of time blocks (ceil)
    Tp = Tn * TB                     # padded sequence length
    mask_tail = (Tp != T)

    # ---- bounded unroll: full only while the per-step live set fits vregs ----
    step_vregs = (BB * 4 * Hp * 4) // 4096
    if step_vregs <= 8:
        unroll = True
    elif step_vregs <= 32:
        unroll = 4
    else:
        unroll = 2

    # ---- repack / zero-pad weights (PyTorch gate order [i, f, g, o]) ---------
    # Sigmoid gates (i, f, o) are pre-scaled by 0.5 so sigma(x)=0.5*tanh(x/2)+0.5
    # becomes a plain tanh of the stored pre-activation (exact in bf16).
    gate_scale = jnp.array([0.5, 0.5, 1.0, 0.5], jnp.float32)

    def _pack_gate_rows(w):          # (4H, X) -> (X, 4Hp) bf16
        X = w.shape[1]
        w4 = w.reshape(4, H, X) * gate_scale[:, None, None]
        w4 = jnp.pad(w4, ((0, 0), (0, Hp - H), (0, 0)))
        return w4.reshape(4 * Hp, X).T.astype(jnp.bfloat16)

    wih_t = _pack_gate_rows(w_ih)                                      # (D, 4Hp)
    whh_t = _pack_gate_rows(jnp.pad(w_hh, ((0, 0), (0, Hp - H))))      # (Hp, 4Hp)
    bias = jnp.pad((b_ih + b_hh).reshape(4, H) * gate_scale[:, None],
                   ((0, 0), (0, Hp - H))).reshape(1, 4 * Hp).astype(jnp.float32)
    wfc_t = jnp.pad(w_fc, ((0, 0), (0, Hp - H))).T.astype(jnp.bfloat16)  # (Hp, O)
    bfc = b_fc.reshape(1, O).astype(jnp.float32)

    # ---- pad x (batch + time), lay it out (NB, Tp*BB, D) time-major, bf16 ----
    x_p = jnp.pad(x, ((0, Bp - B), (0, Tp - T), (0, 0)))               # (Bp, Tp, D)
    x_l = (x_p.reshape(NB, BB, Tp, D).transpose(0, 2, 1, 3)
           .reshape(NB, Tp * BB, D).astype(jnp.bfloat16))

    # ---- VMEM budget + cost hint ---------------------------------------------
    wbuf = 1 if single_buffer_weights else 2
    needed = (2 * TB * BB * D * 2                                      # x block (dbl buf)
              + wbuf * (D * 4 * Hp * 2 + Hp * 4 * Hp * 2 + 4 * Hp * 4
                        + Hp * O * 2 + O * 4)                         # weights/bias
              + 2 * BB * O * 4                                         # out block
              + BB * Hp * (2 + 4)                                      # h (bf16) + c (f32)
              + TB * BB * 4 * Hp * 2)                                  # g_scr (bf16)
    vmem_limit = int(min(128 * 1024 * 1024, max(32 * 1024 * 1024, 2 * needed)))

    cost = pl.CostEstimate(
        flops=2 * T * Bp * (D + Hp) * 4 * Hp + 2 * Bp * Hp * O,
        transcendentals=T * Bp * 5 * Hp + Bp * O,
        bytes_accessed=int(x_l.size * 2 + wih_t.size * 2 + whh_t.size * 2
                           + bias.size * 4 + wfc_t.size * 2 + bfc.size * 4
                           + Bp * O * 4),
    )

    kernel = _make_kernel(T=T, TB=TB, BB=BB, Hp=Hp, unroll=unroll,
                          mask_tail=mask_tail)

    def _run(single_buf):
        wmode = dict(pipeline_mode=pl.Buffered(1)) if single_buf else {}
        in_specs = [
            pl.BlockSpec((1, TB * BB, D), lambda b, t: (b, t, 0)),      # x time block
            pl.BlockSpec((D, 4 * Hp), lambda b, t: (0, 0), **wmode),    # W_ih^T
            pl.BlockSpec((Hp, 4 * Hp), lambda b, t: (0, 0), **wmode),   # W_hh^T
            pl.BlockSpec((1, 4 * Hp), lambda b, t: (0, 0), **wmode),    # fused bias
            pl.BlockSpec((Hp, O), lambda b, t: (0, 0), **wmode),        # W_fc^T
            pl.BlockSpec((1, O), lambda b, t: (0, 0), **wmode),         # b_fc
        ]
        return pl.pallas_call(
            kernel,
            out_shape=jax.ShapeDtypeStruct((NB * BB, O), jnp.float32),
            grid_spec=pltpu.PrefetchScalarGridSpec(
                num_scalar_prefetch=0,
                grid=(NB, Tn),
                in_specs=in_specs,
                out_specs=pl.BlockSpec((BB, O), lambda b, t: (b, 0)),
                scratch_shapes=[
                    pltpu.VMEM((BB, Hp), jnp.bfloat16),          # h state (bf16 carry)
                    pltpu.VMEM((BB, Hp), jnp.float32),           # c state
                    pltpu.VMEM((TB * BB, 4 * Hp), jnp.bfloat16),  # hoisted gate inputs
                ],
            ),
            compiler_params=pltpu.CompilerParams(
                dimension_semantics=("parallel", "arbitrary"),
                vmem_limit_bytes=vmem_limit),
            cost_estimate=cost,
        )(x_l, wih_t, whh_t, bias, wfc_t, bfc)

    try:
        out_p = _run(single_buffer_weights)
    except Exception:
        if not single_buffer_weights:
            raise
        out_p = _run(False)   # graceful fallback if Buffered(1) is unsupported

    return out_p[:B]


def reference_forward(x, params):
    """Pure-JAX f32 reference with PyTorch LSTM semantics (gate order i,f,g,o)."""
    w_ih, w_hh, b_ih, b_hh, w_fc, b_fc = params
    B, T, D = x.shape
    H = w_hh.shape[1]
    h = jnp.zeros((B, H), jnp.float32)
    c = jnp.zeros((B, H), jnp.float32)
    for t in range(T):
        gates = x[:, t, :] @ w_ih.T + h @ w_hh.T + b_ih + b_hh
        i = jax.nn.sigmoid(gates[:, 0 * H:1 * H])
        f = jax.nn.sigmoid(gates[:, 1 * H:2 * H])
        g = jnp.tanh(gates[:, 2 * H:3 * H])
        o = jax.nn.sigmoid(gates[:, 3 * H:4 * H])
        c = f * c + i * g
        h = o * jnp.tanh(c)
    return jax.nn.sigmoid(h @ w_fc.T + b_fc)


def init_params(key, input_dim, hidden_dim, output_dim):
    """Deterministic init mirroring PyTorch default uniform(-1/sqrt(H), 1/sqrt(H))."""
    k = 1.0 / jnp.sqrt(jnp.float32(hidden_dim))
    keys = jax.random.split(key, 6)
    u = lambda kk, shape, bound: jax.random.uniform(
        kk, shape, jnp.float32, -bound, bound)
    w_ih = u(keys[0], (4 * hidden_dim, input_dim), k)
    w_hh = u(keys[1], (4 * hidden_dim, hidden_dim), k)
    b_ih = u(keys[2], (4 * hidden_dim,), k)
    b_hh = u(keys[3], (4 * hidden_dim,), k)
    w_fc = u(keys[4], (output_dim, hidden_dim), k)
    b_fc = u(keys[5], (output_dim,), k)
    return (w_ih, w_hh, b_ih, b_hh, w_fc, b_fc)


if __name__ == "__main__":
    B, T, D, H, O = 2, 8, 4, 32, 1   # batch, seq, input_dim, hidden_dim, output_dim

    key = jax.random.PRNGKey(0)
    kx, kp = jax.random.split(key)
    x = jax.random.normal(kx, (B, T, D), jnp.float32)
    params = init_params(kp, D, H, O)

    out = candle_lstm_forward(x, params)
    out = jax.block_until_ready(out)

    ref = reference_forward(x, params)
    assert out.shape == (B, O)
    # bf16 matmul operands / bf16 hoisted-gate storage with f32 accumulation:
    # loose tolerance on a [0,1] output.
    assert jnp.allclose(out, ref, rtol=0.0, atol=2.5e-2), (out, ref)

    print("KERNEL_OK")
</pallas_src>

<mosaic_0001>
module attributes {stable_mosaic.version = 11 : i64} {
  func.func @kernel(%arg0: i32, %arg1: i32, %arg2: memref<1x64x4xbf16, #tpu.memory_space<vmem>>, %arg3: memref<4x512xbf16, #tpu.memory_space<vmem>>, %arg4: memref<128x512xbf16, #tpu.memory_space<vmem>>, %arg5: memref<1x512xf32, #tpu.memory_space<vmem>>, %arg6: memref<128x1xbf16, #tpu.memory_space<vmem>>, %arg7: memref<1x1xf32, #tpu.memory_space<vmem>>, %arg8: memref<8x1xf32, #tpu.memory_space<vmem>>, %arg9: memref<8x128xbf16, #tpu.memory_space<vmem>>, %arg10: memref<8x128xf32, #tpu.memory_space<vmem>>, %arg11: memref<64x512xbf16, #tpu.memory_space<vmem>>) attributes {dimension_semantics = [#tpu.dimension_semantics<parallel>, #tpu.dimension_semantics<arbitrary>], iteration_bounds = array<i64: 1, 1>, scalar_prefetch = 0 : i64, scratch_operands = 3 : i64, tpu.core_type = #tpu.core_type<tc>, window_params = [{transform_indices = @transform_0, window_bounds = array<i64: 1, 64, 4>}, {pipeline_mode = #tpu.pipeline_mode<synchronous>, transform_indices = @transform_1, window_bounds = array<i64: 4, 512>}, {pipeline_mode = #tpu.pipeline_mode<synchronous>, transform_indices = @transform_2, window_bounds = array<i64: 128, 512>}, {pipeline_mode = #tpu.pipeline_mode<synchronous>, transform_indices = @transform_3, window_bounds = array<i64: 1, 512>}, {pipeline_mode = #tpu.pipeline_mode<synchronous>, transform_indices = @transform_4, window_bounds = array<i64: 128, 1>}, {pipeline_mode = #tpu.pipeline_mode<synchronous>, transform_indices = @transform_5, window_bounds = array<i64: 1, 1>}, {transform_indices = @transform_6, window_bounds = array<i64: 8, 1>}]} {
    %c0_i32 = arith.constant 0 : i32
    %0 = arith.cmpi eq, %arg1, %c0_i32 : i32
    %1 = arith.extui %0 : i1 to i32
    %c0_i32_0 = arith.constant 0 : i32
    %2 = arith.cmpi ne, %1, %c0_i32_0 : i32
    scf.if %2 {
      %cst_108 = arith.constant 0.000000e+00 : bf16
      %267 = vector.broadcast %cst_108 : bf16 to vector<8x128xbf16>
      %c0_109 = arith.constant 0 : index
      %c0_110 = arith.constant 0 : index
      %268 = vector.load %arg9[%c0_109, %c0_110] : memref<8x128xbf16, #tpu.memory_space<vmem>>, vector<8x128xbf16>
      tpu.vector_store %arg9[%c0_109, %c0_110], %267 {strides = array<i32>} : memref<8x128xbf16, #tpu.memory_space<vmem>>, vector<8x128xbf16>,
      %cst_111 = arith.constant 0.000000e+00 : f32
      %269 = vector.broadcast %cst_111 : f32 to vector<8x128xf32>
      %c0_112 = arith.constant 0 : index
      %c0_113 = arith.constant 0 : index
      %270 = vector.load %arg10[%c0_112, %c0_113] : memref<8x128xf32, #tpu.memory_space<vmem>>, vector<8x128xf32>
      tpu.vector_store %arg10[%c0_112, %c0_113], %269 {strides = array<i32>} : memref<8x128xf32, #tpu.memory_space<vmem>>, vector<8x128xf32>,
    } else {
    }
    %c0 = arith.constant 0 : index
    %c0_1 = arith.constant 0 : index
    %c0_2 = arith.constant 0 : index
    %3 = vector.load %arg2[%c0, %c0_1, %c0_2] : memref<1x64x4xbf16, #tpu.memory_space<vmem>>, vector<1x64x4xbf16>
    %4 = vector.shape_cast %3 : vector<1x64x4xbf16> to vector<64x4xbf16>
    %c0_3 = arith.constant 0 : index
    %c0_4 = arith.constant 0 : index
    %5 = vector.load %arg3[%c0_3, %c0_4] : memref<4x512xbf16, #tpu.memory_space<vmem>>, vector<4x512xbf16>
    %cst = arith.constant dense<0.000000e+00> : vector<64x512xf32>
    %6 = tpu.matmul %4, %5, %cst {dimension_numbers = #tpu.dot_dimension_numbers<[1], [0], [0], [1], [0, 0, 1, 1], [], []>} : vector<64x4xbf16>, vector<4x512xbf16>, vector<64x512xf32> -> vector<64x512xf32>
    %c0_5 = arith.constant 0 : index
    %c0_6 = arith.constant 0 : index
    %7 = vector.load %arg5[%c0_5, %c0_6] : memref<1x512xf32, #tpu.memory_space<vmem>>, vector<1x512xf32>
    %8 = vector.broadcast %7 : vector<1x512xf32> to vector<64x512xf32>
    %9 = arith.addf %6, %8 : vector<64x512xf32>
    %10 = arith.truncf %9 : vector<64x512xf32> to vector<64x512xbf16>
    %c0_7 = arith.constant 0 : index
    %c0_8 = arith.constant 0 : index
    %11 = vector.load %arg11[%c0_7, %c0_8] : memref<64x512xbf16, #tpu.memory_space<vmem>>, vector<64x512xbf16>
    tpu.vector_store %arg11[%c0_7, %c0_8], %10 {strides = array<i32>} : memref<64x512xbf16, #tpu.memory_space<vmem>>, vector<64x512xbf16>,
    %c0_9 = arith.constant 0 : index
    %c0_10 = arith.constant 0 : index
    %12 = vector.load %arg9[%c0_9, %c0_10] : memref<8x128xbf16, #tpu.memory_space<vmem>>, vector<8x128xbf16>
    %c0_11 = arith.constant 0 : index
    %c0_12 = arith.constant 0 : index
    %13 = vector.load %arg10[%c0_11, %c0_12] : memref<8x128xf32, #tpu.memory_space<vmem>>, vector<8x128xf32>
    %c0_i32_13 = arith.constant 0 : i32
    %c8_i32 = arith.constant 8 : i32
    %14 = arith.muli %c0_i32_13, %c8_i32 : i32
    %15 = tpu.assume_multiple %14, 8 : i32
    %16 = arith.index_cast %15 : i32 to index
    %c0_14 = arith.constant 0 : index
    %17 = vector.load %arg11[%16, %c0_14] : memref<64x512xbf16, #tpu.memory_space<vmem>>, vector<8x512xbf16>
    %c0_15 = arith.constant 0 : index
    %c0_16 = arith.constant 0 : index
    %18 = vector.load %arg4[%c0_15, %c0_16] : memref<128x512xbf16, #tpu.memory_space<vmem>>, vector<128x512xbf16>
    %cst_17 = arith.constant dense<0.000000e+00> : vector<8x512xf32>
    %19 = tpu.matmul %12, %18, %cst_17 {dimension_numbers = #tpu.dot_dimension_numbers<[1], [0], [0], [1], [0, 0, 1, 1], [], []>} : vector<8x128xbf16>, vector<128x512xbf16>, vector<8x512xf32> -> vector<8x512xf32>
    %20 = arith.extf %17 : vector<8x512xbf16> to vector<8x512xf32>
    %21 = arith.addf %20, %19 : vector<8x512xf32>
    %22 = math.tanh %21 : vector<8x512xf32>
    %23 = vector.extract_strided_slice %22 {offsets = [0, 0], sizes = [8, 128], strides = [1, 1]} : vector<8x512xf32> to vector<8x128xf32>
    %cst_18 = arith.constant 5.000000e-01 : f32
    %24 = vector.broadcast %cst_18 : f32 to vector<8x128xf32>
    %25 = arith.mulf %23, %24 : vector<8x128xf32>
    %cst_19 = arith.constant 5.000000e-01 : f32
    %26 = vector.broadcast %cst_19 : f32 to vector<8x128xf32>
    %27 = arith.addf %25, %26 : vector<8x128xf32>
    %28 = vector.extract_strided_slice %22 {offsets = [0, 128], sizes = [8, 128], strides = [1, 1]} : vector<8x512xf32> to vector<8x128xf32>
    %cst_20 = arith.constant 5.000000e-01 : f32
    %29 = vector.broadcast %cst_20 : f32 to vector<8x128xf32>
    %30 = arith.mulf %28, %29 : vector<8x128xf32>
    %cst_21 = arith.constant 5.000000e-01 : f32
    %31 = vector.broadcast %cst_21 : f32 to vector<8x128xf32>
    %32 = arith.addf %30, %31 : vector<8x128xf32>
    %33 = vector.extract_strided_slice %22 {offsets = [0, 256], sizes = [8, 128], strides = [1, 1]} : vector<8x512xf32> to vector<8x128xf32>
    %34 = vector.extract_strided_slice %22 {offsets = [0, 384], sizes = [8, 128], strides = [1, 1]} : vector<8x512xf32> to vector<8x128xf32>
    %cst_22 = arith.constant 5.000000e-01 : f32
    %35 = vector.broadcast %cst_22 : f32 to vector<8x128xf32>
    %36 = arith.mulf %34, %35 : vector<8x128xf32>
    %cst_23 = arith.constant 5.000000e-01 : f32
    %37 = vector.broadcast %cst_23 : f32 to vector<8x128xf32>
    %38 = arith.addf %36, %37 : vector<8x128xf32>
    %39 = arith.mulf %32, %13 : vector<8x128xf32>
    %40 = arith.mulf %27, %33 : vector<8x128xf32>
    %41 = arith.addf %39, %40 : vector<8x128xf32>
    %42 = math.tanh %41 : vector<8x128xf32>
    %43 = arith.mulf %38, %42 : vector<8x128xf32>
    %44 = arith.truncf %43 : vector<8x128xf32> to vector<8x128xbf16>
    %c1_i32 = arith.constant 1 : i32
    %c8_i32_24 = arith.constant 8 : i32
    %45 = arith.muli %c1_i32, %c8_i32_24 : i32
    %46 = tpu.assume_multiple %45, 8 : i32
    %47 = arith.index_cast %46 : i32 to index
    %c0_25 = arith.constant 0 : index
    %48 = vector.load %arg11[%47, %c0_25] : memref<64x512xbf16, #tpu.memory_space<vmem>>, vector<8x512xbf16>
    %c0_26 = arith.constant 0 : index
    %c0_27 = arith.constant 0 : index
    %49 = vector.load %arg4[%c0_26, %c0_27] : memref<128x512xbf16, #tpu.memory_space<vmem>>, vector<128x512xbf16>
    %cst_28 = arith.constant dense<0.000000e+00> : vector<8x512xf32>
    %50 = tpu.matmul %44, %49, %cst_28 {dimension_numbers = #tpu.dot_dimension_numbers<[1], [0], [0], [1], [0, 0, 1, 1], [], []>} : vector<8x128xbf16>, vector<128x512xbf16>, vector<8x512xf32> -> vector<8x512xf32>
    %51 = arith.extf %48 : vector<8x512xbf16> to vector<8x512xf32>
    %52 = arith.addf %51, %50 : vector<8x512xf32>
    %53 = math.tanh %52 : vector<8x512xf32>
    %54 = vector.extract_strided_slice %53 {offsets = [0, 0], sizes = [8, 128], strides = [1, 1]} : vector<8x512xf32> to vector<8x128xf32>
    %cst_29 = arith.constant 5.000000e-01 : f32
    %55 = vector.broadcast %cst_29 : f32 to vector<8x128xf32>
    %56 = arith.mulf %54, %55 : vector<8x128xf32>
    %cst_30 = arith.constant 5.000000e-01 : f32
    %57 = vector.broadcast %cst_30 : f32 to vector<8x128xf32>
    %58 = arith.addf %56, %57 : vector<8x128xf32>
    %59 = vector.extract_strided_slice %53 {offsets = [0, 128], sizes = [8, 128], strides = [1, 1]} : vector<8x512xf32> to vector<8x128xf32>
    %cst_31 = arith.constant 5.000000e-01 : f32
    %60 = vector.broadcast %cst_31 : f32 to vector<8x128xf32>
    %61 = arith.mulf %59, %60 : vector<8x128xf32>
    %cst_32 = arith.constant 5.000000e-01 : f32
    %62 = vector.broadcast %cst_32 : f32 to vector<8x128xf32>
    %63 = arith.addf %61, %62 : vector<8x128xf32>
    %64 = vector.extract_strided_slice %53 {offsets = [0, 256], sizes = [8, 128], strides = [1, 1]} : vector<8x512xf32> to vector<8x128xf32>
    %65 = vector.extract_strided_slice %53 {offsets = [0, 384], sizes = [8, 128], strides = [1, 1]} : vector<8x512xf32> to vector<8x128xf32>
    %cst_33 = arith.constant 5.000000e-01 : f32
    %66 = vector.broadcast %cst_33 : f32 to vector<8x128xf32>
    %67 = arith.mulf %65, %66 : vector<8x128xf32>
    %cst_34 = arith.constant 5.000000e-01 : f32
    %68 = vector.broadcast %cst_34 : f32 to vector<8x128xf32>
    %69 = arith.addf %67, %68 : vector<8x128xf32>
    %70 = arith.mulf %63, %41 : vector<8x128xf32>
    %71 = arith.mulf %58, %64 : vector<8x128xf32>
    %72 = arith.addf %70, %71 : vector<8x128xf32>
    %73 = math.tanh %72 : vector<8x128xf32>
    %74 = arith.mulf %69, %73 : vector<8x128xf32>
    %75 = arith.truncf %74 : vector<8x128xf32> to vector<8x128xbf16>
    %c2_i32 = arith.constant 2 : i32
    %c8_i32_35 = arith.constant 8 : i32
    %76 = arith.muli %c2_i32, %c8_i32_35 : i32
    %77 = tpu.assume_multiple %76, 8 : i32
    %78 = arith.index_cast %77 : i32 to index
    %c0_36 = arith.constant 0 : index
    %79 = vector.load %arg11[%78, %c0_36] : memref<64x512xbf16, #tpu.memory_space<vmem>>, vector<8x512xbf16>
    %c0_37 = arith.constant 0 : index
    %c0_38 = arith.constant 0 : index
    %80 = vector.load %arg4[%c0_37, %c0_38] : memref<128x512xbf16, #tpu.memory_space<vmem>>, vector<128x512xbf16>
    %cst_39 = arith.constant dense<0.000000e+00> : vector<8x512xf32>
    %81 = tpu.matmul %75, %80, %cst_39 {dimension_numbers = #tpu.dot_dimension_numbers<[1], [0], [0], [1], [0, 0, 1, 1], [], []>} : vector<8x128xbf16>, vector<128x512xbf16>, vector<8x512xf32> -> vector<8x512xf32>
    %82 = arith.extf %79 : vector<8x512xbf16> to vector<8x512xf32>
    %83 = arith.addf %82, %81 : vector<8x512xf32>
    %84 = math.tanh %83 : vector<8x512xf32>
    %85 = vector.extract_strided_slice %84 {offsets = [0, 0], sizes = [8, 128], strides = [1, 1]} : vector<8x512xf32> to vector<8x128xf32>
    %cst_40 = arith.constant 5.000000e-01 : f32
    %86 = vector.broadcast %cst_40 : f32 to vector<8x128xf32>
    %87 = arith.mulf %85, %86 : vector<8x128xf32>
    %cst_41 = arith.constant 5.000000e-01 : f32
    %88 = vector.broadcast %cst_41 : f32 to vector<8x128xf32>
    %89 = arith.addf %87, %88 : vector<8x128xf32>
    %90 = vector.extract_strided_slice %84 {offsets = [0, 128], sizes = [8, 128], strides = [1, 1]} : vector<8x512xf32> to vector<8x128xf32>
    %cst_42 = arith.constant 5.000000e-01 : f32
    %91 = vector.broadcast %cst_42 : f32 to vector<8x128xf32>
    %92 = arith.mulf %90, %91 : vector<8x128xf32>
    %cst_43 = arith.constant 5.000000e-01 : f32
    %93 = vector.broadcast %cst_43 : f32 to vector<8x128xf32>
    %94 = arith.addf %92, %93 : vector<8x128xf32>
    %95 = vector.extract_strided_slice %84 {offsets = [0, 256], sizes = [8, 128], strides = [1, 1]} : vector<8x512xf32> to vector<8x128xf32>
    %96 = vector.extract_strided_slice %84 {offsets = [0, 384], sizes = [8, 128], strides = [1, 1]} : vector<8x512xf32> to vector<8x128xf32>
    %cst_44 = arith.constant 5.000000e-01 : f32
    %97 = vector.broadcast %cst_44 : f32 to vector<8x128xf32>
    %98 = arith.mulf %96, %97 : vector<8x128xf32>
    %cst_45 = arith.constant 5.000000e-01 : f32
    %99 = vector.broadcast %cst_45 : f32 to vector<8x128xf32>
    %100 = arith.addf %98, %99 : vector<8x128xf32>
    %101 = arith.mulf %94, %72 : vector<8x128xf32>
    %102 = arith.mulf %89, %95 : vector<8x128xf32>
    %103 = arith.addf %101, %102 : vector<8x128xf32>
    %104 = math.tanh %103 : vector<8x128xf32>
    %105 = arith.mulf %100, %104 : vector<8x128xf32>
    %106 = arith.truncf %105 : vector<8x128xf32> to vector<8x128xbf16>
    %c3_i32 = arith.constant 3 : i32
    %c8_i32_46 = arith.constant 8 : i32
    %107 = arith.muli %c3_i32, %c8_i32_46 : i32
    %108 = tpu.assume_multiple %107, 8 : i32
    %109 = arith.index_cast %108 : i32 to index
    %c0_47 = arith.constant 0 : index
    %110 = vector.load %arg11[%109, %c0_47] : memref<64x512xbf16, #tpu.memory_space<vmem>>, vector<8x512xbf16>
    %c0_48 = arith.constant 0 : index
    %c0_49 = arith.constant 0 : index
    %111 = vector.load %arg4[%c0_48, %c0_49] : memref<128x512xbf16, #tpu.memory_space<vmem>>, vector<128x512xbf16>
    %cst_50 = arith.constant dense<0.000000e+00> : vector<8x512xf32>
    %112 = tpu.matmul %106, %111, %cst_50 {dimension_numbers = #tpu.dot_dimension_numbers<[1], [0], [0], [1], [0, 0, 1, 1], [], []>} : vector<8x128xbf16>, vector<128x512xbf16>, vector<8x512xf32> -> vector<8x512xf32>
    %113 = arith.extf %110 : vector<8x512xbf16> to vector<8x512xf32>
    %114 = arith.addf %113, %112 : vector<8x512xf32>
    %115 = math.tanh %114 : vector<8x512xf32>
    %116 = vector.extract_strided_slice %115 {offsets = [0, 0], sizes = [8, 128], strides = [1, 1]} : vector<8x512xf32> to vector<8x128xf32>
    %cst_51 = arith.constant 5.000000e-01 : f32
    %117 = vector.broadcast %cst_51 : f32 to vector<8x128xf32>
    %118 = arith.mulf %116, %117 : vector<8x128xf32>
    %cst_52 = arith.constant 5.000000e-01 : f32
    %119 = vector.broadcast %cst_52 : f32 to vector<8x128xf32>
    %120 = arith.addf %118, %119 : vector<8x128xf32>
    %121 = vector.extract_strided_slice %115 {offsets = [0, 128], sizes = [8, 128], strides = [1, 1]} : vector<8x512xf32> to vector<8x128xf32>
    %cst_53 = arith.constant 5.000000e-01 : f32
    %122 = vector.broadcast %cst_53 : f32 to vector<8x128xf32>
    %123 = arith.mulf %121, %122 : vector<8x128xf32>
    %cst_54 = arith.constant 5.000000e-01 : f32
    %124 = vector.broadcast %cst_54 : f32 to vector<8x128xf32>
    %125 = arith.addf %123, %124 : vector<8x128xf32>
    %126 = vector.extract_strided_slice %115 {offsets = [0, 256], sizes = [8, 128], strides = [1, 1]} : vector<8x512xf32> to vector<8x128xf32>
    %127 = vector.extract_strided_slice %115 {offsets = [0, 384], sizes = [8, 128], strides = [1, 1]} : vector<8x512xf32> to vector<8x128xf32>
    %cst_55 = arith.constant 5.000000e-01 : f32
    %128 = vector.broadcast %cst_55 : f32 to vector<8x128xf32>
    %129 = arith.mulf %127, %128 : vector<8x128xf32>
    %cst_56 = arith.constant 5.000000e-01 : f32
    %130 = vector.broadcast %cst_56 : f32 to vector<8x128xf32>
    %131 = arith.addf %129, %130 : vector<8x128xf32>
    %132 = arith.mulf %125, %103 : vector<8x128xf32>
    %133 = arith.mulf %120, %126 : vector<8x128xf32>
    %134 = arith.addf %132, %133 : vector<8x128xf32>
    %135 = math.tanh %134 : vector<8x128xf32>
    %136 = arith.mulf %131, %135 : vector<8x128xf32>
    %137 = arith.truncf %136 : vector<8x128xf32> to vector<8x128xbf16>
    %c4_i32 = arith.constant 4 : i32
    %c8_i32_57 = arith.constant 8 : i32
    %138 = arith.muli %c4_i32, %c8_i32_57 : i32
    %139 = tpu.assume_multiple %138, 8 : i32
    %140 = arith.index_cast %139 : i32 to index
    %c0_58 = arith.constant 0 : index
    %141 = vector.load %arg11[%140, %c0_58] : memref<64x512xbf16, #tpu.memory_space<vmem>>, vector<8x512xbf16>
    %c0_59 = arith.constant 0 : index
    %c0_60 = arith.constant 0 : index
    %142 = vector.load %arg4[%c0_59, %c0_60] : memref<128x512xbf16, #tpu.memory_space<vmem>>, vector<128x512xbf16>
    %cst_61 = arith.constant dense<0.000000e+00> : vector<8x512xf32>
    %143 = tpu.matmul %137, %142, %cst_61 {dimension_numbers = #tpu.dot_dimension_numbers<[1], [0], [0], [1], [0, 0, 1, 1], [], []>} : vector<8x128xbf16>, vector<128x512xbf16>, vector<8x512xf32> -> vector<8x512xf32>
    %144 = arith.extf %141 : vector<8x512xbf16> to vector<8x512xf32>
    %145 = arith.addf %144, %143 : vector<8x512xf32>
    %146 = math.tanh %145 : vector<8x512xf32>
    %147 = vector.extract_strided_slice %146 {offsets = [0, 0], sizes = [8, 128], strides = [1, 1]} : vector<8x512xf32> to vector<8x128xf32>
    %cst_62 = arith.constant 5.000000e-01 : f32
    %148 = vector.broadcast %cst_62 : f32 to vector<8x128xf32>
    %149 = arith.mulf %147, %148 : vector<8x128xf32>
    %cst_63 = arith.constant 5.000000e-01 : f32
    %150 = vector.broadcast %cst_63 : f32 to vector<8x128xf32>
    %151 = arith.addf %149, %150 : vector<8x128xf32>
    %152 = vector.extract_strided_slice %146 {offsets = [0, 128], sizes = [8, 128], strides = [1, 1]} : vector<8x512xf32> to vector<8x128xf32>
    %cst_64 = arith.constant 5.000000e-01 : f32
    %153 = vector.broadcast %cst_64 : f32 to vector<8x128xf32>
    %154 = arith.mulf %152, %153 : vector<8x128xf32>
    %cst_65 = arith.constant 5.000000e-01 : f32
    %155 = vector.broadcast %cst_65 : f32 to vector<8x128xf32>
    %156 = arith.addf %154, %155 : vector<8x128xf32>
    %157 = vector.extract_strided_slice %146 {offsets = [0, 256], sizes = [8, 128], strides = [1, 1]} : vector<8x512xf32> to vector<8x128xf32>
    %158 = vector.extract_strided_slice %146 {offsets = [0, 384], sizes = [8, 128], strides = [1, 1]} : vector<8x512xf32> to vector<8x128xf32>
    %cst_66 = arith.constant 5.000000e-01 : f32
    %159 = vector.broadcast %cst_66 : f32 to vector<8x128xf32>
    %160 = arith.mulf %158, %159 : vector<8x128xf32>
    %cst_67 = arith.constant 5.000000e-01 : f32
    %161 = vector.broadcast %cst_67 : f32 to vector<8x128xf32>
    %162 = arith.addf %160, %161 : vector<8x128xf32>
    %163 = arith.mulf %156, %134 : vector<8x128xf32>
    %164 = arith.mulf %151, %157 : vector<8x128xf32>
    %165 = arith.addf %163, %164 : vector<8x128xf32>
    %166 = math.tanh %165 : vector<8x128xf32>
    %167 = arith.mulf %162, %166 : vector<8x128xf32>
    %168 = arith.truncf %167 : vector<8x128xf32> to vector<8x128xbf16>
    %c5_i32 = arith.constant 5 : i32
    %c8_i32_68 = arith.constant 8 : i32
    %169 = arith.muli %c5_i32, %c8_i32_68 : i32
    %170 = tpu.assume_multiple %169, 8 : i32
    %171 = arith.index_cast %170 : i32 to index
    %c0_69 = arith.constant 0 : index
    %172 = vector.load %arg11[%171, %c0_69] : memref<64x512xbf16, #tpu.memory_space<vmem>>, vector<8x512xbf16>
    %c0_70 = arith.constant 0 : index
    %c0_71 = arith.constant 0 : index
    %173 = vector.load %arg4[%c0_70, %c0_71] : memref<128x512xbf16, #tpu.memory_space<vmem>>, vector<128x512xbf16>
    %cst_72 = arith.constant dense<0.000000e+00> : vector<8x512xf32>
    %174 = tpu.matmul %168, %173, %cst_72 {dimension_numbers = #tpu.dot_dimension_numbers<[1], [0], [0], [1], [0, 0, 1, 1], [], []>} : vector<8x128xbf16>, vector<128x512xbf16>, vector<8x512xf32> -> vector<8x512xf32>
    %175 = arith.extf %172 : vector<8x512xbf16> to vector<8x512xf32>
    %176 = arith.addf %175, %174 : vector<8x512xf32>
    %177 = math.tanh %176 : vector<8x512xf32>
    %178 = vector.extract_strided_slice %177 {offsets = [0, 0], sizes = [8, 128], strides = [1, 1]} : vector<8x512xf32> to vector<8x128xf32>
    %cst_73 = arith.constant 5.000000e-01 : f32
    %179 = vector.broadcast %cst_73 : f32 to vector<8x128xf32>
    %180 = arith.mulf %178, %179 : vector<8x128xf32>
    %cst_74 = arith.constant 5.000000e-01 : f32
    %181 = vector.broadcast %cst_74 : f32 to vector<8x128xf32>
    %182 = arith.addf %180, %181 : vector<8x128xf32>
    %183 = vector.extract_strided_slice %177 {offsets = [0, 128], sizes = [8, 128], strides = [1, 1]} : vector<8x512xf32> to vector<8x128xf32>
    %cst_75 = arith.constant 5.000000e-01 : f32
    %184 = vector.broadcast %cst_75 : f32 to vector<8x128xf32>
    %185 = arith.mulf %183, %184 : vector<8x128xf32>
    %cst_76 = arith.constant 5.000000e-01 : f32
    %186 = vector.broadcast %cst_76 : f32 to vector<8x128xf32>
    %187 = arith.addf %185, %186 : vector<8x128xf32>
    %188 = vector.extract_strided_slice %177 {offsets = [0, 256], sizes = [8, 128], strides = [1, 1]} : vector<8x512xf32> to vector<8x128xf32>
    %189 = vector.extract_strided_slice %177 {offsets = [0, 384], sizes = [8, 128], strides = [1, 1]} : vector<8x512xf32> to vector<8x128xf32>
    %cst_77 = arith.constant 5.000000e-01 : f32
    %190 = vector.broadcast %cst_77 : f32 to vector<8x128xf32>
    %191 = arith.mulf %189, %190 : vector<8x128xf32>
    %cst_78 = arith.constant 5.000000e-01 : f32
    %192 = vector.broadcast %cst_78 : f32 to vector<8x128xf32>
    %193 = arith.addf %191, %192 : vector<8x128xf32>
    %194 = arith.mulf %187, %165 : vector<8x128xf32>
    %195 = arith.mulf %182, %188 : vector<8x128xf32>
    %196 = arith.addf %194, %195 : vector<8x128xf32>
    %197 = math.tanh %196 : vector<8x128xf32>
    %198 = arith.mulf %193, %197 : vector<8x128xf32>
    %199 = arith.truncf %198 : vector<8x128xf32> to vector<8x128xbf16>
    %c6_i32 = arith.constant 6 : i32
    %c8_i32_79 = arith.constant 8 : i32
    %200 = arith.muli %c6_i32, %c8_i32_79 : i32
    %201 = tpu.assume_multiple %200, 8 : i32
    %202 = arith.index_cast %201 : i32 to index
    %c0_80 = arith.constant 0 : index
    %203 = vector.load %arg11[%202, %c0_80] : memref<64x512xbf16, #tpu.memory_space<vmem>>, vector<8x512xbf16>
    %c0_81 = arith.constant 0 : index
    %c0_82 = arith.constant 0 : index
    %204 = vector.load %arg4[%c0_81, %c0_82] : memref<128x512xbf16, #tpu.memory_space<vmem>>, vector<128x512xbf16>
    %cst_83 = arith.constant dense<0.000000e+00> : vector<8x512xf32>
    %205 = tpu.matmul %199, %204, %cst_83 {dimension_numbers = #tpu.dot_dimension_numbers<[1], [0], [0], [1], [0, 0, 1, 1], [], []>} : vector<8x128xbf16>, vector<128x512xbf16>, vector<8x512xf32> -> vector<8x512xf32>
    %206 = arith.extf %203 : vector<8x512xbf16> to vector<8x512xf32>
    %207 = arith.addf %206, %205 : vector<8x512xf32>
    %208 = math.tanh %207 : vector<8x512xf32>
    %209 = vector.extract_strided_slice %208 {offsets = [0, 0], sizes = [8, 128], strides = [1, 1]} : vector<8x512xf32> to vector<8x128xf32>
    %cst_84 = arith.constant 5.000000e-01 : f32
    %210 = vector.broadcast %cst_84 : f32 to vector<8x128xf32>
    %211 = arith.mulf %209, %210 : vector<8x128xf32>
    %cst_85 = arith.constant 5.000000e-01 : f32
    %212 = vector.broadcast %cst_85 : f32 to vector<8x128xf32>
    %213 = arith.addf %211, %212 : vector<8x128xf32>
    %214 = vector.extract_strided_slice %208 {offsets = [0, 128], sizes = [8, 128], strides = [1, 1]} : vector<8x512xf32> to vector<8x128xf32>
    %cst_86 = arith.constant 5.000000e-01 : f32
    %215 = vector.broadcast %cst_86 : f32 to vector<8x128xf32>
    %216 = arith.mulf %214, %215 : vector<8x128xf32>
    %cst_87 = arith.constant 5.000000e-01 : f32
    %217 = vector.broadcast %cst_87 : f32 to vector<8x128xf32>
    %218 = arith.addf %216, %217 : vector<8x128xf32>
    %219 = vector.extract_strided_slice %208 {offsets = [0, 256], sizes = [8, 128], strides = [1, 1]} : vector<8x512xf32> to vector<8x128xf32>
    %220 = vector.extract_strided_slice %208 {offsets = [0, 384], sizes = [8, 128], strides = [1, 1]} : vector<8x512xf32> to vector<8x128xf32>
    %cst_88 = arith.constant 5.000000e-01 : f32
    %221 = vector.broadcast %cst_88 : f32 to vector<8x128xf32>
    %222 = arith.mulf %220, %221 : vector<8x128xf32>
    %cst_89 = arith.constant 5.000000e-01 : f32
    %223 = vector.broadcast %cst_89 : f32 to vector<8x128xf32>
    %224 = arith.addf %222, %223 : vector<8x128xf32>
    %225 = arith.mulf %218, %196 : vector<8x128xf32>
    %226 = arith.mulf %213, %219 : vector<8x128xf32>
    %227 = arith.addf %225, %226 : vector<8x128xf32>
    %228 = math.tanh %227 : vector<8x128xf32>
    %229 = arith.mulf %224, %228 : vector<8x128xf32>
    %230 = arith.truncf %229 : vector<8x128xf32> to vector<8x128xbf16>
    %c7_i32 = arith.constant 7 : i32
    %c8_i32_90 = arith.constant 8 : i32
    %231 = arith.muli %c7_i32, %c8_i32_90 : i32
    %232 = tpu.assume_multiple %231, 8 : i32
    %233 = arith.index_cast %232 : i32 to index
    %c0_91 = arith.constant 0 : index
    %234 = vector.load %arg11[%233, %c0_91] : memref<64x512xbf16, #tpu.memory_space<vmem>>, vector<8x512xbf16>
    %c0_92 = arith.constant 0 : index
    %c0_93 = arith.constant 0 : index
    %235 = vector.load %arg4[%c0_92, %c0_93] : memref<128x512xbf16, #tpu.memory_space<vmem>>, vector<128x512xbf16>
    %cst_94 = arith.constant dense<0.000000e+00> : vector<8x512xf32>
    %236 = tpu.matmul %230, %235, %cst_94 {dimension_numbers = #tpu.dot_dimension_numbers<[1], [0], [0], [1], [0, 0, 1, 1], [], []>} : vector<8x128xbf16>, vector<128x512xbf16>, vector<8x512xf32> -> vector<8x512xf32>
    %237 = arith.extf %234 : vector<8x512xbf16> to vector<8x512xf32>
    %238 = arith.addf %237, %236 : vector<8x512xf32>
    %239 = math.tanh %238 : vector<8x512xf32>
    %240 = vector.extract_strided_slice %239 {offsets = [0, 0], sizes = [8, 128], strides = [1, 1]} : vector<8x512xf32> to vector<8x128xf32>
    %cst_95 = arith.constant 5.000000e-01 : f32
    %241 = vector.broadcast %cst_95 : f32 to vector<8x128xf32>
    %242 = arith.mulf %240, %241 : vector<8x128xf32>
    %cst_96 = arith.constant 5.000000e-01 : f32
    %243 = vector.broadcast %cst_96 : f32 to vector<8x128xf32>
    %244 = arith.addf %242, %243 : vector<8x128xf32>
    %245 = vector.extract_strided_slice %239 {offsets = [0, 128], sizes = [8, 128], strides = [1, 1]} : vector<8x512xf32> to vector<8x128xf32>
    %cst_97 = arith.constant 5.000000e-01 : f32
    %246 = vector.broadcast %cst_97 : f32 to vector<8x128xf32>
    %247 = arith.mulf %245, %246 : vector<8x128xf32>
    %cst_98 = arith.constant 5.000000e-01 : f32
    %248 = vector.broadcast %cst_98 : f32 to vector<8x128xf32>
    %249 = arith.addf %247, %248 : vector<8x128xf32>
    %250 = vector.extract_strided_slice %239 {offsets = [0, 256], sizes = [8, 128], strides = [1, 1]} : vector<8x512xf32> to vector<8x128xf32>
    %251 = vector.extract_strided_slice %239 {offsets = [0, 384], sizes = [8, 128], strides = [1, 1]} : vector<8x512xf32> to vector<8x128xf32>
    %cst_99 = arith.constant 5.000000e-01 : f32
    %252 = vector.broadcast %cst_99 : f32 to vector<8x128xf32>
    %253 = arith.mulf %251, %252 : vector<8x128xf32>
    %cst_100 = arith.constant 5.000000e-01 : f32
    %254 = vector.broadcast %cst_100 : f32 to vector<8x128xf32>
    %255 = arith.addf %253, %254 : vector<8x128xf32>
    %256 = arith.mulf %249, %227 : vector<8x128xf32>
    %257 = arith.mulf %244, %250 : vector<8x128xf32>
    %258 = arith.addf %256, %257 : vector<8x128xf32>
    %259 = math.tanh %258 : vector<8x128xf32>
    %260 = arith.mulf %255, %259 : vector<8x128xf32>
    %261 = arith.truncf %260 : vector<8x128xf32> to vector<8x128xbf16>
    %c8_i32_101 = arith.constant 8 : i32
    %c0_102 = arith.constant 0 : index
    %c0_103 = arith.constant 0 : index
    %262 = vector.load %arg9[%c0_102, %c0_103] : memref<8x128xbf16, #tpu.memory_space<vmem>>, vector<8x128xbf16>
    tpu.vector_store %arg9[%c0_102, %c0_103], %261 {strides = array<i32>} : memref<8x128xbf16, #tpu.memory_space<vmem>>, vector<8x128xbf16>,
    %c0_104 = arith.constant 0 : index
    %c0_105 = arith.constant 0 : index
    %263 = vector.load %arg10[%c0_104, %c0_105] : memref<8x128xf32, #tpu.memory_space<vmem>>, vector<8x128xf32>
    tpu.vector_store %arg10[%c0_104, %c0_105], %258 {strides = array<i32>} : memref<8x128xf32, #tpu.memory_space<vmem>>, vector<8x128xf32>,
    %c0_i32_106 = arith.constant 0 : i32
    %264 = arith.cmpi eq, %arg1, %c0_i32_106 : i32
    %265 = arith.extui %264 : i1 to i32
    %c0_i32_107 = arith.constant 0 : i32
    %266 = arith.cmpi ne, %265, %c0_i32_107 : i32
    scf.if %266 {
      %c0_108 = arith.constant 0 : index
      %c0_109 = arith.constant 0 : index
      %267 = vector.load %arg6[%c0_108, %c0_109] : memref<128x1xbf16, #tpu.memory_space<vmem>>, vector<128x1xbf16>
      %cst_110 = arith.constant dense<0.000000e+00> : vector<8x1xf32>
      %268 = tpu.matmul %261, %267, %cst_110 {dimension_numbers = #tpu.dot_dimension_numbers<[1], [0], [0], [1], [0, 0, 1, 1], [], []>} : vector<8x128xbf16>, vector<128x1xbf16>, vector<8x1xf32> -> vector<8x1xf32>
      %c0_111 = arith.constant 0 : index
      %c0_112 = arith.constant 0 : index
      %269 = vector.load %arg7[%c0_111, %c0_112] : memref<1x1xf32, #tpu.memory_space<vmem>>, vector<1x1xf32>
      %270 = vector.broadcast %269 : vector<1x1xf32> to vector<8x1xf32>
      %271 = arith.addf %268, %270 : vector<8x1xf32>
      %cst_113 = arith.constant 5.000000e-01 : f32
      %272 = vector.broadcast %cst_113 : f32 to vector<8x1xf32>
      %273 = arith.mulf %272, %271 : vector<8x1xf32>
      %274 = math.tanh %273 : vector<8x1xf32>
      %cst_114 = arith.constant 5.000000e-01 : f32
      %275 = vector.broadcast %cst_114 : f32 to vector<8x1xf32>
      %276 = arith.mulf %275, %274 : vector<8x1xf32>
      %cst_115 = arith.constant 5.000000e-01 : f32
      %277 = vector.broadcast %cst_115 : f32 to vector<8x1xf32>
      %278 = arith.addf %276, %277 : vector<8x1xf32>
      %c0_116 = arith.constant 0 : index
      %c0_117 = arith.constant 0 : index
      %279 = vector.load %arg8[%c0_116, %c0_117] : memref<8x1xf32, #tpu.memory_space<vmem>>, vector<8x1xf32>
      tpu.vector_store %arg8[%c0_116, %c0_117], %278 {strides = array<i32>} : memref<8x1xf32, #tpu.memory_space<vmem>>, vector<8x1xf32>,
    } else {
    }
    return
  }
  func.func @transform_0(%arg0: i32, %arg1: i32) -> (i32, i32, i32) {
    %c0_i32 = arith.constant 0 : i32
    %c0_i32_0 = arith.constant 0 : i32
    return %arg0, %arg1, %c0_i32 : i32, i32, i32
  }
  func.func @transform_1(%arg0: i32, %arg1: i32) -> (i32, i32) {
    %c0_i32 = arith.constant 0 : i32
    %c0_i32_0 = arith.constant 0 : i32
    %c0_i32_1 = arith.constant 0 : i32
    return %c0_i32, %c0_i32_0 : i32, i32
  }
  func.func @transform_2(%arg0: i32, %arg1: i32) -> (i32, i32) {
    %c0_i32 = arith.constant 0 : i32
    %c0_i32_0 = arith.constant 0 : i32
    %c0_i32_1 = arith.constant 0 : i32
    return %c0_i32, %c0_i32_0 : i32, i32
  }
  func.func @transform_3(%arg0: i32, %arg1: i32) -> (i32, i32) {
    %c0_i32 = arith.constant 0 : i32
    %c0_i32_0 = arith.constant 0 : i32
    %c0_i32_1 = arith.constant 0 : i32
    return %c0_i32, %c0_i32_0 : i32, i32
  }
  func.func @transform_4(%arg0: i32, %arg1: i32) -> (i32, i32) {
    %c0_i32 = arith.constant 0 : i32
    %c0_i32_0 = arith.constant 0 : i32
    %c0_i32_1 = arith.constant 0 : i32
    return %c0_i32, %c0_i32_0 : i32, i32
  }
  func.func @transform_5(%arg0: i32, %arg1: i32) -> (i32, i32) {
    %c0_i32 = arith.constant 0 : i32
    %c0_i32_0 = arith.constant 0 : i32
    %c0_i32_1 = arith.constant 0 : i32
    return %c0_i32, %c0_i32_0 : i32, i32
  }
  func.func @transform_6(%arg0: i32, %arg1: i32) -> (i32, i32) {
    %c0_i32 = arith.constant 0 : i32
    %c0_i32_0 = arith.constant 0 : i32
    return %arg0, %c0_i32 : i32, i32
  }
}

module attributes {stable_mosaic.version = 11 : i64} {
  func.func @kernel(%arg0: i32, %arg1: i32, %arg2: memref<1x64x4xbf16, #tpu.memory_space<vmem>>, %arg3: memref<4x512xbf16, #tpu.memory_space<vmem>>, %arg4: memref<128x512xbf16, #tpu.memory_space<vmem>>, %arg5: memref<1x512xf32, #tpu.memory_space<vmem>>, %arg6: memref<128x1xbf16, #tpu.memory_space<vmem>>, %arg7: memref<1x1xf32, #tpu.memory_space<vmem>>, %arg8: memref<8x1xf32, #tpu.memory_space<vmem>>, %arg9: memref<8x128xbf16, #tpu.memory_space<vmem>>, %arg10: memref<8x128xf32, #tpu.memory_space<vmem>>, %arg11: memref<64x512xbf16, #tpu.memory_space<vmem>>) attributes {dimension_semantics = [#tpu.dimension_semantics<parallel>, #tpu.dimension_semantics<arbitrary>], iteration_bounds = array<i64: 1, 1>, scalar_prefetch = 0 : i64, scratch_operands = 3 : i64, tpu.core_type = #tpu.core_type<tc>, window_params = [{transform_indices = @transform_0, window_bounds = array<i64: 1, 64, 4>}, {pipeline_mode = #tpu.pipeline_mode<synchronous>, transform_indices = @transform_1, window_bounds = array<i64: 4, 512>}, {pipeline_mode = #tpu.pipeline_mode<synchronous>, transform_indices = @transform_2, window_bounds = array<i64: 128, 512>}, {pipeline_mode = #tpu.pipeline_mode<synchronous>, transform_indices = @transform_3, window_bounds = array<i64: 1, 512>}, {pipeline_mode = #tpu.pipeline_mode<synchronous>, transform_indices = @transform_4, window_bounds = array<i64: 128, 1>}, {pipeline_mode = #tpu.pipeline_mode<synchronous>, transform_indices = @transform_5, window_bounds = array<i64: 1, 1>}, {transform_indices = @transform_6, window_bounds = array<i64: 8, 1>}]} {
    %c0_i32 = arith.constant 0 : i32
    %0 = arith.cmpi eq, %arg1, %c0_i32 : i32
    %1 = arith.extui %0 : i1 to i32
    %c0_i32_0 = arith.constant 0 : i32
    %2 = arith.cmpi ne, %1, %c0_i32_0 : i32
    scf.if %2 {
      %cst_108 = arith.constant 0.000000e+00 : bf16
      %267 = vector.broadcast %cst_108 : bf16 to vector<8x128xbf16>
      %c0_109 = arith.constant 0 : index
      %c0_110 = arith.constant 0 : index
      %268 = vector.load %arg9[%c0_109, %c0_110] : memref<8x128xbf16, #tpu.memory_space<vmem>>, vector<8x128xbf16>
      tpu.vector_store %arg9[%c0_109, %c0_110], %267 {strides = array<i32>} : memref<8x128xbf16, #tpu.memory_space<vmem>>, vector<8x128xbf16>,
      %cst_111 = arith.constant 0.000000e+00 : f32
      %269 = vector.broadcast %cst_111 : f32 to vector<8x128xf32>
      %c0_112 = arith.constant 0 : index
      %c0_113 = arith.constant 0 : index
      %270 = vector.load %arg10[%c0_112, %c0_113] : memref<8x128xf32, #tpu.memory_space<vmem>>, vector<8x128xf32>
      tpu.vector_store %arg10[%c0_112, %c0_113], %269 {strides = array<i32>} : memref<8x128xf32, #tpu.memory_space<vmem>>, vector<8x128xf32>,
    } else {
    }
    %c0 = arith.constant 0 : index
    %c0_1 = arith.constant 0 : index
    %c0_2 = arith.constant 0 : index
    %3 = vector.load %arg2[%c0, %c0_1, %c0_2] : memref<1x64x4xbf16, #tpu.memory_space<vmem>>, vector<1x64x4xbf16>
    %4 = vector.shape_cast %3 : vector<1x64x4xbf16> to vector<64x4xbf16>
    %c0_3 = arith.constant 0 : index
    %c0_4 = arith.constant 0 : index
    %5 = vector.load %arg3[%c0_3, %c0_4] : memref<4x512xbf16, #tpu.memory_space<vmem>>, vector<4x512xbf16>
    %cst = arith.constant dense<0.000000e+00> : vector<64x512xf32>
    %6 = tpu.matmul %4, %5, %cst {dimension_numbers = #tpu.dot_dimension_numbers<[1], [0], [0], [1], [0, 0, 1, 1], [], []>} : vector<64x4xbf16>, vector<4x512xbf16>, vector<64x512xf32> -> vector<64x512xf32>
    %c0_5 = arith.constant 0 : index
    %c0_6 = arith.constant 0 : index
    %7 = vector.load %arg5[%c0_5, %c0_6] : memref<1x512xf32, #tpu.memory_space<vmem>>, vector<1x512xf32>
    %8 = vector.broadcast %7 : vector<1x512xf32> to vector<64x512xf32>
    %9 = arith.addf %6, %8 : vector<64x512xf32>
    %10 = arith.truncf %9 : vector<64x512xf32> to vector<64x512xbf16>
    %c0_7 = arith.constant 0 : index
    %c0_8 = arith.constant 0 : index
    %11 = vector.load %arg11[%c0_7, %c0_8] : memref<64x512xbf16, #tpu.memory_space<vmem>>, vector<64x512xbf16>
    tpu.vector_store %arg11[%c0_7, %c0_8], %10 {strides = array<i32>} : memref<64x512xbf16, #tpu.memory_space<vmem>>, vector<64x512xbf16>,
    %c0_9 = arith.constant 0 : index
    %c0_10 = arith.constant 0 : index
    %12 = vector.load %arg9[%c0_9, %c0_10] : memref<8x128xbf16, #tpu.memory_space<vmem>>, vector<8x128xbf16>
    %c0_11 = arith.constant 0 : index
    %c0_12 = arith.constant 0 : index
    %13 = vector.load %arg10[%c0_11, %c0_12] : memref<8x128xf32, #tpu.memory_space<vmem>>, vector<8x128xf32>
    %c0_i32_13 = arith.constant 0 : i32
    %c8_i32 = arith.constant 8 : i32
    %14 = arith.muli %c0_i32_13, %c8_i32 : i32
    %15 = tpu.assume_multiple %14, 8 : i32
    %16 = arith.index_cast %15 : i32 to index
    %c0_14 = arith.constant 0 : index
    %17 = vector.load %arg11[%16, %c0_14] : memref<64x512xbf16, #tpu.memory_space<vmem>>, vector<8x512xbf16>
    %c0_15 = arith.constant 0 : index
    %c0_16 = arith.constant 0 : index
    %18 = vector.load %arg4[%c0_15, %c0_16] : memref<128x512xbf16, #tpu.memory_space<vmem>>, vector<128x512xbf16>
    %cst_17 = arith.constant dense<0.000000e+00> : vector<8x512xf32>
    %19 = tpu.matmul %12, %18, %cst_17 {dimension_numbers = #tpu.dot_dimension_numbers<[1], [0], [0], [1], [0, 0, 1, 1], [], []>} : vector<8x128xbf16>, vector<128x512xbf16>, vector<8x512xf32> -> vector<8x512xf32>
    %20 = arith.extf %17 : vector<8x512xbf16> to vector<8x512xf32>
    %21 = arith.addf %20, %19 : vector<8x512xf32>
    %22 = math.tanh %21 : vector<8x512xf32>
    %23 = vector.extract_strided_slice %22 {offsets = [0, 0], sizes = [8, 128], strides = [1, 1]} : vector<8x512xf32> to vector<8x128xf32>
    %cst_18 = arith.constant 5.000000e-01 : f32
    %24 = vector.broadcast %cst_18 : f32 to vector<8x128xf32>
    %25 = arith.mulf %23, %24 : vector<8x128xf32>
    %cst_19 = arith.constant 5.000000e-01 : f32
    %26 = vector.broadcast %cst_19 : f32 to vector<8x128xf32>
    %27 = arith.addf %25, %26 : vector<8x128xf32>
    %28 = vector.extract_strided_slice %22 {offsets = [0, 128], sizes = [8, 128], strides = [1, 1]} : vector<8x512xf32> to vector<8x128xf32>
    %cst_20 = arith.constant 5.000000e-01 : f32
    %29 = vector.broadcast %cst_20 : f32 to vector<8x128xf32>
    %30 = arith.mulf %28, %29 : vector<8x128xf32>
    %cst_21 = arith.constant 5.000000e-01 : f32
    %31 = vector.broadcast %cst_21 : f32 to vector<8x128xf32>
    %32 = arith.addf %30, %31 : vector<8x128xf32>
    %33 = vector.extract_strided_slice %22 {offsets = [0, 256], sizes = [8, 128], strides = [1, 1]} : vector<8x512xf32> to vector<8x128xf32>
    %34 = vector.extract_strided_slice %22 {offsets = [0, 384], sizes = [8, 128], strides = [1, 1]} : vector<8x512xf32> to vector<8x128xf32>
    %cst_22 = arith.constant 5.000000e-01 : f32
    %35 = vector.broadcast %cst_22 : f32 to vector<8x128xf32>
    %36 = arith.mulf %34, %35 : vector<8x128xf32>
    %cst_23 = arith.constant 5.000000e-01 : f32
    %37 = vector.broadcast %cst_23 : f32 to vector<8x128xf32>
    %38 = arith.addf %36, %37 : vector<8x128xf32>
    %39 = arith.mulf %32, %13 : vector<8x128xf32>
    %40 = arith.mulf %27, %33 : vector<8x128xf32>
    %41 = arith.addf %39, %40 : vector<8x128xf32>
    %42 = math.tanh %41 : vector<8x128xf32>
    %43 = arith.mulf %38, %42 : vector<8x128xf32>
    %44 = arith.truncf %43 : vector<8x128xf32> to vector<8x128xbf16>
    %c1_i32 = arith.constant 1 : i32
    %c8_i32_24 = arith.constant 8 : i32
    %45 = arith.muli %c1_i32, %c8_i32_24 : i32
    %46 = tpu.assume_multiple %45, 8 : i32
    %47 = arith.index_cast %46 : i32 to index
    %c0_25 = arith.constant 0 : index
    %48 = vector.load %arg11[%47, %c0_25] : memref<64x512xbf16, #tpu.memory_space<vmem>>, vector<8x512xbf16>
    %c0_26 = arith.constant 0 : index
    %c0_27 = arith.constant 0 : index
    %49 = vector.load %arg4[%c0_26, %c0_27] : memref<128x512xbf16, #tpu.memory_space<vmem>>, vector<128x512xbf16>
    %cst_28 = arith.constant dense<0.000000e+00> : vector<8x512xf32>
    %50 = tpu.matmul %44, %49, %cst_28 {dimension_numbers = #tpu.dot_dimension_numbers<[1], [0], [0], [1], [0, 0, 1, 1], [], []>} : vector<8x128xbf16>, vector<128x512xbf16>, vector<8x512xf32> -> vector<8x512xf32>
    %51 = arith.extf %48 : vector<8x512xbf16> to vector<8x512xf32>
    %52 = arith.addf %51, %50 : vector<8x512xf32>
    %53 = math.tanh %52 : vector<8x512xf32>
    %54 = vector.extract_strided_slice %53 {offsets = [0, 0], sizes = [8, 128], strides = [1, 1]} : vector<8x512xf32> to vector<8x128xf32>
    %cst_29 = arith.constant 5.000000e-01 : f32
    %55 = vector.broadcast %cst_29 : f32 to vector<8x128xf32>
    %56 = arith.mulf %54, %55 : vector<8x128xf32>
    %cst_30 = arith.constant 5.000000e-01 : f32
    %57 = vector.broadcast %cst_30 : f32 to vector<8x128xf32>
    %58 = arith.addf %56, %57 : vector<8x128xf32>
    %59 = vector.extract_strided_slice %53 {offsets = [0, 128], sizes = [8, 128], strides = [1, 1]} : vector<8x512xf32> to vector<8x128xf32>
    %cst_31 = arith.constant 5.000000e-01 : f32
    %60 = vector.broadcast %cst_31 : f32 to vector<8x128xf32>
    %61 = arith.mulf %59, %60 : vector<8x128xf32>
    %cst_32 = arith.constant 5.000000e-01 : f32
    %62 = vector.broadcast %cst_32 : f32 to vector<8x128xf32>
    %63 = arith.addf %61, %62 : vector<8x128xf32>
    %64 = vector.extract_strided_slice %53 {offsets = [0, 256], sizes = [8, 128], strides = [1, 1]} : vector<8x512xf32> to vector<8x128xf32>
    %65 = vector.extract_strided_slice %53 {offsets = [0, 384], sizes = [8, 128], strides = [1, 1]} : vector<8x512xf32> to vector<8x128xf32>
    %cst_33 = arith.constant 5.000000e-01 : f32
    %66 = vector.broadcast %cst_33 : f32 to vector<8x128xf32>
    %67 = arith.mulf %65, %66 : vector<8x128xf32>
    %cst_34 = arith.constant 5.000000e-01 : f32
    %68 = vector.broadcast %cst_34 : f32 to vector<8x128xf32>
    %69 = arith.addf %67, %68 : vector<8x128xf32>
    %70 = arith.mulf %63, %41 : vector<8x128xf32>
    %71 = arith.mulf %58, %64 : vector<8x128xf32>
    %72 = arith.addf %70, %71 : vector<8x128xf32>
    %73 = math.tanh %72 : vector<8x128xf32>
    %74 = arith.mulf %69, %73 : vector<8x128xf32>
    %75 = arith.truncf %74 : vector<8x128xf32> to vector<8x128xbf16>
    %c2_i32 = arith.constant 2 : i32
    %c8_i32_35 = arith.constant 8 : i32
    %76 = arith.muli %c2_i32, %c8_i32_35 : i32
    %77 = tpu.assume_multiple %76, 8 : i32
    %78 = arith.index_cast %77 : i32 to index
    %c0_36 = arith.constant 0 : index
    %79 = vector.load %arg11[%78, %c0_36] : memref<64x512xbf16, #tpu.memory_space<vmem>>, vector<8x512xbf16>
    %c0_37 = arith.constant 0 : index
    %c0_38 = arith.constant 0 : index
    %80 = vector.load %arg4[%c0_37, %c0_38] : memref<128x512xbf16, #tpu.memory_space<vmem>>, vector<128x512xbf16>
    %cst_39 = arith.constant dense<0.000000e+00> : vector<8x512xf32>
    %81 = tpu.matmul %75, %80, %cst_39 {dimension_numbers = #tpu.dot_dimension_numbers<[1], [0], [0], [1], [0, 0, 1, 1], [], []>} : vector<8x128xbf16>, vector<128x512xbf16>, vector<8x512xf32> -> vector<8x512xf32>
    %82 = arith.extf %79 : vector<8x512xbf16> to vector<8x512xf32>
    %83 = arith.addf %82, %81 : vector<8x512xf32>
    %84 = math.tanh %83 : vector<8x512xf32>
    %85 = vector.extract_strided_slice %84 {offsets = [0, 0], sizes = [8, 128], strides = [1, 1]} : vector<8x512xf32> to vector<8x128xf32>
    %cst_40 = arith.constant 5.000000e-01 : f32
    %86 = vector.broadcast %cst_40 : f32 to vector<8x128xf32>
    %87 = arith.mulf %85, %86 : vector<8x128xf32>
    %cst_41 = arith.constant 5.000000e-01 : f32
    %88 = vector.broadcast %cst_41 : f32 to vector<8x128xf32>
    %89 = arith.addf %87, %88 : vector<8x128xf32>
    %90 = vector.extract_strided_slice %84 {offsets = [0, 128], sizes = [8, 128], strides = [1, 1]} : vector<8x512xf32> to vector<8x128xf32>
    %cst_42 = arith.constant 5.000000e-01 : f32
    %91 = vector.broadcast %cst_42 : f32 to vector<8x128xf32>
    %92 = arith.mulf %90, %91 : vector<8x128xf32>
    %cst_43 = arith.constant 5.000000e-01 : f32
    %93 = vector.broadcast %cst_43 : f32 to vector<8x128xf32>
    %94 = arith.addf %92, %93 : vector<8x128xf32>
    %95 = vector.extract_strided_slice %84 {offsets = [0, 256], sizes = [8, 128], strides = [1, 1]} : vector<8x512xf32> to vector<8x128xf32>
    %96 = vector.extract_strided_slice %84 {offsets = [0, 384], sizes = [8, 128], strides = [1, 1]} : vector<8x512xf32> to vector<8x128xf32>
    %cst_44 = arith.constant 5.000000e-01 : f32
    %97 = vector.broadcast %cst_44 : f32 to vector<8x128xf32>
    %98 = arith.mulf %96, %97 : vector<8x128xf32>
    %cst_45 = arith.constant 5.000000e-01 : f32
    %99 = vector.broadcast %cst_45 : f32 to vector<8x128xf32>
    %100 = arith.addf %98, %99 : vector<8x128xf32>
    %101 = arith.mulf %94, %72 : vector<8x128xf32>
    %102 = arith.mulf %89, %95 : vector<8x128xf32>
    %103 = arith.addf %101, %102 : vector<8x128xf32>
    %104 = math.tanh %103 : vector<8x128xf32>
    %105 = arith.mulf %100, %104 : vector<8x128xf32>
    %106 = arith.truncf %105 : vector<8x128xf32> to vector<8x128xbf16>
    %c3_i32 = arith.constant 3 : i32
    %c8_i32_46 = arith.constant 8 : i32
    %107 = arith.muli %c3_i32, %c8_i32_46 : i32
    %108 = tpu.assume_multiple %107, 8 : i32
    %109 = arith.index_cast %108 : i32 to index
    %c0_47 = arith.constant 0 : index
    %110 = vector.load %arg11[%109, %c0_47] : memref<64x512xbf16, #tpu.memory_space<vmem>>, vector<8x512xbf16>
    %c0_48 = arith.constant 0 : index
    %c0_49 = arith.constant 0 : index
    %111 = vector.load %arg4[%c0_48, %c0_49] : memref<128x512xbf16, #tpu.memory_space<vmem>>, vector<128x512xbf16>
    %cst_50 = arith.constant dense<0.000000e+00> : vector<8x512xf32>
    %112 = tpu.matmul %106, %111, %cst_50 {dimension_numbers = #tpu.dot_dimension_numbers<[1], [0], [0], [1], [0, 0, 1, 1], [], []>} : vector<8x128xbf16>, vector<128x512xbf16>, vector<8x512xf32> -> vector<8x512xf32>
    %113 = arith.extf %110 : vector<8x512xbf16> to vector<8x512xf32>
    %114 = arith.addf %113, %112 : vector<8x512xf32>
    %115 = math.tanh %114 : vector<8x512xf32>
    %116 = vector.extract_strided_slice %115 {offsets = [0, 0], sizes = [8, 128], strides = [1, 1]} : vector<8x512xf32> to vector<8x128xf32>
    %cst_51 = arith.constant 5.000000e-01 : f32
    %117 = vector.broadcast %cst_51 : f32 to vector<8x128xf32>
    %118 = arith.mulf %116, %117 : vector<8x128xf32>
    %cst_52 = arith.constant 5.000000e-01 : f32
    %119 = vector.broadcast %cst_52 : f32 to vector<8x128xf32>
    %120 = arith.addf %118, %119 : vector<8x128xf32>
    %121 = vector.extract_strided_slice %115 {offsets = [0, 128], sizes = [8, 128], strides = [1, 1]} : vector<8x512xf32> to vector<8x128xf32>
    %cst_53 = arith.constant 5.000000e-01 : f32
    %122 = vector.broadcast %cst_53 : f32 to vector<8x128xf32>
    %123 = arith.mulf %121, %122 : vector<8x128xf32>
    %cst_54 = arith.constant 5.000000e-01 : f32
    %124 = vector.broadcast %cst_54 : f32 to vector<8x128xf32>
    %125 = arith.addf %123, %124 : vector<8x128xf32>
    %126 = vector.extract_strided_slice %115 {offsets = [0, 256], sizes = [8, 128], strides = [1, 1]} : vector<8x512xf32> to vector<8x128xf32>
    %127 = vector.extract_strided_slice %115 {offsets = [0, 384], sizes = [8, 128], strides = [1, 1]} : vector<8x512xf32> to vector<8x128xf32>
    %cst_55 = arith.constant 5.000000e-01 : f32
    %128 = vector.broadcast %cst_55 : f32 to vector<8x128xf32>
    %129 = arith.mulf %127, %128 : vector<8x128xf32>
    %cst_56 = arith.constant 5.000000e-01 : f32
    %130 = vector.broadcast %cst_56 : f32 to vector<8x128xf32>
    %131 = arith.addf %129, %130 : vector<8x128xf32>
    %132 = arith.mulf %125, %103 : vector<8x128xf32>
    %133 = arith.mulf %120, %126 : vector<8x128xf32>
    %134 = arith.addf %132, %133 : vector<8x128xf32>
    %135 = math.tanh %134 : vector<8x128xf32>
    %136 = arith.mulf %131, %135 : vector<8x128xf32>
    %137 = arith.truncf %136 : vector<8x128xf32> to vector<8x128xbf16>
    %c4_i32 = arith.constant 4 : i32
    %c8_i32_57 = arith.constant 8 : i32
    %138 = arith.muli %c4_i32, %c8_i32_57 : i32
    %139 = tpu.assume_multiple %138, 8 : i32
    %140 = arith.index_cast %139 : i32 to index
    %c0_58 = arith.constant 0 : index
    %141 = vector.load %arg11[%140, %c0_58] : memref<64x512xbf16, #tpu.memory_space<vmem>>, vector<8x512xbf16>
    %c0_59 = arith.constant 0 : index
    %c0_60 = arith.constant 0 : index
    %142 = vector.load %arg4[%c0_59, %c0_60] : memref<128x512xbf16, #tpu.memory_space<vmem>>, vector<128x512xbf16>
    %cst_61 = arith.constant dense<0.000000e+00> : vector<8x512xf32>
    %143 = tpu.matmul %137, %142, %cst_61 {dimension_numbers = #tpu.dot_dimension_numbers<[1], [0], [0], [1], [0, 0, 1, 1], [], []>} : vector<8x128xbf16>, vector<128x512xbf16>, vector<8x512xf32> -> vector<8x512xf32>
    %144 = arith.extf %141 : vector<8x512xbf16> to vector<8x512xf32>
    %145 = arith.addf %144, %143 : vector<8x512xf32>
    %146 = math.tanh %145 : vector<8x512xf32>
    %147 = vector.extract_strided_slice %146 {offsets = [0, 0], sizes = [8, 128], strides = [1, 1]} : vector<8x512xf32> to vector<8x128xf32>
    %cst_62 = arith.constant 5.000000e-01 : f32
    %148 = vector.broadcast %cst_62 : f32 to vector<8x128xf32>
    %149 = arith.mulf %147, %148 : vector<8x128xf32>
    %cst_63 = arith.constant 5.000000e-01 : f32
    %150 = vector.broadcast %cst_63 : f32 to vector<8x128xf32>
    %151 = arith.addf %149, %150 : vector<8x128xf32>
    %152 = vector.extract_strided_slice %146 {offsets = [0, 128], sizes = [8, 128], strides = [1, 1]} : vector<8x512xf32> to vector<8x128xf32>
    %cst_64 = arith.constant 5.000000e-01 : f32
    %153 = vector.broadcast %cst_64 : f32 to vector<8x128xf32>
    %154 = arith.mulf %152, %153 : vector<8x128xf32>
    %cst_65 = arith.constant 5.000000e-01 : f32
    %155 = vector.broadcast %cst_65 : f32 to vector<8x128xf32>
    %156 = arith.addf %154, %155 : vector<8x128xf32>
    %157 = vector.extract_strided_slice %146 {offsets = [0, 256], sizes = [8, 128], strides = [1, 1]} : vector<8x512xf32> to vector<8x128xf32>
    %158 = vector.extract_strided_slice %146 {offsets = [0, 384], sizes = [8, 128], strides = [1, 1]} : vector<8x512xf32> to vector<8x128xf32>
    %cst_66 = arith.constant 5.000000e-01 : f32
    %159 = vector.broadcast %cst_66 : f32 to vector<8x128xf32>
    %160 = arith.mulf %158, %159 : vector<8x128xf32>
    %cst_67 = arith.constant 5.000000e-01 : f32
    %161 = vector.broadcast %cst_67 : f32 to vector<8x128xf32>
    %162 = arith.addf %160, %161 : vector<8x128xf32>
    %163 = arith.mulf %156, %134 : vector<8x128xf32>
    %164 = arith.mulf %151, %157 : vector<8x128xf32>
    %165 = arith.addf %163, %164 : vector<8x128xf32>
    %166 = math.tanh %165 : vector<8x128xf32>
    %167 = arith.mulf %162, %166 : vector<8x128xf32>
    %168 = arith.truncf %167 : vector<8x128xf32> to vector<8x128xbf16>
    %c5_i32 = arith.constant 5 : i32
    %c8_i32_68 = arith.constant 8 : i32
    %169 = arith.muli %c5_i32, %c8_i32_68 : i32
    %170 = tpu.assume_multiple %169, 8 : i32
    %171 = arith.index_cast %170 : i32 to index
    %c0_69 = arith.constant 0 : index
    %172 = vector.load %arg11[%171, %c0_69] : memref<64x512xbf16, #tpu.memory_space<vmem>>, vector<8x512xbf16>
    %c0_70 = arith.constant 0 : index
    %c0_71 = arith.constant 0 : index
    %173 = vector.load %arg4[%c0_70, %c0_71] : memref<128x512xbf16, #tpu.memory_space<vmem>>, vector<128x512xbf16>
    %cst_72 = arith.constant dense<0.000000e+00> : vector<8x512xf32>
    %174 = tpu.matmul %168, %173, %cst_72 {dimension_numbers = #tpu.dot_dimension_numbers<[1], [0], [0], [1], [0, 0, 1, 1], [], []>} : vector<8x128xbf16>, vector<128x512xbf16>, vector<8x512xf32> -> vector<8x512xf32>
    %175 = arith.extf %172 : vector<8x512xbf16> to vector<8x512xf32>
    %176 = arith.addf %175, %174 : vector<8x512xf32>
    %177 = math.tanh %176 : vector<8x512xf32>
    %178 = vector.extract_strided_slice %177 {offsets = [0, 0], sizes = [8, 128], strides = [1, 1]} : vector<8x512xf32> to vector<8x128xf32>
    %cst_73 = arith.constant 5.000000e-01 : f32
    %179 = vector.broadcast %cst_73 : f32 to vector<8x128xf32>
    %180 = arith.mulf %178, %179 : vector<8x128xf32>
    %cst_74 = arith.constant 5.000000e-01 : f32
    %181 = vector.broadcast %cst_74 : f32 to vector<8x128xf32>
    %182 = arith.addf %180, %181 : vector<8x128xf32>
    %183 = vector.extract_strided_slice %177 {offsets = [0, 128], sizes = [8, 128], strides = [1, 1]} : vector<8x512xf32> to vector<8x128xf32>
    %cst_75 = arith.constant 5.000000e-01 : f32
    %184 = vector.broadcast %cst_75 : f32 to vector<8x128xf32>
    %185 = arith.mulf %183, %184 : vector<8x128xf32>
    %cst_76 = arith.constant 5.000000e-01 : f32
    %186 = vector.broadcast %cst_76 : f32 to vector<8x128xf32>
    %187 = arith.addf %185, %186 : vector<8x128xf32>
    %188 = vector.extract_strided_slice %177 {offsets = [0, 256], sizes = [8, 128], strides = [1, 1]} : vector<8x512xf32> to vector<8x128xf32>
    %189 = vector.extract_strided_slice %177 {offsets = [0, 384], sizes = [8, 128], strides = [1, 1]} : vector<8x512xf32> to vector<8x128xf32>
    %cst_77 = arith.constant 5.000000e-01 : f32
    %190 = vector.broadcast %cst_77 : f32 to vector<8x128xf32>
    %191 = arith.mulf %189, %190 : vector<8x128xf32>
    %cst_78 = arith.constant 5.000000e-01 : f32
    %192 = vector.broadcast %cst_78 : f32 to vector<8x128xf32>
    %193 = arith.addf %191, %192 : vector<8x128xf32>
    %194 = arith.mulf %187, %165 : vector<8x128xf32>
    %195 = arith.mulf %182, %188 : vector<8x128xf32>
    %196 = arith.addf %194, %195 : vector<8x128xf32>
    %197 = math.tanh %196 : vector<8x128xf32>
    %198 = arith.mulf %193, %197 : vector<8x128xf32>
    %199 = arith.truncf %198 : vector<8x128xf32> to vector<8x128xbf16>
    %c6_i32 = arith.constant 6 : i32
    %c8_i32_79 = arith.constant 8 : i32
    %200 = arith.muli %c6_i32, %c8_i32_79 : i32
    %201 = tpu.assume_multiple %200, 8 : i32
    %202 = arith.index_cast %201 : i32 to index
    %c0_80 = arith.constant 0 : index
    %203 = vector.load %arg11[%202, %c0_80] : memref<64x512xbf16, #tpu.memory_space<vmem>>, vector<8x512xbf16>
    %c0_81 = arith.constant 0 : index
    %c0_82 = arith.constant 0 : index
    %204 = vector.load %arg4[%c0_81, %c0_82] : memref<128x512xbf16, #tpu.memory_space<vmem>>, vector<128x512xbf16>
    %cst_83 = arith.constant dense<0.000000e+00> : vector<8x512xf32>
    %205 = tpu.matmul %199, %204, %cst_83 {dimension_numbers = #tpu.dot_dimension_numbers<[1], [0], [0], [1], [0, 0, 1, 1], [], []>} : vector<8x128xbf16>, vector<128x512xbf16>, vector<8x512xf32> -> vector<8x512xf32>
    %206 = arith.extf %203 : vector<8x512xbf16> to vector<8x512xf32>
    %207 = arith.addf %206, %205 : vector<8x512xf32>
    %208 = math.tanh %207 : vector<8x512xf32>
    %209 = vector.extract_strided_slice %208 {offsets = [0, 0], sizes = [8, 128], strides = [1, 1]} : vector<8x512xf32> to vector<8x128xf32>
    %cst_84 = arith.constant 5.000000e-01 : f32
    %210 = vector.broadcast %cst_84 : f32 to vector<8x128xf32>
    %211 = arith.mulf %209, %210 : vector<8x128xf32>
    %cst_85 = arith.constant 5.000000e-01 : f32
    %212 = vector.broadcast %cst_85 : f32 to vector<8x128xf32>
    %213 = arith.addf %211, %212 : vector<8x128xf32>
    %214 = vector.extract_strided_slice %208 {offsets = [0, 128], sizes = [8, 128], strides = [1, 1]} : vector<8x512xf32> to vector<8x128xf32>
    %cst_86 = arith.constant 5.000000e-01 : f32
    %215 = vector.broadcast %cst_86 : f32 to vector<8x128xf32>
    %216 = arith.mulf %214, %215 : vector<8x128xf32>
    %cst_87 = arith.constant 5.000000e-01 : f32
    %217 = vector.broadcast %cst_87 : f32 to vector<8x128xf32>
    %218 = arith.addf %216, %217 : vector<8x128xf32>
    %219 = vector.extract_strided_slice %208 {offsets = [0, 256], sizes = [8, 128], strides = [1, 1]} : vector<8x512xf32> to vector<8x128xf32>
    %220 = vector.extract_strided_slice %208 {offsets = [0, 384], sizes = [8, 128], strides = [1, 1]} : vector<8x512xf32> to vector<8x128xf32>
    %cst_88 = arith.constant 5.000000e-01 : f32
    %221 = vector.broadcast %cst_88 : f32 to vector<8x128xf32>
    %222 = arith.mulf %220, %221 : vector<8x128xf32>
    %cst_89 = arith.constant 5.000000e-01 : f32
    %223 = vector.broadcast %cst_89 : f32 to vector<8x128xf32>
    %224 = arith.addf %222, %223 : vector<8x128xf32>
    %225 = arith.mulf %218, %196 : vector<8x128xf32>
    %226 = arith.mulf %213, %219 : vector<8x128xf32>
    %227 = arith.addf %225, %226 : vector<8x128xf32>
    %228 = math.tanh %227 : vector<8x128xf32>
    %229 = arith.mulf %224, %228 : vector<8x128xf32>
    %230 = arith.truncf %229 : vector<8x128xf32> to vector<8x128xbf16>
    %c7_i32 = arith.constant 7 : i32
    %c8_i32_90 = arith.constant 8 : i32
    %231 = arith.muli %c7_i32, %c8_i32_90 : i32
    %232 = tpu.assume_multiple %231, 8 : i32
    %233 = arith.index_cast %232 : i32 to index
    %c0_91 = arith.constant 0 : index
    %234 = vector.load %arg11[%233, %c0_91] : memref<64x512xbf16, #tpu.memory_space<vmem>>, vector<8x512xbf16>
    %c0_92 = arith.constant 0 : index
    %c0_93 = arith.constant 0 : index
    %235 = vector.load %arg4[%c0_92, %c0_93] : memref<128x512xbf16, #tpu.memory_space<vmem>>, vector<128x512xbf16>
    %cst_94 = arith.constant dense<0.000000e+00> : vector<8x512xf32>
    %236 = tpu.matmul %230, %235, %cst_94 {dimension_numbers = #tpu.dot_dimension_numbers<[1], [0], [0], [1], [0, 0, 1, 1], [], []>} : vector<8x128xbf16>, vector<128x512xbf16>, vector<8x512xf32> -> vector<8x512xf32>
    %237 = arith.extf %234 : vector<8x512xbf16> to vector<8x512xf32>
    %238 = arith.addf %237, %236 : vector<8x512xf32>
    %239 = math.tanh %238 : vector<8x512xf32>
    %240 = vector.extract_strided_slice %239 {offsets = [0, 0], sizes = [8, 128], strides = [1, 1]} : vector<8x512xf32> to vector<8x128xf32>
    %cst_95 = arith.constant 5.000000e-01 : f32
    %241 = vector.broadcast %cst_95 : f32 to vector<8x128xf32>
    %242 = arith.mulf %240, %241 : vector<8x128xf32>
    %cst_96 = arith.constant 5.000000e-01 : f32
    %243 = vector.broadcast %cst_96 : f32 to vector<8x128xf32>
    %244 = arith.addf %242, %243 : vector<8x128xf32>
    %245 = vector.extract_strided_slice %239 {offsets = [0, 128], sizes = [8, 128], strides = [1, 1]} : vector<8x512xf32> to vector<8x128xf32>
    %cst_97 = arith.constant 5.000000e-01 : f32
    %246 = vector.broadcast %cst_97 : f32 to vector<8x128xf32>
    %247 = arith.mulf %245, %246 : vector<8x128xf32>
    %cst_98 = arith.constant 5.000000e-01 : f32
    %248 = vector.broadcast %cst_98 : f32 to vector<8x128xf32>
    %249 = arith.addf %247, %248 : vector<8x128xf32>
    %250 = vector.extract_strided_slice %239 {offsets = [0, 256], sizes = [8, 128], strides = [1, 1]} : vector<8x512xf32> to vector<8x128xf32>
    %251 = vector.extract_strided_slice %239 {offsets = [0, 384], sizes = [8, 128], strides = [1, 1]} : vector<8x512xf32> to vector<8x128xf32>
    %cst_99 = arith.constant 5.000000e-01 : f32
    %252 = vector.broadcast %cst_99 : f32 to vector<8x128xf32>
    %253 = arith.mulf %251, %252 : vector<8x128xf32>
    %cst_100 = arith.constant 5.000000e-01 : f32
    %254 = vector.broadcast %cst_100 : f32 to vector<8x128xf32>
    %255 = arith.addf %253, %254 : vector<8x128xf32>
    %256 = arith.mulf %249, %227 : vector<8x128xf32>
    %257 = arith.mulf %244, %250 : vector<8x128xf32>
    %258 = arith.addf %256, %257 : vector<8x128xf32>
    %259 = math.tanh %258 : vector<8x128xf32>
    %260 = arith.mulf %255, %259 : vector<8x128xf32>
    %261 = arith.truncf %260 : vector<8x128xf32> to vector<8x128xbf16>
    %c8_i32_101 = arith.constant 8 : i32
    %c0_102 = arith.constant 0 : index
    %c0_103 = arith.constant 0 : index
    %262 = vector.load %arg9[%c0_102, %c0_103] : memref<8x128xbf16, #tpu.memory_space<vmem>>, vector<8x128xbf16>
    tpu.vector_store %arg9[%c0_102, %c0_103], %261 {strides = array<i32>} : memref<8x128xbf16, #tpu.memory_space<vmem>>, vector<8x128xbf16>,
    %c0_104 = arith.constant 0 : index
    %c0_105 = arith.constant 0 : index
    %263 = vector.load %arg10[%c0_104, %c0_105] : memref<8x128xf32, #tpu.memory_space<vmem>>, vector<8x128xf32>
    tpu.vector_store %arg10[%c0_104, %c0_105], %258 {strides = array<i32>} : memref<8x128xf32, #tpu.memory_space<vmem>>, vector<8x128xf32>,
    %c0_i32_106 = arith.constant 0 : i32
    %264 = arith.cmpi eq, %arg1, %c0_i32_106 : i32
    %265 = arith.extui %264 : i1 to i32
    %c0_i32_107 = arith.constant 0 : i32
    %266 = arith.cmpi ne, %265, %c0_i32_107 : i32
    scf.if %266 {
      %c0_108 = arith.constant 0 : index
      %c0_109 = arith.constant 0 : index
      %267 = vector.load %arg6[%c0_108, %c0_109] : memref<128x1xbf16, #tpu.memory_space<vmem>>, vector<128x1xbf16>
      %cst_110 = arith.constant dense<0.000000e+00> : vector<8x1xf32>
      %268 = tpu.matmul %261, %267, %cst_110 {dimension_numbers = #tpu.dot_dimension_numbers<[1], [0], [0], [1], [0, 0, 1, 1], [], []>} : vector<8x128xbf16>, vector<128x1xbf16>, vector<8x1xf32> -> vector<8x1xf32>
      %c0_111 = arith.constant 0 : index
      %c0_112 = arith.constant 0 : index
      %269 = vector.load %arg7[%c0_111, %c0_112] : memref<1x1xf32, #tpu.memory_space<vmem>>, vector<1x1xf32>
      %270 = vector.broadcast %269 : vector<1x1xf32> to vector<8x1xf32>
      %271 = arith.addf %268, %270 : vector<8x1xf32>
      %cst_113 = arith.constant 5.000000e-01 : f32
      %272 = vector.broadcast %cst_113 : f32 to vector<8x1xf32>
      %273 = arith.mulf %272, %271 : vector<8x1xf32>
      %274 = math.tanh %273 : vector<8x1xf32>
      %cst_114 = arith.constant 5.000000e-01 : f32
      %275 = vector.broadcast %cst_114 : f32 to vector<8x1xf32>
      %276 = arith.mulf %275, %274 : vector<8x1xf32>
      %cst_115 = arith.constant 5.000000e-01 : f32
      %277 = vector.broadcast %cst_115 : f32 to vector<8x1xf32>
      %278 = arith.addf %276, %277 : vector<8x1xf32>
      %c0_116 = arith.constant 0 : index
      %c0_117 = arith.constant 0 : index
      %279 = vector.load %arg8[%c0_116, %c0_117] : memref<8x1xf32, #tpu.memory_space<vmem>>, vector<8x1xf32>
      tpu.vector_store %arg8[%c0_116, %c0_117], %278 {strides = array<i32>} : memref<8x1xf32, #tpu.memory_space<vmem>>, vector<8x1xf32>,
    } else {
    }
    return
  }
  func.func @transform_0(%arg0: i32, %arg1: i32) -> (i32, i32, i32) {
    %c0_i32 = arith.constant 0 : i32
    %c0_i32_0 = arith.constant 0 : i32
    return %arg0, %arg1, %c0_i32 : i32, i32, i32
  }
  func.func @transform_1(%arg0: i32, %arg1: i32) -> (i32, i32) {
    %c0_i32 = arith.constant 0 : i32
    %c0_i32_0 = arith.constant 0 : i32
    %c0_i32_1 = arith.constant 0 : i32
    return %c0_i32, %c0_i32_0 : i32, i32
  }
  func.func @transform_2(%arg0: i32, %arg1: i32) -> (i32, i32) {
    %c0_i32 = arith.constant 0 : i32
    %c0_i32_0 = arith.constant 0 : i32
    %c0_i32_1 = arith.constant 0 : i32
    return %c0_i32, %c0_i32_0 : i32, i32
  }
  func.func @transform_3(%arg0: i32, %arg1: i32) -> (i32, i32) {
    %c0_i32 = arith.constant 0 : i32
    %c0_i32_0 = arith.constant 0 : i32
    %c0_i32_1 = arith.constant 0 : i32
    return %c0_i32, %c0_i32_0 : i32, i32
  }
  func.func @transform_4(%arg0: i32, %arg1: i32) -> (i32, i32) {
    %c0_i32 = arith.constant 0 : i32
    %c0_i32_0 = arith.constant 0 : i32
    %c0_i32_1 = arith.constant 0 : i32
    return %c0_i32, %c0_i32_0 : i32, i32
  }
  func.func @transform_5(%arg0: i32, %arg1: i32) -> (i32, i32) {
    %c0_i32 = arith.constant 0 : i32
    %c0_i32_0 = arith.constant 0 : i32
    %c0_i32_1 = arith.constant 0 : i32
    return %c0_i32, %c0_i32_0 : i32, i32
  }
  func.func @transform_6(%arg0: i32, %arg1: i32) -> (i32, i32) {
    %c0_i32 = arith.constant 0 : i32
    %c0_i32_0 = arith.constant 0 : i32
    return %arg0, %c0_i32 : i32, i32
  }
}

</mosaic_0001>

<bundles_post_ra>
// kernel: tpu_custom_call.1
= control target key start
LH: loop header
LB: loop body
LE: loop exit
PB: predicated region body
PF: predicated region fallthrough
CT: control target
= control target key end

     0   :  { %s2561_s0 = inlined_call_operand.vmem [shape: bf16[1,64,4], index: 0, kind: input, shape index: {}]   ;;  %s2562_s1 = inlined_call_operand.vmem [shape: bf16[4,512], index: 1, kind: input, shape index: {}]   ;;  %s2563_s2 = inlined_call_operand.hbm [shape: bf16[128,512], index: 2, kind: input, shape index: {}]   ;;  %s2564_s3 = inlined_call_operand.vmem [shape: f32[1,512], index: 3, kind: input, shape index: {}]   ;;  %s2565_s4 = inlined_call_operand.vmem [shape: bf16[128,1], index: 4, kind: input, shape index: {}]   ;;  %s2566_s5 = inlined_call_operand.<no memory space> [shape: f32[1,1], index: 5, kind: input, shape index: {}]   ;;  %s2567_s6 = inlined_call_operand.vmem [shape: f32[8,1], index: 6, kind: output, shape index: {}]  }
   0x1   :  { %v11_v0 = vstv %s2566_s5 }
   0x2   :  { %12 = vst [vmem:[#allocation5] sm:$0x1] %v11_v0 }
   0x3   :  { %13 = vsyncpa [#allocation7], 0  ;;  %s1935_s23 = smov [#allocation6]  }
   0x4   :  { %s23_s24 = sshll.u32 %s1935_s23, 4  ;;  %s24_s24 = int_to_ptr.vmem [resolvable:$true] %s23_s24 }
   0x5   :  { %s1921_s25 = scalar_lea.vmem %s24_s24, 4096  ;;  %p1926_p1 = scmp.lt.s32.totalorder %s24_s24, %s24_s24 }
   0x6   :  { %p1922_p0 = scmp.ne.s32.totalorder %s24_s24, %s1921_s25  ;;  %p1927_p2 = scmp.lt.s32.totalorder %s1921_s25, %s1921_s25 }
   0x8   :  { %p1928_p3 = por %p1927_p2, %p1926_p1 }
   0xa   :  { %p1929_p4 = pnand %p1928_p3, %p1922_p0 }
   0xc   :  { %1932 = shalt.err (!%p1929_p4)
}
   0xd   :  { %s1936_s26 = smov 256   ;;  %s1937_s27 = smov 16  }
   0xe   :  { %29 = dma.hbm_to_vmem [thread:$0]  %s2563_s2, 4096, %s24_s24, [#allocation7], %s1936_s26, %s1936_s26, %s1937_s27  }
   0xf   :  { %1933 = dma.done.wait [#allocation7], 4096  }
  0x10   :  { %1934 = vsyncadd [#allocation7], 4294963200  ;;  %v57_v1 = vlaneseq  ;;  %v1938_v2 = vmov 1983009808   ;;  %v2568_v4 = vmov 0   ;;  %v54_v8 = vld [vmem:[%s2562_s1] sm:$0xff] }
  0x11   :  { %v100_v3 = vunpack.c.l.s4 %v1938_v2  ;;  %173 = vmatprep.mubr.bf16.mxu0 %v2568_v4  ;;  %44 = vst [vmem:[#allocation2] sm:$0xf] %v2568_v4  ;;  %246 = vmatprep.mubr.bf16.mxu1 %v2568_v4  ;;  %vm128_vm0 = vcmask 1041408   ;;  %v98_v10 = vcombine.high %v54_v8, %v54_v8  ;;  %v1992_v14 = vld [vmem:[#allocation6 + $0xe4] ss:$16 sps:$4 sm:$0xff]   ;;  %v1739_v15 = vld [vmem:[%s2561_s0] sm:$0xff]  }
  0x12   :  { %v1986_v5 = vshrl.u32 %v57_v1, 7  ;;  %v1997_v18 = vld [vmem:[#allocation6 + $0xec] ss:$16 sps:$4 sm:$0xff]   ;;  %vm115_vm1 = vcmask 31744   ;;  %v1999_v19 = vld [vmem:[#allocation6 + $0xe0] ss:$16 sps:$4 sm:$0xff]  }
  0x13   :  { %v101_v6 = vunpack.c.0.s8 %v100_v3  ;;  %v2002_v20 = vld [vmem:[#allocation6 + $0xc4] ss:$16 sps:$4 sm:$0xff]   ;;  %v2004_v21 = vld [vmem:[#allocation6 + $0xe8] ss:$16 sps:$4 sm:$0xff]   ;;  %v2008_v22 = vld [vmem:[#allocation6 + $0xcc] ss:$16 sps:$4 sm:$0xff]  }
  0x14   :  { %v2011_v23 = vld [vmem:[#allocation6 + $0xc0] ss:$16 sps:$4 sm:$0xff]   ;;  %v2016_v24 = vld [vmem:[#allocation6 + $0xa4] ss:$16 sps:$4 sm:$0xff]   ;;  %v2019_v25 = vld [vmem:[#allocation6 + $0xc8] ss:$16 sps:$4 sm:$0xff]  }
  0x15   :  { %v104_v7 = vsub.s32 %v101_v6, %v1986_v5  ;;  %v1752_v26 = vld [vmem:[%s2561_s0 + $0x8] sm:$0xff]   ;;  %v2026_v27 = vld [vmem:[#allocation6 + $0xac] ss:$16 sps:$4 sm:$0xff]   ;;  %v1778_v44 = vld [vmem:[%s2561_s0 + $0x18] sm:$0xff]   ;;  %v59_v53 = vsub.s32 0, %v1986_v5  ;;  %v67_v54 = vsub.s32 2, %v1986_v5 }
  0x16   :  { %v2029_v28 = vld [vmem:[#allocation6 + $0xa0] ss:$16 sps:$4 sm:$0xff]   ;;  %v2032_v29 = vld [vmem:[#allocation6 + $0x84] ss:$16 sps:$4 sm:$0xff]   ;;  %v2035_v30 = vld [vmem:[#allocation6 + $0xa8] ss:$16 sps:$4 sm:$0xff]  }
  0x17   :  { %v105_v9 = vrot.slane %v54_v8, %v104_v7  ;;  %v112_v13 = vrot.slane %v98_v10, %v104_v7  ;;  %v2039_v31 = vld [vmem:[#allocation6 + $0x8c] ss:$16 sps:$4 sm:$0xff]   ;;  %v2042_v32 = vld [vmem:[#allocation6 + $0x80] ss:$16 sps:$4 sm:$0xff]   ;;  %v2047_v33 = vld [vmem:[#allocation6 + $0x64] ss:$16 sps:$4 sm:$0xff]  }
  0x18   :  { %v2050_v34 = vld [vmem:[#allocation6 + $0x88] ss:$16 sps:$4 sm:$0xff]   ;;  %v2057_v36 = vld [vmem:[#allocation6 + $0x6c] ss:$16 sps:$4 sm:$0xff]   ;;  %v2060_v37 = vld [vmem:[#allocation6 + $0x60] ss:$16 sps:$4 sm:$0xff]  }
  0x19   :  { %v113_v11 = vcombine.high %v105_v9, %v105_v9  ;;  %v130_v12 = vsel %vm128_vm0, %v105_v9, 0  ;;  %v114_v16 = vcombine.high %v112_v13, %v112_v13  ;;  %v136_v17 = vsel %vm128_vm0, %v112_v13, 0  ;;  %v1765_v35 = vld [vmem:[%s2561_s0 + $0x10] sm:$0xff]   ;;  %v2063_v38 = vld [vmem:[#allocation6 + $0x44] ss:$16 sps:$4 sm:$0xff]  }
  0x1a   :  { %v2066_v39 = vld [vmem:[#allocation6 + $0x68] ss:$16 sps:$4 sm:$0xff]   ;;  %v2070_v40 = vld [vmem:[#allocation6 + $0x40] ss:$16 sps:$4 sm:$0xff]   ;;  %v2072_v41 = vld [vmem:[#allocation6 + $0x4c] ss:$16 sps:$4 sm:$0xff]  }
  0x1b   :  { %1619 = vmatprep.subr.msk.bf16.mxu0 %vm128_vm0, %v113_v11  ;;  %1624 = vmatprep.subr.msk.bf16.mxu1 %vm128_vm0, %v114_v16  ;;  %v2076_v42 = vld [vmem:[#allocation6 + $0x48] ss:$16 sps:$4 sm:$0xff]   ;;  %v2078_v43 = vld [vmem:[#allocation6 + $0x24] ss:$16 sps:$4 sm:$0xff]   ;;  %v2085_v45 = vld [vmem:[#allocation6 + $0x2c] ss:$16 sps:$4 sm:$0xff]  }
  0x1c   :  { %156 = vmatpush1.bf16.msra.mxu0 %v130_v12  ;;  %229 = vmatpush1.bf16.msra.mxu1 %v136_v17  ;;  %v2089_v46 = vld [vmem:[#allocation6 + $0x20] ss:$16 sps:$4 sm:$0xff]   ;;  %v2094_v47 = vld [vmem:[#allocation6 + $0x4] ss:$16 sps:$4 sm:$0xff]   ;;  %v2097_v48 = vld [vmem:[#allocation6 + $0x28] ss:$16 sps:$4 sm:$0xff]  }
  0x1d   :  { %598 = vmatprep.subr.bf16.mxu0 %v1992_v14  ;;  %639 = vmatprep.subr.bf16.mxu1 %v1997_v18  ;;  %v2101_v49 = vld [vmem:[#allocation6 + $0xc] ss:$16 sps:$4 sm:$0xff]   ;;  %v2104_v50 = vld [vmem:[#allocation6] ss:$16 sps:$4 sm:$0xff]   ;;  %v2110_v51 = vld [vmem:[#allocation6 + $0x8] ss:$16 sps:$4 sm:$0xff]  }
  0x1e   :  { %v399_v52 = vld [vmem:[#allocation2] sm:$0xf]  ;;  %v63_v57 = vsub.s32 1, %v1986_v5  ;;  %v71_v62 = vsub.s32 3, %v1986_v5  ;;  %vm1941_vm2 = vmmov 0   ;;  %vm1601_vm3 = vcmask 7168  }
  0x1f   :  { %1620 = vmatmul.mubr.msk.bf16.vlgmr.msra.gmra.mxu0 %vm115_vm1, %v1739_v15  ;;  %1625 = vmatmul.mubr.msk.bf16.vlgmr.msra.gmra.mxu1 %vm115_vm1, %v1739_v15  ;;  %v55_v55 = vld [vmem:[%s2564_s3] sm:$0xf] }
  0x20   :  { %599 = vmatpush1.bf16.msra.mxu0 %v1999_v19  ;;  %183 = vmatprep.mubr.bf16.mxu0 %v2568_v4  ;;  %v2158_v60 = vrot.slane %v55_v55, %v59_v53  ;;  %v2160_v61 = vrot.slane %v55_v55, %v67_v54  ;;  %v2163_v1 = vrot.slane %v55_v55, %v63_v57 }
  0x21   :  { %600 = vmatprep.subr.bf16.mxu0 %v2002_v20  ;;  %640 = vmatpush1.bf16.msra.mxu1 %v2004_v21  ;;  %v2166_v7 = vrot.slane %v55_v55, %v71_v62 }
  0x22   :  { %256 = vmatprep.mubr.bf16.mxu1 %v2568_v4  ;;  %641 = vmatprep.subr.bf16.mxu1 %v2008_v22 }
  0x24   :  { %601 = vmatpush1.bf16.msra.mxu0 %v2011_v23 }
  0x25   :  { %602 = vmatprep.subr.bf16.mxu0 %v2016_v24  ;;  %642 = vmatpush1.bf16.msra.mxu1 %v2019_v25 }
  0x26   :  { %643 = vmatprep.subr.bf16.mxu1 %v2026_v27 }
  0x27   :  { %1621 = vmatmul.mubr.msk.bf16.gmra.mxu0 %vm115_vm1, %v1752_v26  ;;  %1626 = vmatmul.mubr.msk.bf16.gmra.mxu1 %vm115_vm1, %v1752_v26 }
  0x28   :  { %603 = vmatpush1.bf16.msra.mxu0 %v2029_v28  ;;  %193 = vmatprep.mubr.bf16.mxu0 %v2568_v4 }
  0x29   :  { %604 = vmatprep.subr.bf16.mxu0 %v2032_v29  ;;  %644 = vmatpush1.bf16.msra.mxu1 %v2035_v30 }
  0x2a   :  { %266 = vmatprep.mubr.bf16.mxu1 %v2568_v4  ;;  %645 = vmatprep.subr.bf16.mxu1 %v2039_v31 }
  0x2c   :  { %605 = vmatpush1.bf16.msra.mxu0 %v2042_v32 }
  0x2d   :  { %606 = vmatprep.subr.bf16.mxu0 %v2047_v33  ;;  %646 = vmatpush1.bf16.msra.mxu1 %v2050_v34 }
  0x2e   :  { %647 = vmatprep.subr.bf16.mxu1 %v2057_v36 }
  0x2f   :  { %1622 = vmatmul.mubr.msk.bf16.gmra.mxu0 %vm115_vm1, %v1765_v35  ;;  %1627 = vmatmul.mubr.msk.bf16.gmra.mxu1 %vm115_vm1, %v1765_v35 }
  0x30   :  { %607 = vmatpush1.bf16.msra.mxu0 %v2060_v37  ;;  %203 = vmatprep.mubr.bf16.mxu0 %v2568_v4 }
  0x31   :  { %608 = vmatprep.subr.bf16.mxu0 %v2063_v38  ;;  %648 = vmatpush1.bf16.msra.mxu1 %v2066_v39 }
  0x32   :  { %276 = vmatprep.mubr.bf16.mxu1 %v2568_v4  ;;  %649 = vmatprep.subr.bf16.mxu1 %v2072_v41 }
  0x34   :  { %609 = vmatpush1.bf16.msra.mxu0 %v2070_v40 }
  0x35   :  { %610 = vmatprep.subr.bf16.mxu0 %v2078_v43  ;;  %650 = vmatpush1.bf16.msra.mxu1 %v2076_v42 }
  0x36   :  { %651 = vmatprep.subr.bf16.mxu1 %v2085_v45 }
  0x37   :  { %1623 = vmatmul.mubr.msk.bf16.gmra.mxu0 %vm115_vm1, %v1778_v44  ;;  %1628 = vmatmul.mubr.msk.bf16.gmra.mxu1 %vm115_vm1, %v1778_v44 }
  0x38   :  { %611 = vmatpush1.bf16.msra.mxu0 %v2089_v46  ;;  %630 = vmatprep.mubr.bf16.mxu0 %v2568_v4 }
  0x39   :  { %612 = vmatprep.subr.bf16.mxu0 %v2094_v47  ;;  %652 = vmatpush1.bf16.msra.mxu1 %v2097_v48 }
  0x3a   :  { %671 = vmatprep.mubr.bf16.mxu1 %v2568_v4  ;;  %653 = vmatprep.subr.bf16.mxu1 %v2101_v49 }
  0x3c   :  { %613 = vmatpush1.bf16.msra.mxu0 %v2104_v50 }
  0x3d   :  { %709 = vmatprep.subr.bf16.mxu0 %v1992_v14  ;;  %654 = vmatpush1.bf16.msra.mxu1 %v2110_v51 }
  0x3e   :  { %750 = vmatprep.subr.bf16.mxu1 %v1997_v18 }
  0x3f   :  { %631 = vmatmul.mubr.bf16.vlgmr.msra.gmra.mxu0 %v399_v52 }
  0x40   :  { %710 = vmatpush1.bf16.msra.mxu0 %v1999_v19  ;;  %741 = vmatprep.mubr.bf16.mxu0 %v2568_v4 }
  0x41   :  { %672 = vmatmul.mubr.bf16.vlgmr.msra.gmra.mxu1 %v399_v52  ;;  %711 = vmatprep.subr.bf16.mxu0 %v2002_v20 }
  0x42   :  { %751 = vmatpush1.bf16.msra.mxu1 %v2004_v21  ;;  %782 = vmatprep.mubr.bf16.mxu1 %v2568_v4 }
  0x43   :  { %752 = vmatprep.subr.bf16.mxu1 %v2008_v22 }
  0x44   :  { %712 = vmatpush1.bf16.msra.mxu0 %v2011_v23 }
  0x45   :  { %713 = vmatprep.subr.bf16.mxu0 %v2016_v24 }
  0x46   :  { %753 = vmatpush1.bf16.msra.mxu1 %v2019_v25 }
  0x47   :  { %754 = vmatprep.subr.bf16.mxu1 %v2026_v27 }
  0x48   :  { %714 = vmatpush1.bf16.msra.mxu0 %v2029_v28 }
  0x49   :  { %715 = vmatprep.subr.bf16.mxu0 %v2032_v29 }
  0x4a   :  { %755 = vmatpush1.bf16.msra.mxu1 %v2035_v30 }
  0x4b   :  { %756 = vmatprep.subr.bf16.mxu1 %v2039_v31 }
  0x4c   :  { %716 = vmatpush1.bf16.msra.mxu0 %v2042_v32 }
  0x4d   :  { %717 = vmatprep.subr.bf16.mxu0 %v2047_v33 }
  0x4e   :  { %757 = vmatpush1.bf16.msra.mxu1 %v2050_v34 }
  0x4f   :  { %758 = vmatprep.subr.bf16.mxu1 %v2057_v36 }
  0x50   :  { %718 = vmatpush1.bf16.msra.mxu0 %v2060_v37 }
  0x51   :  { %719 = vmatprep.subr.bf16.mxu0 %v2063_v38 }
  0x52   :  { %759 = vmatpush1.bf16.msra.mxu1 %v2066_v39 }
  0x53   :  { %760 = vmatprep.subr.bf16.mxu1 %v2072_v41 }
  0x54   :  { %720 = vmatpush1.bf16.msra.mxu0 %v2070_v40 }
  0x55   :  { %721 = vmatprep.subr.bf16.mxu0 %v2078_v43 }
  0x56   :  { %761 = vmatpush1.bf16.msra.mxu1 %v2076_v42 }
  0x57   :  { %762 = vmatprep.subr.bf16.mxu1 %v2085_v45 }
  0x58   :  { %722 = vmatpush1.bf16.msra.mxu0 %v2089_v46 }
  0x59   :  { %723 = vmatprep.subr.bf16.mxu0 %v2094_v47 }
  0x5a   :  { %763 = vmatpush1.bf16.msra.mxu1 %v2097_v48 }
  0x5b   :  { %764 = vmatprep.subr.bf16.mxu1 %v2101_v49 }
  0x5c   :  { %724 = vmatpush1.bf16.msra.mxu0 %v2104_v50 }
  0x5d   :  { %820 = vmatprep.subr.bf16.mxu0 %v1992_v14 }
  0x5e   :  { %765 = vmatpush1.bf16.msra.mxu1 %v2110_v51 }
  0x5f   :  { %861 = vmatprep.subr.bf16.mxu1 %v1997_v18 }
  0xdf   :  { %v175_v56 = vpop.f32.mrf.mxu0  ;;  %v248_v59 = vpop.f32.mrf.mxu1 }
  0xe1   :  { %v177_v58 = vpop.f32.mrf.mxu0  ;;  %v250_v0 = vpop.f32.mrf.mxu1 }
  0xe3   :  { %v179_v63 = vpop.f32.mrf.mxu0  ;;  %v252_v6 = vpop.f32.mrf.mxu1 }
  0xe4   :  { %v180_v2 = vadd.f32 %v179_v63, %v2158_v60  ;;  %v253_v9 = vadd.f32 %v252_v6, %v2160_v61 }
  0xe5   :  { %v181_v3 = vpop.f32.mrf.mxu0  ;;  %v254_v11 = vpop.f32.mrf.mxu1 }
  0xe6   :  { %v182_v8 = vadd.f32 %v181_v3, %v2163_v1  ;;  %v255_v13 = vadd.f32 %v254_v11, %v2166_v7 }
  0xe7   :  { %v185_v10 = vpop.f32.mrf.mxu0  ;;  %v258_v16 = vpop.f32.mrf.mxu1 }
  0xe8   :  { %v2170_v12 = vpack.c.bf16 %v182_v8, %v180_v2  ;;  %v186_v5 = vadd.f32 %v185_v10, %v2158_v60  ;;  %v2174_v17 = vpack.c.bf16 %v255_v13, %v253_v9  ;;  %v259_v35 = vadd.f32 %v258_v16, %v2160_v61 }
  0xe9   :  { %v187_v15 = vpop.f32.mrf.mxu0  ;;  %v260_v52 = vpop.f32.mrf.mxu1 }
  0xea   :  { %v188_v26 = vadd.f32 %v187_v15, %v2163_v1  ;;  %v261_v55 = vadd.f32 %v260_v52, %v2166_v7 }
  0xeb   :  { %v189_v44 = vpop.f32.mrf.mxu0  ;;  %v262_v62 = vpop.f32.mrf.mxu1 }
  0xec   :  { %v2178_v53 = vpack.c.bf16 %v188_v26, %v186_v5  ;;  %v190_v54 = vadd.f32 %v189_v44, %v2158_v60  ;;  %v2182_v63 = vpack.c.bf16 %v261_v55, %v259_v35  ;;  %v263_v3 = vadd.f32 %v262_v62, %v2160_v61 }
  0xed   :  { %v191_v57 = vpop.f32.mrf.mxu0  ;;  %v264_v8 = vpop.f32.mrf.mxu1 }
  0xee   :  { %v192_v2 = vadd.f32 %v191_v57, %v2163_v1  ;;  %v265_v11 = vadd.f32 %v264_v8, %v2166_v7 }
  0xef   :  { %v195_v6 = vpop.f32.mrf.mxu0  ;;  %v268_v13 = vpop.f32.mrf.mxu1 }
  0xf0   :  { %v2186_v9 = vpack.c.bf16 %v192_v2, %v190_v54  ;;  %v196_v10 = vadd.f32 %v195_v6, %v2158_v60  ;;  %v2190_v15 = vpack.c.bf16 %v265_v11, %v263_v3  ;;  %v269_v26 = vadd.f32 %v268_v13, %v2160_v61 }
  0xf1   :  { %v197_v5 = vpop.f32.mrf.mxu0  ;;  %v270_v44 = vpop.f32.mrf.mxu1  ;;  %v178_v2 = vadd.f32 %v177_v58, %v2163_v1  ;;  %v176_v13 = vadd.f32 %v175_v56, %v2158_v60  ;;  %v251_v58 = vadd.f32 %v250_v0, %v2166_v7 }
  0xf2   :  { %v198_v16 = vadd.f32 %v197_v5, %v2163_v1  ;;  %v271_v54 = vadd.f32 %v270_v44, %v2166_v7  ;;  %v249_v44 = vadd.f32 %v248_v59, %v2160_v61 }
  0xf3   :  { %v199_v35 = vpop.f32.mrf.mxu0  ;;  %v272_v62 = vpop.f32.mrf.mxu1  ;;  %v1686_v4 = vpack.c.bf16 %v178_v2, %v176_v13 }
  0xf4   :  { %v2194_v52 = vpack.c.bf16 %v198_v16, %v196_v10  ;;  %v200_v55 = vadd.f32 %v199_v35, %v2158_v60  ;;  %v2199_v6 = vpack.c.bf16 %v271_v54, %v269_v26  ;;  %v273_v8 = vadd.f32 %v272_v62, %v2160_v61 }
  0xf5   :  { %v201_v57 = vpop.f32.mrf.mxu0  ;;  %v274_v5 = vpop.f32.mrf.mxu1  ;;  %v1687_v59 = vpack.c.bf16 %v251_v58, %v249_v44  ;;  %v680_v13 = vunpack.c.l.bf16 %v1686_v4 }
  0xf6   :  { %2574 = vst [vmem:[#allocation9_spill] sm:$0xff] %v2194_v52  ;;  %2575 = vst [vmem:[#allocation10_spill] sm:$0xff] %v2199_v6  ;;  %v202_v3 = vadd.f32 %v201_v57, %v2163_v1  ;;  %v275_v35 = vadd.f32 %v274_v5, %v2166_v7 }
  0xf7   :  { %v205_v11 = vpop.f32.mrf.mxu0  ;;  %v278_v54 = vpop.f32.mrf.mxu1  ;;  %v682_v58 = vunpack.c.l.bf16 %v1687_v59 }
  0xf8   :  { %v2204_v10 = vpack.c.bf16 %v202_v3, %v200_v55  ;;  %v206_v16 = vadd.f32 %v205_v11, %v2158_v60  ;;  %v2210_v57 = vpack.c.bf16 %v275_v35, %v273_v8  ;;  %v279_v6 = vadd.f32 %v278_v54, %v2160_v61 }
  0xf9   :  { %v207_v26 = vpop.f32.mrf.mxu0  ;;  %v280_v55 = vpop.f32.mrf.mxu1 }
  0xfa   :  { %2576 = vst [vmem:[#allocation11_spill] sm:$0xff] %v2204_v10  ;;  %v208_v62 = vadd.f32 %v207_v26, %v2163_v1  ;;  %v281_v5 = vadd.f32 %v280_v55, %v2166_v7 }
  0xfb   :  { %v209_v56 = vpop.f32.mrf.mxu0  ;;  %v282_v0 = vpop.f32.mrf.mxu1 }
  0xfc   :  { %v2214_v3 = vpack.c.bf16 %v208_v62, %v206_v16  ;;  %v210_v11 = vadd.f32 %v209_v56, %v2158_v60  ;;  %v2218_v52 = vpack.c.bf16 %v281_v5, %v279_v6  ;;  %v283_v8 = vadd.f32 %v282_v0, %v2160_v61 }
  0xfd   :  { %v211_v10 = vpop.f32.mrf.mxu0  ;;  %v284_v35 = vpop.f32.mrf.mxu1  ;;  %v681_v60 = vunpack.c.h.bf16 %v1686_v4 }
  0xfe   :  { %2577 = vst [vmem:[#allocation12_spill] sm:$0xff] %v2218_v52  ;;  %v212_v2 = vadd.f32 %v211_v10, %v2163_v1  ;;  %v285_v16 = vadd.f32 %v284_v35, %v2166_v7 }
  0xff   :  { %v632_v26 = vpop.f32.mrf.mxu0 }
 0x100   :  { %v2222_v54 = vpack.c.bf16 %v212_v2, %v210_v11  ;;  %v684_v62 = vadd.f32 %v680_v13, %v632_v26  ;;  %v2225_v44 = vpack.c.bf16 %v285_v16, %v283_v8  ;;  %v683_v11 = vunpack.c.h.bf16 %v1687_v59 }
 0x101   :  { %v634_v56 = vpop.f32.mrf.mxu0  ;;  %v673_v55 = vpop.f32.mrf.mxu1 }
 0x102   :  { %1799 = vtanh.f32 %v684_v62  ;;  %v685_v6 = vadd.f32 %v681_v60, %v634_v56  ;;  %v686_v61 = vadd.f32 %v682_v58, %v673_v55 }
 0x103   :  { %v636_v5 = vpop.f32.mrf.mxu0  ;;  %v675_v1 = vpop.f32.mrf.mxu1 }
 0x104   :  { %1801 = vtanh.f32 %v685_v6  ;;  %v687_v2 = vadd.f32 %v683_v11, %v675_v1  ;;  %v2578_v1 = vmov 0  }
 0x105   :  { %v637_v10 = vpop.f32.mrf.mxu0  ;;  %v677_v0 = vpop.f32.mrf.mxu1  ;;  %1803 = vtanh.f32 %v686_v61  ;;  %v791_v61 = vunpack.c.l.bf16 %v2170_v12 }
 0x106   :  { %1805 = vtanh.f32 %v687_v2  ;;  %v793_v2 = vunpack.c.l.bf16 %v2174_v17 }
 0x107   :  { %v678_v52 = vpop.f32.mrf.mxu1 }
 0x10f   :  { %v1800_v7 = vpop.eup %1799 }
 0x110   :  { %v692_v13 = vmul.f32 0.5, %v1800_v7  ;;  %v792_v7 = vunpack.c.h.bf16 %v2170_v12 }
 0x111   :  { %v1802_v4 = vpop.eup %1801 }
 0x112   :  { %v693_v35 = vadd.f32 0.5, %v692_v13  ;;  %v694_v26 = vmul.f32 0.5, %v1802_v4  ;;  %v1804_v16 = vpop.eup %1803 }
 0x113   :  { %v1806_v55 = vpop.eup %1805 }
 0x114   :  { %v695_v8 = vadd.f32 0.5, %v694_v26  ;;  %v699_v60 = vmul.f32 %v1804_v16, %v693_v35  ;;  %v696_v6 = vmul.f32 0.5, %v1806_v55  ;;  %v794_v55 = vunpack.c.h.bf16 %v2174_v17 }
 0x116   :  { %v698_v62 = vmul.f32 0.0, %v695_v8  ;;  %v697_v52 = vadd.f32 0.5, %v696_v6 }
 0x118   :  { %v2227_v56 = vadd.f32 %v699_v60, %v698_v62 }
 0x11a   :  { %1807 = vtanh.f32 %v2227_v56 }
 0x127   :  { %v1808_v58 = vpop.eup %1807 }
 0x128   :  { %v702_v59 = vmul.f32 %v1808_v58, %v697_v52 }
 0x12a   :  { %v703_v5 = vpack.c.bf16 %v702_v59, %v702_v59 }
 0x12c   :  { %742 = vmatmul.mubr.bf16.vlgmr.msra.gmra.mxu0 %v703_v5  ;;  %783 = vmatmul.mubr.bf16.vlgmr.msra.gmra.mxu1 %v703_v5 }
 0x12d   :  { %821 = vmatpush1.bf16.msra.mxu0 %v1999_v19  ;;  %862 = vmatpush1.bf16.msra.mxu1 %v2004_v21 }
 0x12e   :  { %822 = vmatprep.subr.bf16.mxu0 %v2002_v20  ;;  %863 = vmatprep.subr.bf16.mxu1 %v2008_v22 }
 0x12f   :  { %852 = vmatprep.mubr.bf16.mxu0 %v2578_v1  ;;  %893 = vmatprep.mubr.bf16.mxu1 %v2578_v1 }
 0x131   :  { %823 = vmatpush1.bf16.msra.mxu0 %v2011_v23  ;;  %864 = vmatpush1.bf16.msra.mxu1 %v2019_v25 }
 0x132   :  { %824 = vmatprep.subr.bf16.mxu0 %v2016_v24  ;;  %865 = vmatprep.subr.bf16.mxu1 %v2026_v27 }
 0x135   :  { %825 = vmatpush1.bf16.msra.mxu0 %v2029_v28  ;;  %866 = vmatpush1.bf16.msra.mxu1 %v2035_v30 }
 0x136   :  { %826 = vmatprep.subr.bf16.mxu0 %v2032_v29  ;;  %867 = vmatprep.subr.bf16.mxu1 %v2039_v31 }
 0x139   :  { %827 = vmatpush1.bf16.msra.mxu0 %v2042_v32  ;;  %868 = vmatpush1.bf16.msra.mxu1 %v2050_v34 }
 0x13a   :  { %828 = vmatprep.subr.bf16.mxu0 %v2047_v33  ;;  %869 = vmatprep.subr.bf16.mxu1 %v2057_v36 }
 0x13d   :  { %829 = vmatpush1.bf16.msra.mxu0 %v2060_v37  ;;  %870 = vmatpush1.bf16.msra.mxu1 %v2066_v39 }
 0x13e   :  { %830 = vmatprep.subr.bf16.mxu0 %v2063_v38  ;;  %871 = vmatprep.subr.bf16.mxu1 %v2072_v41 }
 0x141   :  { %831 = vmatpush1.bf16.msra.mxu0 %v2070_v40  ;;  %872 = vmatpush1.bf16.msra.mxu1 %v2076_v42 }
 0x142   :  { %832 = vmatprep.subr.bf16.mxu0 %v2078_v43  ;;  %873 = vmatprep.subr.bf16.mxu1 %v2085_v45 }
 0x145   :  { %833 = vmatpush1.bf16.msra.mxu0 %v2089_v46  ;;  %874 = vmatpush1.bf16.msra.mxu1 %v2097_v48 }
 0x146   :  { %834 = vmatprep.subr.bf16.mxu0 %v2094_v47  ;;  %875 = vmatprep.subr.bf16.mxu1 %v2101_v49 }
 0x149   :  { %835 = vmatpush1.bf16.msra.mxu0 %v2104_v50  ;;  %876 = vmatpush1.bf16.msra.mxu1 %v2110_v51 }
 0x14a   :  { %931 = vmatprep.subr.bf16.mxu0 %v1992_v14  ;;  %972 = vmatprep.subr.bf16.mxu1 %v1997_v18 }
 0x1ec   :  { %v743_v10 = vpop.f32.mrf.mxu0  ;;  %v784_v0 = vpop.f32.mrf.mxu1 }
 0x1ed   :  { %v795_v11 = vadd.f32 %v791_v61, %v743_v10  ;;  %v797_v35 = vadd.f32 %v793_v2, %v784_v0 }
 0x1ee   :  { %v745_v13 = vpop.f32.mrf.mxu0  ;;  %v786_v4 = vpop.f32.mrf.mxu1 }
 0x1ef   :  { %1809 = vtanh.f32 %v795_v11  ;;  %v796_v26 = vadd.f32 %v792_v7, %v745_v13  ;;  %v798_v6 = vadd.f32 %v794_v55, %v786_v4  ;;  %v903_v55 = vunpack.c.h.bf16 %v2178_v53 }
 0x1f0   :  { %v747_v8 = vpop.f32.mrf.mxu0  ;;  %v788_v16 = vpop.f32.mrf.mxu1 }
 0x1f1   :  { %1811 = vtanh.f32 %v796_v26 }
 0x1f2   :  { %v748_v62 = vpop.f32.mrf.mxu0  ;;  %v789_v60 = vpop.f32.mrf.mxu1  ;;  %1813 = vtanh.f32 %v797_v35 }
 0x1f3   :  { %1815 = vtanh.f32 %v798_v6  ;;  %v904_v60 = vunpack.c.l.bf16 %v2182_v63 }
 0x1fc   :  { %v1810_v52 = vpop.eup %1809 }
 0x1fd   :  { %v803_v58 = vmul.f32 0.5, %v1810_v52 }
 0x1fe   :  { %v1812_v59 = vpop.eup %1811 }
 0x1ff   :  { %v804_v5 = vadd.f32 0.5, %v803_v58  ;;  %v805_v61 = vmul.f32 0.5, %v1812_v59  ;;  %v1814_v12 = vpop.eup %1813 }
 0x200   :  { %v1816_v7 = vpop.eup %1815 }
 0x201   :  { %v806_v10 = vadd.f32 0.5, %v805_v61  ;;  %v810_v11 = vmul.f32 %v1814_v12, %v804_v5  ;;  %v807_v13 = vmul.f32 0.5, %v1816_v7 }
 0x203   :  { %v809_v0 = vmul.f32 %v806_v10, %v2227_v56  ;;  %v808_v35 = vadd.f32 0.5, %v807_v13  ;;  %v902_v56 = vunpack.c.l.bf16 %v2178_v53 }
 0x205   :  { %v2269_v2 = vadd.f32 %v810_v11, %v809_v0  ;;  %v905_v11 = vunpack.c.h.bf16 %v2182_v63 }
 0x207   :  { %1817 = vtanh.f32 %v2269_v2 }
 0x214   :  { %v1818_v17 = vpop.eup %1817 }
 0x215   :  { %v813_v4 = vmul.f32 %v1818_v17, %v808_v35 }
 0x217   :  { %v814_v26 = vpack.c.bf16 %v813_v4, %v813_v4 }
 0x219   :  { %853 = vmatmul.mubr.bf16.vlgmr.msra.gmra.mxu0 %v814_v26  ;;  %894 = vmatmul.mubr.bf16.vlgmr.msra.gmra.mxu1 %v814_v26 }
 0x21a   :  { %932 = vmatpush1.bf16.msra.mxu0 %v1999_v19  ;;  %973 = vmatpush1.bf16.msra.mxu1 %v2004_v21 }
 0x21b   :  { %933 = vmatprep.subr.bf16.mxu0 %v2002_v20  ;;  %974 = vmatprep.subr.bf16.mxu1 %v2008_v22 }
 0x21c   :  { %963 = vmatprep.mubr.bf16.mxu0 %v2578_v1  ;;  %1004 = vmatprep.mubr.bf16.mxu1 %v2578_v1 }
 0x21e   :  { %934 = vmatpush1.bf16.msra.mxu0 %v2011_v23  ;;  %975 = vmatpush1.bf16.msra.mxu1 %v2019_v25 }
 0x21f   :  { %935 = vmatprep.subr.bf16.mxu0 %v2016_v24  ;;  %976 = vmatprep.subr.bf16.mxu1 %v2026_v27 }
 0x222   :  { %936 = vmatpush1.bf16.msra.mxu0 %v2029_v28  ;;  %977 = vmatpush1.bf16.msra.mxu1 %v2035_v30 }
 0x223   :  { %937 = vmatprep.subr.bf16.mxu0 %v2032_v29  ;;  %978 = vmatprep.subr.bf16.mxu1 %v2039_v31 }
 0x226   :  { %938 = vmatpush1.bf16.msra.mxu0 %v2042_v32  ;;  %979 = vmatpush1.bf16.msra.mxu1 %v2050_v34 }
 0x227   :  { %939 = vmatprep.subr.bf16.mxu0 %v2047_v33  ;;  %980 = vmatprep.subr.bf16.mxu1 %v2057_v36 }
 0x22a   :  { %940 = vmatpush1.bf16.msra.mxu0 %v2060_v37  ;;  %981 = vmatpush1.bf16.msra.mxu1 %v2066_v39 }
 0x22b   :  { %941 = vmatprep.subr.bf16.mxu0 %v2063_v38  ;;  %982 = vmatprep.subr.bf16.mxu1 %v2072_v41 }
 0x22e   :  { %942 = vmatpush1.bf16.msra.mxu0 %v2070_v40  ;;  %983 = vmatpush1.bf16.msra.mxu1 %v2076_v42 }
 0x22f   :  { %943 = vmatprep.subr.bf16.mxu0 %v2078_v43  ;;  %984 = vmatprep.subr.bf16.mxu1 %v2085_v45 }
 0x232   :  { %944 = vmatpush1.bf16.msra.mxu0 %v2089_v46  ;;  %985 = vmatpush1.bf16.msra.mxu1 %v2097_v48 }
 0x233   :  { %945 = vmatprep.subr.bf16.mxu0 %v2094_v47  ;;  %986 = vmatprep.subr.bf16.mxu1 %v2101_v49 }
 0x236   :  { %946 = vmatpush1.bf16.msra.mxu0 %v2104_v50  ;;  %987 = vmatpush1.bf16.msra.mxu1 %v2110_v51 }
 0x237   :  { %1042 = vmatprep.subr.bf16.mxu0 %v1992_v14  ;;  %1083 = vmatprep.subr.bf16.mxu1 %v1997_v18 }
 0x2d9   :  { %v854_v8 = vpop.f32.mrf.mxu0  ;;  %v895_v16 = vpop.f32.mrf.mxu1 }
 0x2da   :  { %v906_v62 = vadd.f32 %v902_v56, %v854_v8  ;;  %v908_v58 = vadd.f32 %v904_v60, %v895_v16 }
 0x2db   :  { %v856_v6 = vpop.f32.mrf.mxu0  ;;  %v897_v52 = vpop.f32.mrf.mxu1 }
 0x2dc   :  { %1819 = vtanh.f32 %v906_v62  ;;  %v907_v59 = vadd.f32 %v903_v55, %v856_v6  ;;  %v909_v0 = vadd.f32 %v905_v11, %v897_v52 }
 0x2dd   :  { %v858_v5 = vpop.f32.mrf.mxu0  ;;  %v899_v61 = vpop.f32.mrf.mxu1 }
 0x2de   :  { %1821 = vtanh.f32 %v907_v59  ;;  %v1015_v59 = vunpack.c.l.bf16 %v2190_v15  ;;  %v1014_v5 = vunpack.c.h.bf16 %v2186_v9 }
 0x2df   :  { %v859_v12 = vpop.f32.mrf.mxu0  ;;  %v900_v10 = vpop.f32.mrf.mxu1  ;;  %1823 = vtanh.f32 %v908_v58 }
 0x2e0   :  { %1825 = vtanh.f32 %v909_v0 }
 0x2e9   :  { %v1820_v7 = vpop.eup %1819 }
 0x2ea   :  { %v914_v13 = vmul.f32 0.5, %v1820_v7 }
 0x2eb   :  { %v1822_v35 = vpop.eup %1821 }
 0x2ec   :  { %v915_v17 = vadd.f32 0.5, %v914_v13  ;;  %v916_v4 = vmul.f32 0.5, %v1822_v35  ;;  %v1824_v53 = vpop.eup %1823 }
 0x2ed   :  { %v1826_v62 = vpop.eup %1825 }
 0x2ee   :  { %v917_v26 = vadd.f32 0.5, %v916_v4  ;;  %v921_v56 = vmul.f32 %v1824_v53, %v915_v17  ;;  %v918_v60 = vmul.f32 0.5, %v1826_v62 }
 0x2f0   :  { %v920_v8 = vmul.f32 %v917_v26, %v2269_v2  ;;  %v919_v55 = vadd.f32 0.5, %v918_v60 }
 0x2f2   :  { %v2311_v16 = vadd.f32 %v921_v56, %v920_v8 }
 0x2f4   :  { %1827 = vtanh.f32 %v2311_v16 }
 0x301   :  { %v1828_v63 = vpop.eup %1827 }
 0x302   :  { %v924_v6 = vmul.f32 %v1828_v63, %v919_v55 }
 0x304   :  { %v925_v52 = vpack.c.bf16 %v924_v6, %v924_v6 }
 0x306   :  { %964 = vmatmul.mubr.bf16.vlgmr.msra.gmra.mxu0 %v925_v52  ;;  %1005 = vmatmul.mubr.bf16.vlgmr.msra.gmra.mxu1 %v925_v52 }
 0x307   :  { %1043 = vmatpush1.bf16.msra.mxu0 %v1999_v19  ;;  %1084 = vmatpush1.bf16.msra.mxu1 %v2004_v21  ;;  %v1013_v19 = vunpack.c.l.bf16 %v2186_v9 }
 0x308   :  { %1044 = vmatprep.subr.bf16.mxu0 %v2002_v20  ;;  %1085 = vmatprep.subr.bf16.mxu1 %v2008_v22 }
 0x309   :  { %1074 = vmatprep.mubr.bf16.mxu0 %v2578_v1  ;;  %1115 = vmatprep.mubr.bf16.mxu1 %v2578_v1 }
 0x30b   :  { %1045 = vmatpush1.bf16.msra.mxu0 %v2011_v23  ;;  %1086 = vmatpush1.bf16.msra.mxu1 %v2019_v25 }
 0x30c   :  { %1046 = vmatprep.subr.bf16.mxu0 %v2016_v24  ;;  %1087 = vmatprep.subr.bf16.mxu1 %v2026_v27 }
 0x30f   :  { %1047 = vmatpush1.bf16.msra.mxu0 %v2029_v28  ;;  %1088 = vmatpush1.bf16.msra.mxu1 %v2035_v30 }
 0x310   :  { %1048 = vmatprep.subr.bf16.mxu0 %v2032_v29  ;;  %1089 = vmatprep.subr.bf16.mxu1 %v2039_v31 }
 0x313   :  { %1049 = vmatpush1.bf16.msra.mxu0 %v2042_v32  ;;  %1090 = vmatpush1.bf16.msra.mxu1 %v2050_v34 }
 0x314   :  { %1050 = vmatprep.subr.bf16.mxu0 %v2047_v33  ;;  %1091 = vmatprep.subr.bf16.mxu1 %v2057_v36 }
 0x317   :  { %1051 = vmatpush1.bf16.msra.mxu0 %v2060_v37  ;;  %1092 = vmatpush1.bf16.msra.mxu1 %v2066_v39 }
 0x318   :  { %1052 = vmatprep.subr.bf16.mxu0 %v2063_v38  ;;  %1093 = vmatprep.subr.bf16.mxu1 %v2072_v41 }
 0x31b   :  { %1053 = vmatpush1.bf16.msra.mxu0 %v2070_v40  ;;  %1094 = vmatpush1.bf16.msra.mxu1 %v2076_v42 }
 0x31c   :  { %1054 = vmatprep.subr.bf16.mxu0 %v2078_v43  ;;  %1095 = vmatprep.subr.bf16.mxu1 %v2085_v45 }
 0x31f   :  { %1055 = vmatpush1.bf16.msra.mxu0 %v2089_v46  ;;  %1096 = vmatpush1.bf16.msra.mxu1 %v2097_v48 }
 0x320   :  { %1056 = vmatprep.subr.bf16.mxu0 %v2094_v47  ;;  %1097 = vmatprep.subr.bf16.mxu1 %v2101_v49 }
 0x323   :  { %1057 = vmatpush1.bf16.msra.mxu0 %v2104_v50  ;;  %1098 = vmatpush1.bf16.msra.mxu1 %v2110_v51 }
 0x324   :  { %1153 = vmatprep.subr.bf16.mxu0 %v1992_v14  ;;  %1194 = vmatprep.subr.bf16.mxu1 %v1997_v18  ;;  %v1016_v18 = vunpack.c.h.bf16 %v2190_v15 }
 0x3c6   :  { %v965_v20 = vpop.f32.mrf.mxu0  ;;  %v1006_v2 = vpop.f32.mrf.mxu1 }
 0x3c7   :  { %v1017_v58 = vadd.f32 %v1013_v19, %v965_v20  ;;  %v1019_v10 = vadd.f32 %v1015_v59, %v1006_v2  ;;  %v2356_v2 = vld [vmem:[#allocation6 + $0xe0] ss:$16 sps:$4 sm:$0xff]  }
 0x3c8   :  { %v967_v61 = vpop.f32.mrf.mxu0  ;;  %v1008_v12 = vpop.f32.mrf.mxu1 }
 0x3c9   :  { %1829 = vtanh.f32 %v1017_v58  ;;  %v1018_v11 = vadd.f32 %v1014_v5, %v967_v61  ;;  %v1020_v35 = vadd.f32 %v1016_v18, %v1008_v12  ;;  %v2360_v58 = vld [vmem:[#allocation6 + $0xc4] ss:$16 sps:$4 sm:$0xff]  }
 0x3ca   :  { %v969_v0 = vpop.f32.mrf.mxu0  ;;  %v1010_v7 = vpop.f32.mrf.mxu1 }
 0x3cb   :  { %1831 = vtanh.f32 %v1018_v11 }
 0x3cc   :  { %v970_v14 = vpop.f32.mrf.mxu0  ;;  %v1011_v13 = vpop.f32.mrf.mxu1  ;;  %1833 = vtanh.f32 %v1019_v10 }
 0x3cd   :  { %1835 = vtanh.f32 %v1020_v35 }
 0x3d6   :  { %v1830_v17 = vpop.eup %1829 }
 0x3d7   :  { %v1025_v4 = vmul.f32 0.5, %v1830_v17  ;;  %v2407_v17 = vld [vmem:[#allocation6 + $0xe8] ss:$16 sps:$4 sm:$0xff]  }
 0x3d8   :  { %v1832_v53 = vpop.eup %1831 }
 0x3d9   :  { %v1026_v26 = vadd.f32 0.5, %v1025_v4  ;;  %v1027_v56 = vmul.f32 0.5, %v1832_v53  ;;  %v1834_v9 = vpop.eup %1833  ;;  %v2411_v4 = vld [vmem:[#allocation6 + $0xcc] ss:$16 sps:$4 sm:$0xff]   ;;  %v2416_v53 = vld [vmem:[#allocation6 + $0xc0] ss:$16 sps:$4 sm:$0xff]  }
 0x3da   :  { %v1836_v63 = vpop.eup %1835 }
 0x3db   :  { %v1028_v8 = vadd.f32 0.5, %v1027_v56  ;;  %v1032_v62 = vmul.f32 %v1834_v9, %v1026_v26  ;;  %v1029_v6 = vmul.f32 0.5, %v1836_v63  ;;  %v2419_v26 = vld [vmem:[#allocation6 + $0xc8] ss:$16 sps:$4 sm:$0xff]   ;;  %v2422_v56 = vld [vmem:[#allocation6 + $0xa4] ss:$16 sps:$4 sm:$0xff]  }
 0x3dc   :  { %v2425_v9 = vld [vmem:[#allocation6 + $0xac] ss:$16 sps:$4 sm:$0xff]   ;;  %v2440_v63 = vld [vmem:[#allocation6 + $0x80] ss:$16 sps:$4 sm:$0xff]  }
 0x3dd   :  { %v1031_v60 = vmul.f32 %v1028_v8, %v2311_v16  ;;  %v1030_v52 = vadd.f32 0.5, %v1029_v6  ;;  %v2428_v8 = vld [vmem:[#allocation6 + $0xa0] ss:$16 sps:$4 sm:$0xff]   ;;  %v2443_v6 = vld [vmem:[#allocation6 + $0x88] ss:$16 sps:$4 sm:$0xff]  }
 0x3df   :  { %v2353_v55 = vadd.f32 %v1032_v62, %v1031_v60  ;;  %v2431_v62 = vld [vmem:[#allocation6 + $0xa8] ss:$16 sps:$4 sm:$0xff]   ;;  %v2434_v60 = vld [vmem:[#allocation6 + $0x84] ss:$16 sps:$4 sm:$0xff]  }
 0x3e1   :  { %1837 = vtanh.f32 %v2353_v55 }
 0x3ee   :  { %v1838_v15 = vpop.eup %1837 }
 0x3ef   :  { %v1035_v19 = vmul.f32 %v1838_v15, %v1030_v52  ;;  %v2446_v52 = vld [vmem:[#allocation6 + $0x64] ss:$16 sps:$4 sm:$0xff]   ;;  %v2449_v15 = vld [vmem:[#allocation6 + $0x6c] ss:$16 sps:$4 sm:$0xff]  }
 0x3f1   :  { %v1036_v20 = vpack.c.bf16 %v1035_v19, %v1035_v19  ;;  %v2452_v19 = vld [vmem:[#allocation6 + $0x60] ss:$16 sps:$4 sm:$0xff]  }
 0x3f3   :  { %1075 = vmatmul.mubr.bf16.vlgmr.msra.gmra.mxu0 %v1036_v20  ;;  %1116 = vmatmul.mubr.bf16.vlgmr.msra.gmra.mxu1 %v1036_v20  ;;  %v2455_v20 = vld [vmem:[#allocation6 + $0x68] ss:$16 sps:$4 sm:$0xff]  }
 0x3f4   :  { %1154 = vmatpush1.bf16.msra.mxu0 %v2356_v2  ;;  %1195 = vmatpush1.bf16.msra.mxu1 %v2004_v21  ;;  %v2392_v21 = vld [vmem:[#allocation6 + $0xe4] ss:$16 sps:$4 sm:$0xff]  }
 0x3f5   :  { %1155 = vmatprep.subr.bf16.mxu0 %v2360_v58  ;;  %1196 = vmatprep.subr.bf16.mxu1 %v2008_v22  ;;  %v2395_v22 = vld [vmem:[#allocation6 + $0xec] ss:$16 sps:$4 sm:$0xff]  }
 0x3f6   :  { %1185 = vmatprep.mubr.bf16.mxu0 %v2578_v1  ;;  %1226 = vmatprep.mubr.bf16.mxu1 %v2578_v1 }
 0x3f8   :  { %1156 = vmatpush1.bf16.msra.mxu0 %v2011_v23  ;;  %1197 = vmatpush1.bf16.msra.mxu1 %v2019_v25  ;;  %v2579_v23 = vld [vmem:[#allocation9_spill] sm:$0xff] }
 0x3f9   :  { %1157 = vmatprep.subr.bf16.mxu0 %v2016_v24  ;;  %1198 = vmatprep.subr.bf16.mxu1 %v2026_v27  ;;  %v1124_v24 = vunpack.c.l.bf16 %v2579_v23 }
 0x3fc   :  { %1158 = vmatpush1.bf16.msra.mxu0 %v2029_v28  ;;  %1199 = vmatpush1.bf16.msra.mxu1 %v2035_v30 }
 0x3fd   :  { %1159 = vmatprep.subr.bf16.mxu0 %v2032_v29  ;;  %1200 = vmatprep.subr.bf16.mxu1 %v2039_v31  ;;  %v2580_v29 = vld [vmem:[#allocation10_spill] sm:$0xff]  ;;  %v1125_v31 = vunpack.c.h.bf16 %v2579_v23  ;;  %v2458_v23 = vld [vmem:[#allocation6 + $0x44] ss:$16 sps:$4 sm:$0xff]  }
 0x3fe   :  { %v1126_v30 = vunpack.c.l.bf16 %v2580_v29 }
 0x400   :  { %1160 = vmatpush1.bf16.msra.mxu0 %v2042_v32  ;;  %1201 = vmatpush1.bf16.msra.mxu1 %v2050_v34 }
 0x401   :  { %1161 = vmatprep.subr.bf16.mxu0 %v2047_v33  ;;  %1202 = vmatprep.subr.bf16.mxu1 %v2057_v36 }
 0x404   :  { %1162 = vmatpush1.bf16.msra.mxu0 %v2060_v37  ;;  %1203 = vmatpush1.bf16.msra.mxu1 %v2066_v39 }
 0x405   :  { %1163 = vmatprep.subr.bf16.mxu0 %v2063_v38  ;;  %1204 = vmatprep.subr.bf16.mxu1 %v2072_v41  ;;  %v1127_v41 = vunpack.c.h.bf16 %v2580_v29  ;;  %v2473_v29 = vld [vmem:[#allocation6 + $0x2c] ss:$16 sps:$4 sm:$0xff]  }
 0x408   :  { %1164 = vmatpush1.bf16.msra.mxu0 %v2070_v40  ;;  %1205 = vmatpush1.bf16.msra.mxu1 %v2076_v42 }
 0x409   :  { %1165 = vmatprep.subr.bf16.mxu0 %v2078_v43  ;;  %1206 = vmatprep.subr.bf16.mxu1 %v2085_v45 }
 0x40c   :  { %1166 = vmatpush1.bf16.msra.mxu0 %v2089_v46  ;;  %1207 = vmatpush1.bf16.msra.mxu1 %v2097_v48 }
 0x40d   :  { %1167 = vmatprep.subr.bf16.mxu0 %v2094_v47  ;;  %1208 = vmatprep.subr.bf16.mxu1 %v2101_v49 }
 0x410   :  { %1168 = vmatpush1.bf16.msra.mxu0 %v2104_v50  ;;  %1209 = vmatpush1.bf16.msra.mxu1 %v2110_v51 }
 0x411   :  { %1264 = vmatprep.subr.bf16.mxu0 %v2392_v21  ;;  %1305 = vmatprep.subr.bf16.mxu1 %v2395_v22 }
 0x4b3   :  { %v1076_v25 = vpop.f32.mrf.mxu0  ;;  %v1117_v27 = vpop.f32.mrf.mxu1 }
 0x4b4   :  { %v1128_v28 = vadd.f32 %v1124_v24, %v1076_v25  ;;  %v1130_v34 = vadd.f32 %v1126_v30, %v1117_v27  ;;  %v2461_v24 = vld [vmem:[#allocation6 + $0x4c] ss:$16 sps:$4 sm:$0xff]   ;;  %v2464_v25 = vld [vmem:[#allocation6 + $0x40] ss:$16 sps:$4 sm:$0xff]   ;;  %v2467_v27 = vld [vmem:[#allocation6 + $0x48] ss:$16 sps:$4 sm:$0xff]  }
 0x4b5   :  { %v1078_v32 = vpop.f32.mrf.mxu0  ;;  %v1119_v33 = vpop.f32.mrf.mxu1  ;;  %v2476_v30 = vld [vmem:[#allocation6 + $0x20] ss:$16 sps:$4 sm:$0xff]  }
 0x4b6   :  { %1839 = vtanh.f32 %v1128_v28  ;;  %v1129_v36 = vadd.f32 %v1125_v31, %v1078_v32  ;;  %v1131_v42 = vadd.f32 %v1127_v41, %v1119_v33  ;;  %v2470_v28 = vld [vmem:[#allocation6 + $0x24] ss:$16 sps:$4 sm:$0xff]  }
 0x4b7   :  { %v1080_v37 = vpop.f32.mrf.mxu0  ;;  %v1121_v38 = vpop.f32.mrf.mxu1  ;;  %v2581_v31 = vld [vmem:[#allocation11_spill] sm:$0xff] }
 0x4b8   :  { %1841 = vtanh.f32 %v1129_v36  ;;  %v1235_v32 = vunpack.c.l.bf16 %v2581_v31  ;;  %v1237_v37 = vunpack.c.l.bf16 %v2210_v57 }
 0x4b9   :  { %v1081_v39 = vpop.f32.mrf.mxu0  ;;  %v1122_v40 = vpop.f32.mrf.mxu1  ;;  %1843 = vtanh.f32 %v1130_v34 }
 0x4ba   :  { %1845 = vtanh.f32 %v1131_v42 }
 0x4c3   :  { %v1840_v43 = vpop.eup %1839 }
 0x4c4   :  { %v1136_v45 = vmul.f32 0.5, %v1840_v43 }
 0x4c5   :  { %v1842_v46 = vpop.eup %1841 }
 0x4c6   :  { %v1137_v16 = vadd.f32 0.5, %v1136_v45  ;;  %v1138_v59 = vmul.f32 0.5, %v1842_v46  ;;  %v1844_v5 = vpop.eup %1843 }
 0x4c7   :  { %v1846_v0 = vpop.eup %1845 }
 0x4c8   :  { %v1139_v61 = vadd.f32 0.5, %v1138_v59  ;;  %v1143_v12 = vmul.f32 %v1844_v5, %v1137_v16  ;;  %v1140_v7 = vmul.f32 0.5, %v1846_v0 }
 0x4ca   :  { %v1142_v10 = vmul.f32 %v1139_v61, %v2353_v55  ;;  %v1141_v14 = vadd.f32 0.5, %v1140_v7  ;;  %v2437_v55 = vld [vmem:[#allocation6 + $0x8c] ss:$16 sps:$4 sm:$0xff]  }
 0x4cc   :  { %v2403_v11 = vadd.f32 %v1143_v12, %v1142_v10 }
 0x4ce   :  { %1847 = vtanh.f32 %v2403_v11 }
 0x4db   :  { %v1848_v13 = vpop.eup %1847 }
 0x4dc   :  { %v1146_v18 = vmul.f32 %v1848_v13, %v1141_v14 }
 0x4de   :  { %v1147_v35 = vpack.c.bf16 %v1146_v18, %v1146_v18 }
 0x4e0   :  { %1186 = vmatmul.mubr.bf16.vlgmr.msra.gmra.mxu0 %v1147_v35  ;;  %1227 = vmatmul.mubr.bf16.vlgmr.msra.gmra.mxu1 %v1147_v35  ;;  %v1912_v35 = vld [vmem:[#allocation6 + $0x8] ss:$16 sps:$4 sm:$0xff]  }
 0x4e1   :  { %1265 = vmatpush1.bf16.msra.mxu0 %v2356_v2  ;;  %1306 = vmatpush1.bf16.msra.mxu1 %v2407_v17 }
 0x4e2   :  { %1266 = vmatprep.subr.bf16.mxu0 %v2360_v58  ;;  %1307 = vmatprep.subr.bf16.mxu1 %v2411_v4 }
 0x4e3   :  { %1296 = vmatprep.mubr.bf16.mxu0 %v2578_v1  ;;  %1337 = vmatprep.mubr.bf16.mxu1 %v2578_v1 }
 0x4e5   :  { %1267 = vmatpush1.bf16.msra.mxu0 %v2416_v53  ;;  %1308 = vmatpush1.bf16.msra.mxu1 %v2419_v26 }
 0x4e6   :  { %1268 = vmatprep.subr.bf16.mxu0 %v2422_v56  ;;  %1309 = vmatprep.subr.bf16.mxu1 %v2425_v9 }
 0x4e9   :  { %1269 = vmatpush1.bf16.msra.mxu0 %v2428_v8  ;;  %1310 = vmatpush1.bf16.msra.mxu1 %v2431_v62 }
 0x4ea   :  { %1270 = vmatprep.subr.bf16.mxu0 %v2434_v60  ;;  %1311 = vmatprep.subr.bf16.mxu1 %v2437_v55 }
 0x4ed   :  { %1271 = vmatpush1.bf16.msra.mxu0 %v2440_v63  ;;  %1312 = vmatpush1.bf16.msra.mxu1 %v2443_v6 }
 0x4ee   :  { %1272 = vmatprep.subr.bf16.mxu0 %v2446_v52  ;;  %1313 = vmatprep.subr.bf16.mxu1 %v2449_v15 }
 0x4f1   :  { %1273 = vmatpush1.bf16.msra.mxu0 %v2452_v19  ;;  %1314 = vmatpush1.bf16.msra.mxu1 %v2455_v20 }
 0x4f2   :  { %1274 = vmatprep.subr.bf16.mxu0 %v2458_v23  ;;  %1315 = vmatprep.subr.bf16.mxu1 %v2461_v24 }
 0x4f5   :  { %1275 = vmatpush1.bf16.msra.mxu0 %v2464_v25  ;;  %1316 = vmatpush1.bf16.msra.mxu1 %v2467_v27 }
 0x4f6   :  { %1276 = vmatprep.subr.bf16.mxu0 %v2470_v28  ;;  %1317 = vmatprep.subr.bf16.mxu1 %v2473_v29 }
 0x4f9   :  { %1277 = vmatpush1.bf16.msra.mxu0 %v2476_v30  ;;  %1318 = vmatpush1.bf16.msra.mxu1 %v2097_v48  ;;  %v1236_v48 = vunpack.c.h.bf16 %v2581_v31 }
 0x4fa   :  { %1278 = vmatprep.subr.bf16.mxu0 %v2094_v47  ;;  %1319 = vmatprep.subr.bf16.mxu1 %v2101_v49 }
 0x4fd   :  { %1279 = vmatpush1.bf16.msra.mxu0 %v2104_v50  ;;  %1320 = vmatpush1.bf16.msra.mxu1 %v2110_v51 }
 0x4fe   :  { %1375 = vmatprep.subr.bf16.mxu0 %v2392_v21  ;;  %1416 = vmatprep.subr.bf16.mxu1 %v2395_v22  ;;  %v1238_v22 = vunpack.c.h.bf16 %v2210_v57 }
 0x5a0   :  { %v1187_v33 = vpop.f32.mrf.mxu0  ;;  %v1228_v34 = vpop.f32.mrf.mxu1 }
 0x5a1   :  { %v1239_v36 = vadd.f32 %v1235_v32, %v1187_v33  ;;  %v1241_v49 = vadd.f32 %v1237_v37, %v1228_v34 }
 0x5a2   :  { %v1189_v47 = vpop.f32.mrf.mxu0  ;;  %v1230_v38 = vpop.f32.mrf.mxu1 }
 0x5a3   :  { %1849 = vtanh.f32 %v1239_v36  ;;  %v1240_v50 = vadd.f32 %v1236_v48, %v1189_v47  ;;  %v1242_v41 = vadd.f32 %v1238_v22, %v1230_v38  ;;  %v1796_v22 = vld [vmem:[%s2565_s4 + $0x10] sm:$0xff]  }
 0x5a4   :  { %v1191_v39 = vpop.f32.mrf.mxu0  ;;  %v1232_v51 = vpop.f32.mrf.mxu1 }
 0x5a5   :  { %1851 = vtanh.f32 %v1240_v50  ;;  %v1940_v50 = vmov 0.0   ;;  %v1792_v39 = vld [vmem:[%s2565_s4 + $0x30] sm:$0xff]   ;;  %v1793_v51 = vld [vmem:[%s2565_s4 + $0x28] sm:$0xff]  }
 0x5a6   :  { %v1192_v21 = vpop.f32.mrf.mxu0  ;;  %v1233_v40 = vpop.f32.mrf.mxu1  ;;  %1853 = vtanh.f32 %v1241_v49  ;;  %v1791_v49 = vld [vmem:[%s2565_s4 + $0x38] sm:$0xff]  }
 0x5a7   :  { %1855 = vtanh.f32 %v1242_v41  ;;  %v1794_v21 = vld [vmem:[%s2565_s4 + $0x20] sm:$0xff]   ;;  %v1795_v40 = vld [vmem:[%s2565_s4 + $0x18] sm:$0xff]   ;;  %v1797_v41 = vld [vmem:[%s2565_s4 + $0x8] sm:$0xff]  }
 0x5b0   :  { %v1850_v42 = vpop.eup %1849 }
 0x5b1   :  { %v1247_v43 = vmul.f32 0.5, %v1850_v42  ;;  %v1798_v42 = vld [vmem:[%s2565_s4] sm:$0xff]  }
 0x5b2   :  { %v1852_v45 = vpop.eup %1851 }
 0x5b3   :  { %v1248_v46 = vadd.f32 0.5, %v1247_v43  ;;  %v1249_v16 = vmul.f32 0.5, %v1852_v45  ;;  %v1854_v59 = vpop.eup %1853  ;;  %v1457_v43 = vunpack.c.l.bf16 %v2222_v54 }
 0x5b4   :  { %v1856_v0 = vpop.eup %1855 }
 0x5b5   :  { %v1250_v5 = vadd.f32 0.5, %v1249_v16  ;;  %v1254_v61 = vmul.f32 %v1854_v59, %v1248_v46  ;;  %v1251_v7 = vmul.f32 0.5, %v1856_v0  ;;  %v1459_v59 = vunpack.c.l.bf16 %v2225_v44 }
 0x5b7   :  { %v1253_v12 = vmul.f32 %v1250_v5, %v2403_v11  ;;  %v1252_v14 = vadd.f32 0.5, %v1251_v7  ;;  %v1911_v11 = vld [vmem:[#allocation6] ss:$16 sps:$4 sm:$0xff]   ;;  %v1458_v5 = vunpack.c.h.bf16 %v2222_v54 }
 0x5b9   :  { %v2491_v10 = vadd.f32 %v1254_v61, %v1253_v12 }
 0x5bb   :  { %1857 = vtanh.f32 %v2491_v10 }
 0x5c8   :  { %v1858_v57 = vpop.eup %1857 }
 0x5c9   :  { %v1257_v13 = vmul.f32 %v1858_v57, %v1252_v14 }
 0x5cb   :  { %v1258_v18 = vpack.c.bf16 %v1257_v13, %v1257_v13 }
 0x5cd   :  { %1297 = vmatmul.mubr.bf16.vlgmr.msra.gmra.mxu0 %v1258_v18  ;;  %1338 = vmatmul.mubr.bf16.vlgmr.msra.gmra.mxu1 %v1258_v18  ;;  %v1460_v18 = vunpack.c.h.bf16 %v2225_v44 }
 0x5ce   :  { %1376 = vmatpush1.bf16.msra.mxu0 %v2356_v2  ;;  %1417 = vmatpush1.bf16.msra.mxu1 %v2407_v17  ;;  %v1909_v2 = vld [vmem:[#allocation6 + $0x4] ss:$16 sps:$4 sm:$0xff]   ;;  %v1346_v17 = vunpack.c.l.bf16 %v2214_v3 }
 0x5cf   :  { %1377 = vmatprep.subr.bf16.mxu0 %v2360_v58  ;;  %1418 = vmatprep.subr.bf16.mxu1 %v2411_v4  ;;  %v1910_v58 = vld [vmem:[#allocation6 + $0xc] ss:$16 sps:$4 sm:$0xff]  }
 0x5d0   :  { %1407 = vmatprep.mubr.bf16.mxu0 %v2578_v1  ;;  %1448 = vmatprep.mubr.bf16.mxu1 %v2578_v1  ;;  %v1908_v1 = vld [vmem:[#allocation6 + $0x28] ss:$16 sps:$4 sm:$0xff]  }
 0x5d2   :  { %1378 = vmatpush1.bf16.msra.mxu0 %v2416_v53  ;;  %1419 = vmatpush1.bf16.msra.mxu1 %v2419_v26 }
 0x5d3   :  { %1379 = vmatprep.subr.bf16.mxu0 %v2422_v56  ;;  %1420 = vmatprep.subr.bf16.mxu1 %v2425_v9  ;;  %v2582_v56 = vld [vmem:[#allocation12_spill] sm:$0xff] }
 0x5d4   :  { %v1348_v9 = vunpack.c.l.bf16 %v2582_v56 }
 0x5d6   :  { %1380 = vmatpush1.bf16.msra.mxu0 %v2428_v8  ;;  %1421 = vmatpush1.bf16.msra.mxu1 %v2431_v62  ;;  %v1347_v8 = vunpack.c.h.bf16 %v2214_v3 }
 0x5d7   :  { %1381 = vmatprep.subr.bf16.mxu0 %v2434_v60  ;;  %1422 = vmatprep.subr.bf16.mxu1 %v2437_v55 }
 0x5da   :  { %1382 = vmatpush1.bf16.msra.mxu0 %v2440_v63  ;;  %1423 = vmatpush1.bf16.msra.mxu1 %v2443_v6 }
 0x5db   :  { %1383 = vmatprep.subr.bf16.mxu0 %v2446_v52  ;;  %1424 = vmatprep.subr.bf16.mxu1 %v2449_v15 }
 0x5de   :  { %1384 = vmatpush1.bf16.msra.mxu0 %v2452_v19  ;;  %1425 = vmatpush1.bf16.msra.mxu1 %v2455_v20  ;;  %v1349_v20 = vunpack.c.h.bf16 %v2582_v56 }
 0x5df   :  { %1385 = vmatprep.subr.bf16.mxu0 %v2458_v23  ;;  %1426 = vmatprep.subr.bf16.mxu1 %v2461_v24 }
 0x5e2   :  { %1386 = vmatpush1.bf16.msra.mxu0 %v2464_v25  ;;  %1427 = vmatpush1.bf16.msra.mxu1 %v2467_v27 }
 0x5e3   :  { %1387 = vmatprep.subr.bf16.mxu0 %v2470_v28  ;;  %1428 = vmatprep.subr.bf16.mxu1 %v2473_v29 }
 0x5e6   :  { %1388 = vmatpush1.bf16.msra.mxu0 %v2476_v30  ;;  %1429 = vmatpush1.bf16.msra.mxu1 %v1908_v1 }
 0x5e7   :  { %1389 = vmatprep.subr.bf16.mxu0 %v1909_v2  ;;  %1430 = vmatprep.subr.bf16.mxu1 %v1910_v58 }
 0x5ea   :  { %1390 = vmatpush1.bf16.msra.mxu0 %v1911_v11  ;;  %1431 = vmatpush1.bf16.msra.mxu1 %v1912_v35 }
 0x5eb   :  { %1711 = vmatprep.subr.bf16.mxu0 %v1940_v50 }
 0x68d   :  { %v1298_v4 = vpop.f32.mrf.mxu0  ;;  %v1339_v53 = vpop.f32.mrf.mxu1 }
 0x68e   :  { %v1350_v26 = vadd.f32 %v1346_v17, %v1298_v4  ;;  %v1352_v55 = vadd.f32 %v1348_v9, %v1339_v53 }
 0x68f   :  { %v1300_v62 = vpop.f32.mrf.mxu0  ;;  %v1341_v60 = vpop.f32.mrf.mxu1 }
 0x690   :  { %1859 = vtanh.f32 %v1350_v26  ;;  %v1351_v63 = vadd.f32 %v1347_v8, %v1300_v62  ;;  %v1353_v23 = vadd.f32 %v1349_v20, %v1341_v60 }
 0x691   :  { %v1302_v6 = vpop.f32.mrf.mxu0  ;;  %v1343_v52 = vpop.f32.mrf.mxu1 }
 0x692   :  { %1861 = vtanh.f32 %v1351_v63  ;;  %v1677_v63 = vld [vmem:[#allocation5] ss:$0 sm:$0xff] }
 0x693   :  { %v1303_v15 = vpop.f32.mrf.mxu0  ;;  %v1344_v19 = vpop.f32.mrf.mxu1  ;;  %1863 = vtanh.f32 %v1352_v55 }
 0x694   :  { %1865 = vtanh.f32 %v1353_v23 }
 0x69d   :  { %v1860_v24 = vpop.eup %1859 }
 0x69e   :  { %v1358_v25 = vmul.f32 0.5, %v1860_v24 }
 0x69f   :  { %v1862_v27 = vpop.eup %1861 }
 0x6a0   :  { %v1359_v28 = vadd.f32 0.5, %v1358_v25  ;;  %v1360_v29 = vmul.f32 0.5, %v1862_v27  ;;  %v1864_v3 = vpop.eup %1863 }
 0x6a1   :  { %v1866_v34 = vpop.eup %1865 }
 0x6a2   :  { %v1361_v30 = vadd.f32 0.5, %v1360_v29  ;;  %v1365_v31 = vmul.f32 %v1864_v3, %v1359_v28  ;;  %v1362_v36 = vmul.f32 0.5, %v1866_v34 }
 0x6a4   :  { %v1364_v32 = vmul.f32 %v1361_v30, %v2491_v10  ;;  %v1363_v37 = vadd.f32 0.5, %v1362_v36 }
 0x6a6   :  { %v2526_v33 = vadd.f32 %v1365_v31, %v1364_v32 }
 0x6a8   :  { %1867 = vtanh.f32 %v2526_v33 }
 0x6b5   :  { %v1868_v48 = vpop.eup %1867 }
 0x6b6   :  { %v1368_v47 = vmul.f32 %v1868_v48, %v1363_v37 }
 0x6b8   :  { %v1369_v38 = vpack.c.bf16 %v1368_v47, %v1368_v47 }
 0x6ba   :  { %1408 = vmatmul.mubr.bf16.vlgmr.msra.gmra.mxu0 %v1369_v38  ;;  %1449 = vmatmul.mubr.bf16.vlgmr.msra.gmra.mxu1 %v1369_v38 }
 0x6bb   :  { %1712 = vmatpush3.bf16.msra.mxu0 %v1791_v49  ;;  %1727 = vmatprep.mubr.msk.bf16.mxu0 %vm1941_vm2, %v1940_v50 }
 0x6bc   :  { %1713 = vmatprep.subr.bf16.mxu0 %v1940_v50 }
 0x6bf   :  { %1714 = vmatpush3.bf16.msra.mxu0 %v1792_v39 }
 0x6c0   :  { %1715 = vmatprep.subr.bf16.mxu0 %v1940_v50 }
 0x6c3   :  { %1716 = vmatpush3.bf16.msra.mxu0 %v1793_v51 }
 0x6c4   :  { %1717 = vmatprep.subr.bf16.mxu0 %v1940_v50 }
 0x6c7   :  { %1718 = vmatpush3.bf16.msra.mxu0 %v1794_v21 }
 0x6c8   :  { %1719 = vmatprep.subr.bf16.mxu0 %v1940_v50 }
 0x6cb   :  { %1720 = vmatpush3.bf16.msra.mxu0 %v1795_v40 }
 0x6cc   :  { %1721 = vmatprep.subr.bf16.mxu0 %v1940_v50 }
 0x6cf   :  { %1722 = vmatpush3.bf16.msra.mxu0 %v1796_v22 }
 0x6d0   :  { %1723 = vmatprep.subr.bf16.mxu0 %v1940_v50 }
 0x6d3   :  { %1724 = vmatpush3.bf16.msra.mxu0 %v1797_v41 }
 0x6d4   :  { %1725 = vmatprep.subr.bf16.mxu0 %v1940_v50 }
 0x6d7   :  { %1726 = vmatpush3.bf16.msra.mxu0 %v1798_v42 }
 0x77a   :  { %v1409_v45 = vpop.f32.mrf.mxu0  ;;  %v1450_v46 = vpop.f32.mrf.mxu1 }
 0x77b   :  { %v1461_v16 = vadd.f32 %v1457_v43, %v1409_v45  ;;  %v1463_v10 = vadd.f32 %v1459_v59, %v1450_v46 }
 0x77c   :  { %v1411_v61 = vpop.f32.mrf.mxu0  ;;  %v1452_v12 = vpop.f32.mrf.mxu1 }
 0x77d   :  { %1869 = vtanh.f32 %v1461_v16  ;;  %v1462_v0 = vadd.f32 %v1458_v5, %v1411_v61  ;;  %v1464_v1 = vadd.f32 %v1460_v18, %v1452_v12 }
 0x77e   :  { %v1413_v7 = vpop.f32.mrf.mxu0  ;;  %v1454_v14 = vpop.f32.mrf.mxu1 }
 0x77f   :  { %1871 = vtanh.f32 %v1462_v0 }
 0x780   :  { %v1414_v57 = vpop.f32.mrf.mxu0  ;;  %v1455_v13 = vpop.f32.mrf.mxu1  ;;  %1873 = vtanh.f32 %v1463_v10 }
 0x781   :  { %1875 = vtanh.f32 %v1464_v1 }
 0x78a   :  { %v1870_v2 = vpop.eup %1869 }
 0x78b   :  { %v1469_v58 = vmul.f32 0.5, %v1870_v2 }
 0x78c   :  { %v1872_v11 = vpop.eup %1871 }
 0x78d   :  { %v1470_v35 = vadd.f32 0.5, %v1469_v58  ;;  %v1471_v17 = vmul.f32 0.5, %v1872_v11  ;;  %v1874_v54 = vpop.eup %1873 }
 0x78e   :  { %v1876_v9 = vpop.eup %1875 }
 0x78f   :  { %v1472_v4 = vadd.f32 0.5, %v1471_v17  ;;  %v1476_v53 = vmul.f32 %v1874_v54, %v1470_v35  ;;  %v1473_v8 = vmul.f32 0.5, %v1876_v9 }
 0x791   :  { %v1475_v26 = vmul.f32 %v1472_v4, %v2526_v33  ;;  %v1474_v62 = vadd.f32 0.5, %v1473_v8 }
 0x793   :  { %v1477_v56 = vadd.f32 %v1476_v53, %v1475_v26 }
 0x795   :  { %1877 = vtanh.f32 %v1477_v56 }
 0x7a2   :  { %v1878_v60 = vpop.eup %1877 }
 0x7a3   :  { %v1479_v55 = vmul.f32 %v1878_v60, %v1474_v62 }
 0x7a5   :  { %v1480_v44 = vpack.c.bf16 %v1479_v55, %v1479_v55 }
 0x7a7   :  { %1481 = vst [vmem:[#allocation2] sm:$0xf] %v1480_v44  ;;  %1728 = vmatmul.mubr.bf16.vlgmr.msra.gmra.mxu0 %v1480_v44 }
 0x867   :  { %v1591_v6 = vpop.f32.mrf.mxu0 }
 0x868   :  { %v1592_v52 = vadd.f32 %v1677_v63, %v1591_v6 }
 0x869   :  { %v1729_v15 = vpop.f32.mrf.mxu0 }
 0x86a   :  { %v1597_v19 = vmul.f32 0.5, %v1592_v52 }
 0x86b   :  { %v1594_v20 = vpop.f32.mrf.mxu0 }
 0x86c   :  { %1879 = vtanh.f32 %v1597_v19 }
 0x86d   :  { %v1730_v23 = vpop.f32.mrf.mxu0 }
 0x879   :  { %v1880_v24 = vpop.eup %1879 }
 0x87a   :  { %v1599_v25 = vmul.f32 0.5, %v1880_v24 }
 0x87c   :  { %v1600_v27 = vadd.f32 0.5, %v1599_v25 }
 0x87e   :  { %1602 = vst.msk [vmem:[%s2567_s6] sm:$0xff] %vm1601_vm3, %v1600_v27 }
 0x87f   :  { %1607 = vsyncpa [#allocation7], 1 }

// kernel: tpu_custom_call.1
= control target key start
LH: loop header
LB: loop body
LE: loop exit
PB: predicated region body
PF: predicated region fallthrough
CT: control target
= control target key end

     0   :  { %s2561_s0 = inlined_call_operand.vmem [shape: bf16[1,64,4], index: 0, kind: input, shape index: {}]   ;;  %s2562_s1 = inlined_call_operand.vmem [shape: bf16[4,512], index: 1, kind: input, shape index: {}]   ;;  %s2563_s2 = inlined_call_operand.hbm [shape: bf16[128,512], index: 2, kind: input, shape index: {}]   ;;  %s2564_s3 = inlined_call_operand.vmem [shape: f32[1,512], index: 3, kind: input, shape index: {}]   ;;  %s2565_s4 = inlined_call_operand.vmem [shape: bf16[128,1], index: 4, kind: input, shape index: {}]   ;;  %s2566_s5 = inlined_call_operand.<no memory space> [shape: f32[1,1], index: 5, kind: input, shape index: {}]   ;;  %s2567_s6 = inlined_call_operand.vmem [shape: f32[8,1], index: 6, kind: output, shape index: {}]  }
   0x1   :  { %v11_v0 = vstv %s2566_s5 }
   0x2   :  { %12 = vst [vmem:[#allocation5] sm:$0x1] %v11_v0 }
   0x3   :  { %13 = vsyncpa [#allocation7], 0  ;;  %s1935_s23 = smov [#allocation6]  }
   0x4   :  { %s23_s24 = sshll.u32 %s1935_s23, 4  ;;  %s24_s24 = int_to_ptr.vmem [resolvable:$true] %s23_s24 }
   0x5   :  { %s1921_s25 = scalar_lea.vmem %s24_s24, 4096  ;;  %p1926_p1 = scmp.lt.s32.totalorder %s24_s24, %s24_s24 }
   0x6   :  { %p1922_p0 = scmp.ne.s32.totalorder %s24_s24, %s1921_s25  ;;  %p1927_p2 = scmp.lt.s32.totalorder %s1921_s25, %s1921_s25 }
   0x8   :  { %p1928_p3 = por %p1927_p2, %p1926_p1 }
   0xa   :  { %p1929_p4 = pnand %p1928_p3, %p1922_p0 }
   0xc   :  { %1932 = shalt.err (!%p1929_p4)
}
   0xd   :  { %s1936_s26 = smov 256   ;;  %s1937_s27 = smov 16  }
   0xe   :  { %29 = dma.hbm_to_vmem [thread:$0]  %s2563_s2, 4096, %s24_s24, [#allocation7], %s1936_s26, %s1936_s26, %s1937_s27  }
   0xf   :  { %1933 = dma.done.wait [#allocation7], 4096  }
  0x10   :  { %1934 = vsyncadd [#allocation7], 4294963200  ;;  %v57_v1 = vlaneseq  ;;  %v1938_v2 = vmov 1983009808   ;;  %v2568_v4 = vmov 0   ;;  %v54_v8 = vld [vmem:[%s2562_s1] sm:$0xff] }
  0x11   :  { %v100_v3 = vunpack.c.l.s4 %v1938_v2  ;;  %173 = vmatprep.mubr.bf16.mxu0 %v2568_v4  ;;  %44 = vst [vmem:[#allocation2] sm:$0xf] %v2568_v4  ;;  %246 = vmatprep.mubr.bf16.mxu1 %v2568_v4  ;;  %vm128_vm0 = vcmask 1041408   ;;  %v98_v10 = vcombine.high %v54_v8, %v54_v8  ;;  %v1992_v14 = vld [vmem:[#allocation6 + $0xe4] ss:$16 sps:$4 sm:$0xff]   ;;  %v1739_v15 = vld [vmem:[%s2561_s0] sm:$0xff]  }
  0x12   :  { %v1986_v5 = vshrl.u32 %v57_v1, 7  ;;  %v1997_v18 = vld [vmem:[#allocation6 + $0xec] ss:$16 sps:$4 sm:$0xff]   ;;  %vm115_vm1 = vcmask 31744   ;;  %v1999_v19 = vld [vmem:[#allocation6 + $0xe0] ss:$16 sps:$4 sm:$0xff]  }
  0x13   :  { %v101_v6 = vunpack.c.0.s8 %v100_v3  ;;  %v2002_v20 = vld [vmem:[#allocation6 + $0xc4] ss:$16 sps:$4 sm:$0xff]   ;;  %v2004_v21 = vld [vmem:[#allocation6 + $0xe8] ss:$16 sps:$4 sm:$0xff]   ;;  %v2008_v22 = vld [vmem:[#allocation6 + $0xcc] ss:$16 sps:$4 sm:$0xff]  }
  0x14   :  { %v2011_v23 = vld [vmem:[#allocation6 + $0xc0] ss:$16 sps:$4 sm:$0xff]   ;;  %v2016_v24 = vld [vmem:[#allocation6 + $0xa4] ss:$16 sps:$4 sm:$0xff]   ;;  %v2019_v25 = vld [vmem:[#allocation6 + $0xc8] ss:$16 sps:$4 sm:$0xff]  }
  0x15   :  { %v104_v7 = vsub.s32 %v101_v6, %v1986_v5  ;;  %v1752_v26 = vld [vmem:[%s2561_s0 + $0x8] sm:$0xff]   ;;  %v2026_v27 = vld [vmem:[#allocation6 + $0xac] ss:$16 sps:$4 sm:$0xff]   ;;  %v1778_v44 = vld [vmem:[%s2561_s0 + $0x18] sm:$0xff]   ;;  %v59_v53 = vsub.s32 0, %v1986_v5  ;;  %v67_v54 = vsub.s32 2, %v1986_v5 }
  0x16   :  { %v2029_v28 = vld [vmem:[#allocation6 + $0xa0] ss:$16 sps:$4 sm:$0xff]   ;;  %v2032_v29 = vld [vmem:[#allocation6 + $0x84] ss:$16 sps:$4 sm:$0xff]   ;;  %v2035_v30 = vld [vmem:[#allocation6 + $0xa8] ss:$16 sps:$4 sm:$0xff]  }
  0x17   :  { %v105_v9 = vrot.slane %v54_v8, %v104_v7  ;;  %v112_v13 = vrot.slane %v98_v10, %v104_v7  ;;  %v2039_v31 = vld [vmem:[#allocation6 + $0x8c] ss:$16 sps:$4 sm:$0xff]   ;;  %v2042_v32 = vld [vmem:[#allocation6 + $0x80] ss:$16 sps:$4 sm:$0xff]   ;;  %v2047_v33 = vld [vmem:[#allocation6 + $0x64] ss:$16 sps:$4 sm:$0xff]  }
  0x18   :  { %v2050_v34 = vld [vmem:[#allocation6 + $0x88] ss:$16 sps:$4 sm:$0xff]   ;;  %v2057_v36 = vld [vmem:[#allocation6 + $0x6c] ss:$16 sps:$4 sm:$0xff]   ;;  %v2060_v37 = vld [vmem:[#allocation6 + $0x60] ss:$16 sps:$4 sm:$0xff]  }
  0x19   :  { %v113_v11 = vcombine.high %v105_v9, %v105_v9  ;;  %v130_v12 = vsel %vm128_vm0, %v105_v9, 0  ;;  %v114_v16 = vcombine.high %v112_v13, %v112_v13  ;;  %v136_v17 = vsel %vm128_vm0, %v112_v13, 0  ;;  %v1765_v35 = vld [vmem:[%s2561_s0 + $0x10] sm:$0xff]   ;;  %v2063_v38 = vld [vmem:[#allocation6 + $0x44] ss:$16 sps:$4 sm:$0xff]  }
  0x1a   :  { %v2066_v39 = vld [vmem:[#allocation6 + $0x68] ss:$16 sps:$4 sm:$0xff]   ;;  %v2070_v40 = vld [vmem:[#allocation6 + $0x40] ss:$16 sps:$4 sm:$0xff]   ;;  %v2072_v41 = vld [vmem:[#allocation6 + $0x4c] ss:$16 sps:$4 sm:$0xff]  }
  0x1b   :  { %1619 = vmatprep.subr.msk.bf16.mxu0 %vm128_vm0, %v113_v11  ;;  %1624 = vmatprep.subr.msk.bf16.mxu1 %vm128_vm0, %v114_v16  ;;  %v2076_v42 = vld [vmem:[#allocation6 + $0x48] ss:$16 sps:$4 sm:$0xff]   ;;  %v2078_v43 = vld [vmem:[#allocation6 + $0x24] ss:$16 sps:$4 sm:$0xff]   ;;  %v2085_v45 = vld [vmem:[#allocation6 + $0x2c] ss:$16 sps:$4 sm:$0xff]  }
  0x1c   :  { %156 = vmatpush1.bf16.msra.mxu0 %v130_v12  ;;  %229 = vmatpush1.bf16.msra.mxu1 %v136_v17  ;;  %v2089_v46 = vld [vmem:[#allocation6 + $0x20] ss:$16 sps:$4 sm:$0xff]   ;;  %v2094_v47 = vld [vmem:[#allocation6 + $0x4] ss:$16 sps:$4 sm:$0xff]   ;;  %v2097_v48 = vld [vmem:[#allocation6 + $0x28] ss:$16 sps:$4 sm:$0xff]  }
  0x1d   :  { %598 = vmatprep.subr.bf16.mxu0 %v1992_v14  ;;  %639 = vmatprep.subr.bf16.mxu1 %v1997_v18  ;;  %v2101_v49 = vld [vmem:[#allocation6 + $0xc] ss:$16 sps:$4 sm:$0xff]   ;;  %v2104_v50 = vld [vmem:[#allocation6] ss:$16 sps:$4 sm:$0xff]   ;;  %v2110_v51 = vld [vmem:[#allocation6 + $0x8] ss:$16 sps:$4 sm:$0xff]  }
  0x1e   :  { %v399_v52 = vld [vmem:[#allocation2] sm:$0xf]  ;;  %v63_v57 = vsub.s32 1, %v1986_v5  ;;  %v71_v62 = vsub.s32 3, %v1986_v5  ;;  %vm1941_vm2 = vmmov 0   ;;  %vm1601_vm3 = vcmask 7168  }
  0x1f   :  { %1620 = vmatmul.mubr.msk.bf16.vlgmr.msra.gmra.mxu0 %vm115_vm1, %v1739_v15  ;;  %1625 = vmatmul.mubr.msk.bf16.vlgmr.msra.gmra.mxu1 %vm115_vm1, %v1739_v15  ;;  %v55_v55 = vld [vmem:[%s2564_s3] sm:$0xf] }
  0x20   :  { %599 = vmatpush1.bf16.msra.mxu0 %v1999_v19  ;;  %183 = vmatprep.mubr.bf16.mxu0 %v2568_v4  ;;  %v2158_v60 = vrot.slane %v55_v55, %v59_v53  ;;  %v2160_v61 = vrot.slane %v55_v55, %v67_v54  ;;  %v2163_v1 = vrot.slane %v55_v55, %v63_v57 }
  0x21   :  { %600 = vmatprep.subr.bf16.mxu0 %v2002_v20  ;;  %640 = vmatpush1.bf16.msra.mxu1 %v2004_v21  ;;  %v2166_v7 = vrot.slane %v55_v55, %v71_v62 }
  0x22   :  { %256 = vmatprep.mubr.bf16.mxu1 %v2568_v4  ;;  %641 = vmatprep.subr.bf16.mxu1 %v2008_v22 }
  0x24   :  { %601 = vmatpush1.bf16.msra.mxu0 %v2011_v23 }
  0x25   :  { %602 = vmatprep.subr.bf16.mxu0 %v2016_v24  ;;  %642 = vmatpush1.bf16.msra.mxu1 %v2019_v25 }
  0x26   :  { %643 = vmatprep.subr.bf16.mxu1 %v2026_v27 }
  0x27   :  { %1621 = vmatmul.mubr.msk.bf16.gmra.mxu0 %vm115_vm1, %v1752_v26  ;;  %1626 = vmatmul.mubr.msk.bf16.gmra.mxu1 %vm115_vm1, %v1752_v26 }
  0x28   :  { %603 = vmatpush1.bf16.msra.mxu0 %v2029_v28  ;;  %193 = vmatprep.mubr.bf16.mxu0 %v2568_v4 }
  0x29   :  { %604 = vmatprep.subr.bf16.mxu0 %v2032_v29  ;;  %644 = vmatpush1.bf16.msra.mxu1 %v2035_v30 }
  0x2a   :  { %266 = vmatprep.mubr.bf16.mxu1 %v2568_v4  ;;  %645 = vmatprep.subr.bf16.mxu1 %v2039_v31 }
  0x2c   :  { %605 = vmatpush1.bf16.msra.mxu0 %v2042_v32 }
  0x2d   :  { %606 = vmatprep.subr.bf16.mxu0 %v2047_v33  ;;  %646 = vmatpush1.bf16.msra.mxu1 %v2050_v34 }
  0x2e   :  { %647 = vmatprep.subr.bf16.mxu1 %v2057_v36 }
  0x2f   :  { %1622 = vmatmul.mubr.msk.bf16.gmra.mxu0 %vm115_vm1, %v1765_v35  ;;  %1627 = vmatmul.mubr.msk.bf16.gmra.mxu1 %vm115_vm1, %v1765_v35 }
  0x30   :  { %607 = vmatpush1.bf16.msra.mxu0 %v2060_v37  ;;  %203 = vmatprep.mubr.bf16.mxu0 %v2568_v4 }
  0x31   :  { %608 = vmatprep.subr.bf16.mxu0 %v2063_v38  ;;  %648 = vmatpush1.bf16.msra.mxu1 %v2066_v39 }
  0x32   :  { %276 = vmatprep.mubr.bf16.mxu1 %v2568_v4  ;;  %649 = vmatprep.subr.bf16.mxu1 %v2072_v41 }
  0x34   :  { %609 = vmatpush1.bf16.msra.mxu0 %v2070_v40 }
  0x35   :  { %610 = vmatprep.subr.bf16.mxu0 %v2078_v43  ;;  %650 = vmatpush1.bf16.msra.mxu1 %v2076_v42 }
  0x36   :  { %651 = vmatprep.subr.bf16.mxu1 %v2085_v45 }
  0x37   :  { %1623 = vmatmul.mubr.msk.bf16.gmra.mxu0 %vm115_vm1, %v1778_v44  ;;  %1628 = vmatmul.mubr.msk.bf16.gmra.mxu1 %vm115_vm1, %v1778_v44 }
  0x38   :  { %611 = vmatpush1.bf16.msra.mxu0 %v2089_v46  ;;  %630 = vmatprep.mubr.bf16.mxu0 %v2568_v4 }
  0x39   :  { %612 = vmatprep.subr.bf16.mxu0 %v2094_v47  ;;  %652 = vmatpush1.bf16.msra.mxu1 %v2097_v48 }
  0x3a   :  { %671 = vmatprep.mubr.bf16.mxu1 %v2568_v4  ;;  %653 = vmatprep.subr.bf16.mxu1 %v2101_v49 }
  0x3c   :  { %613 = vmatpush1.bf16.msra.mxu0 %v2104_v50 }
  0x3d   :  { %709 = vmatprep.subr.bf16.mxu0 %v1992_v14  ;;  %654 = vmatpush1.bf16.msra.mxu1 %v2110_v51 }
  0x3e   :  { %750 = vmatprep.subr.bf16.mxu1 %v1997_v18 }
  0x3f   :  { %631 = vmatmul.mubr.bf16.vlgmr.msra.gmra.mxu0 %v399_v52 }
  0x40   :  { %710 = vmatpush1.bf16.msra.mxu0 %v1999_v19  ;;  %741 = vmatprep.mubr.bf16.mxu0 %v2568_v4 }
  0x41   :  { %672 = vmatmul.mubr.bf16.vlgmr.msra.gmra.mxu1 %v399_v52  ;;  %711 = vmatprep.subr.bf16.mxu0 %v2002_v20 }
  0x42   :  { %751 = vmatpush1.bf16.msra.mxu1 %v2004_v21  ;;  %782 = vmatprep.mubr.bf16.mxu1 %v2568_v4 }
  0x43   :  { %752 = vmatprep.subr.bf16.mxu1 %v2008_v22 }
  0x44   :  { %712 = vmatpush1.bf16.msra.mxu0 %v2011_v23 }
  0x45   :  { %713 = vmatprep.subr.bf16.mxu0 %v2016_v24 }
  0x46   :  { %753 = vmatpush1.bf16.msra.mxu1 %v2019_v25 }
  0x47   :  { %754 = vmatprep.subr.bf16.mxu1 %v2026_v27 }
  0x48   :  { %714 = vmatpush1.bf16.msra.mxu0 %v2029_v28 }
  0x49   :  { %715 = vmatprep.subr.bf16.mxu0 %v2032_v29 }
  0x4a   :  { %755 = vmatpush1.bf16.msra.mxu1 %v2035_v30 }
  0x4b   :  { %756 = vmatprep.subr.bf16.mxu1 %v2039_v31 }
  0x4c   :  { %716 = vmatpush1.bf16.msra.mxu0 %v2042_v32 }
  0x4d   :  { %717 = vmatprep.subr.bf16.mxu0 %v2047_v33 }
  0x4e   :  { %757 = vmatpush1.bf16.msra.mxu1 %v2050_v34 }
  0x4f   :  { %758 = vmatprep.subr.bf16.mxu1 %v2057_v36 }
  0x50   :  { %718 = vmatpush1.bf16.msra.mxu0 %v2060_v37 }
  0x51   :  { %719 = vmatprep.subr.bf16.mxu0 %v2063_v38 }
  0x52   :  { %759 = vmatpush1.bf16.msra.mxu1 %v2066_v39 }
  0x53   :  { %760 = vmatprep.subr.bf16.mxu1 %v2072_v41 }
  0x54   :  { %720 = vmatpush1.bf16.msra.mxu0 %v2070_v40 }
  0x55   :  { %721 = vmatprep.subr.bf16.mxu0 %v2078_v43 }
  0x56   :  { %761 = vmatpush1.bf16.msra.mxu1 %v2076_v42 }
  0x57   :  { %762 = vmatprep.subr.bf16.mxu1 %v2085_v45 }
  0x58   :  { %722 = vmatpush1.bf16.msra.mxu0 %v2089_v46 }
  0x59   :  { %723 = vmatprep.subr.bf16.mxu0 %v2094_v47 }
  0x5a   :  { %763 = vmatpush1.bf16.msra.mxu1 %v2097_v48 }
  0x5b   :  { %764 = vmatprep.subr.bf16.mxu1 %v2101_v49 }
  0x5c   :  { %724 = vmatpush1.bf16.msra.mxu0 %v2104_v50 }
  0x5d   :  { %820 = vmatprep.subr.bf16.mxu0 %v1992_v14 }
  0x5e   :  { %765 = vmatpush1.bf16.msra.mxu1 %v2110_v51 }
  0x5f   :  { %861 = vmatprep.subr.bf16.mxu1 %v1997_v18 }
  0xdf   :  { %v175_v56 = vpop.f32.mrf.mxu0  ;;  %v248_v59 = vpop.f32.mrf.mxu1 }
  0xe1   :  { %v177_v58 = vpop.f32.mrf.mxu0  ;;  %v250_v0 = vpop.f32.mrf.mxu1 }
  0xe3   :  { %v179_v63 = vpop.f32.mrf.mxu0  ;;  %v252_v6 = vpop.f32.mrf.mxu1 }
  0xe4   :  { %v180_v2 = vadd.f32 %v179_v63, %v2158_v60  ;;  %v253_v9 = vadd.f32 %v252_v6, %v2160_v61 }
  0xe5   :  { %v181_v3 = vpop.f32.mrf.mxu0  ;;  %v254_v11 = vpop.f32.mrf.mxu1 }
  0xe6   :  { %v182_v8 = vadd.f32 %v181_v3, %v2163_v1  ;;  %v255_v13 = vadd.f32 %v254_v11, %v2166_v7 }
  0xe7   :  { %v185_v10 = vpop.f32.mrf.mxu0  ;;  %v258_v16 = vpop.f32.mrf.mxu1 }
  0xe8   :  { %v2170_v12 = vpack.c.bf16 %v182_v8, %v180_v2  ;;  %v186_v5 = vadd.f32 %v185_v10, %v2158_v60  ;;  %v2174_v17 = vpack.c.bf16 %v255_v13, %v253_v9  ;;  %v259_v35 = vadd.f32 %v258_v16, %v2160_v61 }
  0xe9   :  { %v187_v15 = vpop.f32.mrf.mxu0  ;;  %v260_v52 = vpop.f32.mrf.mxu1 }
  0xea   :  { %v188_v26 = vadd.f32 %v187_v15, %v2163_v1  ;;  %v261_v55 = vadd.f32 %v260_v52, %v2166_v7 }
  0xeb   :  { %v189_v44 = vpop.f32.mrf.mxu0  ;;  %v262_v62 = vpop.f32.mrf.mxu1 }
  0xec   :  { %v2178_v53 = vpack.c.bf16 %v188_v26, %v186_v5  ;;  %v190_v54 = vadd.f32 %v189_v44, %v2158_v60  ;;  %v2182_v63 = vpack.c.bf16 %v261_v55, %v259_v35  ;;  %v263_v3 = vadd.f32 %v262_v62, %v2160_v61 }
  0xed   :  { %v191_v57 = vpop.f32.mrf.mxu0  ;;  %v264_v8 = vpop.f32.mrf.mxu1 }
  0xee   :  { %v192_v2 = vadd.f32 %v191_v57, %v2163_v1  ;;  %v265_v11 = vadd.f32 %v264_v8, %v2166_v7 }
  0xef   :  { %v195_v6 = vpop.f32.mrf.mxu0  ;;  %v268_v13 = vpop.f32.mrf.mxu1 }
  0xf0   :  { %v2186_v9 = vpack.c.bf16 %v192_v2, %v190_v54  ;;  %v196_v10 = vadd.f32 %v195_v6, %v2158_v60  ;;  %v2190_v15 = vpack.c.bf16 %v265_v11, %v263_v3  ;;  %v269_v26 = vadd.f32 %v268_v13, %v2160_v61 }
  0xf1   :  { %v197_v5 = vpop.f32.mrf.mxu0  ;;  %v270_v44 = vpop.f32.mrf.mxu1  ;;  %v178_v2 = vadd.f32 %v177_v58, %v2163_v1  ;;  %v176_v13 = vadd.f32 %v175_v56, %v2158_v60  ;;  %v251_v58 = vadd.f32 %v250_v0, %v2166_v7 }
  0xf2   :  { %v198_v16 = vadd.f32 %v197_v5, %v2163_v1  ;;  %v271_v54 = vadd.f32 %v270_v44, %v2166_v7  ;;  %v249_v44 = vadd.f32 %v248_v59, %v2160_v61 }
  0xf3   :  { %v199_v35 = vpop.f32.mrf.mxu0  ;;  %v272_v62 = vpop.f32.mrf.mxu1  ;;  %v1686_v4 = vpack.c.bf16 %v178_v2, %v176_v13 }
  0xf4   :  { %v2194_v52 = vpack.c.bf16 %v198_v16, %v196_v10  ;;  %v200_v55 = vadd.f32 %v199_v35, %v2158_v60  ;;  %v2199_v6 = vpack.c.bf16 %v271_v54, %v269_v26  ;;  %v273_v8 = vadd.f32 %v272_v62, %v2160_v61 }
  0xf5   :  { %v201_v57 = vpop.f32.mrf.mxu0  ;;  %v274_v5 = vpop.f32.mrf.mxu1  ;;  %v1687_v59 = vpack.c.bf16 %v251_v58, %v249_v44  ;;  %v680_v13 = vunpack.c.l.bf16 %v1686_v4 }
  0xf6   :  { %2574 = vst [vmem:[#allocation9_spill] sm:$0xff] %v2194_v52  ;;  %2575 = vst [vmem:[#allocation10_spill] sm:$0xff] %v2199_v6  ;;  %v202_v3 = vadd.f32 %v201_v57, %v2163_v1  ;;  %v275_v35 = vadd.f32 %v274_v5, %v2166_v7 }
  0xf7   :  { %v205_v11 = vpop.f32.mrf.mxu0  ;;  %v278_v54 = vpop.f32.mrf.mxu1  ;;  %v682_v58 = vunpack.c.l.bf16 %v1687_v59 }
  0xf8   :  { %v2204_v10 = vpack.c.bf16 %v202_v3, %v200_v55  ;;  %v206_v16 = vadd.f32 %v205_v11, %v2158_v60  ;;  %v2210_v57 = vpack.c.bf16 %v275_v35, %v273_v8  ;;  %v279_v6 = vadd.f32 %v278_v54, %v2160_v61 }
  0xf9   :  { %v207_v26 = vpop.f32.mrf.mxu0  ;;  %v280_v55 = vpop.f32.mrf.mxu1 }
  0xfa   :  { %2576 = vst [vmem:[#allocation11_spill] sm:$0xff] %v2204_v10  ;;  %v208_v62 = vadd.f32 %v207_v26, %v2163_v1  ;;  %v281_v5 = vadd.f32 %v280_v55, %v2166_v7 }
  0xfb   :  { %v209_v56 = vpop.f32.mrf.mxu0  ;;  %v282_v0 = vpop.f32.mrf.mxu1 }
  0xfc   :  { %v2214_v3 = vpack.c.bf16 %v208_v62, %v206_v16  ;;  %v210_v11 = vadd.f32 %v209_v56, %v2158_v60  ;;  %v2218_v52 = vpack.c.bf16 %v281_v5, %v279_v6  ;;  %v283_v8 = vadd.f32 %v282_v0, %v2160_v61 }
  0xfd   :  { %v211_v10 = vpop.f32.mrf.mxu0  ;;  %v284_v35 = vpop.f32.mrf.mxu1  ;;  %v681_v60 = vunpack.c.h.bf16 %v1686_v4 }
  0xfe   :  { %2577 = vst [vmem:[#allocation12_spill] sm:$0xff] %v2218_v52  ;;  %v212_v2 = vadd.f32 %v211_v10, %v2163_v1  ;;  %v285_v16 = vadd.f32 %v284_v35, %v2166_v7 }
  0xff   :  { %v632_v26 = vpop.f32.mrf.mxu0 }
 0x100   :  { %v2222_v54 = vpack.c.bf16 %v212_v2, %v210_v11  ;;  %v684_v62 = vadd.f32 %v680_v13, %v632_v26  ;;  %v2225_v44 = vpack.c.bf16 %v285_v16, %v283_v8  ;;  %v683_v11 = vunpack.c.h.bf16 %v1687_v59 }
 0x101   :  { %v634_v56 = vpop.f32.mrf.mxu0  ;;  %v673_v55 = vpop.f32.mrf.mxu1 }
 0x102   :  { %1799 = vtanh.f32 %v684_v62  ;;  %v685_v6 = vadd.f32 %v681_v60, %v634_v56  ;;  %v686_v61 = vadd.f32 %v682_v58, %v673_v55 }
 0x103   :  { %v636_v5 = vpop.f32.mrf.mxu0  ;;  %v675_v1 = vpop.f32.mrf.mxu1 }
 0x104   :  { %1801 = vtanh.f32 %v685_v6  ;;  %v687_v2 = vadd.f32 %v683_v11, %v675_v1  ;;  %v2578_v1 = vmov 0  }
 0x105   :  { %v637_v10 = vpop.f32.mrf.mxu0  ;;  %v677_v0 = vpop.f32.mrf.mxu1  ;;  %1803 = vtanh.f32 %v686_v61  ;;  %v791_v61 = vunpack.c.l.bf16 %v2170_v12 }
 0x106   :  { %1805 = vtanh.f32 %v687_v2  ;;  %v793_v2 = vunpack.c.l.bf16 %v2174_v17 }
 0x107   :  { %v678_v52 = vpop.f32.mrf.mxu1 }
 0x10f   :  { %v1800_v7 = vpop.eup %1799 }
 0x110   :  { %v692_v13 = vmul.f32 0.5, %v1800_v7  ;;  %v792_v7 = vunpack.c.h.bf16 %v2170_v12 }
 0x111   :  { %v1802_v4 = vpop.eup %1801 }
 0x112   :  { %v693_v35 = vadd.f32 0.5, %v692_v13  ;;  %v694_v26 = vmul.f32 0.5, %v1802_v4  ;;  %v1804_v16 = vpop.eup %1803 }
 0x113   :  { %v1806_v55 = vpop.eup %1805 }
 0x114   :  { %v695_v8 = vadd.f32 0.5, %v694_v26  ;;  %v699_v60 = vmul.f32 %v1804_v16, %v693_v35  ;;  %v696_v6 = vmul.f32 0.5, %v1806_v55  ;;  %v794_v55 = vunpack.c.h.bf16 %v2174_v17 }
 0x116   :  { %v698_v62 = vmul.f32 0.0, %v695_v8  ;;  %v697_v52 = vadd.f32 0.5, %v696_v6 }
 0x118   :  { %v2227_v56 = vadd.f32 %v699_v60, %v698_v62 }
 0x11a   :  { %1807 = vtanh.f32 %v2227_v56 }
 0x127   :  { %v1808_v58 = vpop.eup %1807 }
 0x128   :  { %v702_v59 = vmul.f32 %v1808_v58, %v697_v52 }
 0x12a   :  { %v703_v5 = vpack.c.bf16 %v702_v59, %v702_v59 }
 0x12c   :  { %742 = vmatmul.mubr.bf16.vlgmr.msra.gmra.mxu0 %v703_v5  ;;  %783 = vmatmul.mubr.bf16.vlgmr.msra.gmra.mxu1 %v703_v5 }
 0x12d   :  { %821 = vmatpush1.bf16.msra.mxu0 %v1999_v19  ;;  %862 = vmatpush1.bf16.msra.mxu1 %v2004_v21 }
 0x12e   :  { %822 = vmatprep.subr.bf16.mxu0 %v2002_v20  ;;  %863 = vmatprep.subr.bf16.mxu1 %v2008_v22 }
 0x12f   :  { %852 = vmatprep.mubr.bf16.mxu0 %v2578_v1  ;;  %893 = vmatprep.mubr.bf16.mxu1 %v2578_v1 }
 0x131   :  { %823 = vmatpush1.bf16.msra.mxu0 %v2011_v23  ;;  %864 = vmatpush1.bf16.msra.mxu1 %v2019_v25 }
 0x132   :  { %824 = vmatprep.subr.bf16.mxu0 %v2016_v24  ;;  %865 = vmatprep.subr.bf16.mxu1 %v2026_v27 }
 0x135   :  { %825 = vmatpush1.bf16.msra.mxu0 %v2029_v28  ;;  %866 = vmatpush1.bf16.msra.mxu1 %v2035_v30 }
 0x136   :  { %826 = vmatprep.subr.bf16.mxu0 %v2032_v29  ;;  %867 = vmatprep.subr.bf16.mxu1 %v2039_v31 }
 0x139   :  { %827 = vmatpush1.bf16.msra.mxu0 %v2042_v32  ;;  %868 = vmatpush1.bf16.msra.mxu1 %v2050_v34 }
 0x13a   :  { %828 = vmatprep.subr.bf16.mxu0 %v2047_v33  ;;  %869 = vmatprep.subr.bf16.mxu1 %v2057_v36 }
 0x13d   :  { %829 = vmatpush1.bf16.msra.mxu0 %v2060_v37  ;;  %870 = vmatpush1.bf16.msra.mxu1 %v2066_v39 }
 0x13e   :  { %830 = vmatprep.subr.bf16.mxu0 %v2063_v38  ;;  %871 = vmatprep.subr.bf16.mxu1 %v2072_v41 }
 0x141   :  { %831 = vmatpush1.bf16.msra.mxu0 %v2070_v40  ;;  %872 = vmatpush1.bf16.msra.mxu1 %v2076_v42 }
 0x142   :  { %832 = vmatprep.subr.bf16.mxu0 %v2078_v43  ;;  %873 = vmatprep.subr.bf16.mxu1 %v2085_v45 }
 0x145   :  { %833 = vmatpush1.bf16.msra.mxu0 %v2089_v46  ;;  %874 = vmatpush1.bf16.msra.mxu1 %v2097_v48 }
 0x146   :  { %834 = vmatprep.subr.bf16.mxu0 %v2094_v47  ;;  %875 = vmatprep.subr.bf16.mxu1 %v2101_v49 }
 0x149   :  { %835 = vmatpush1.bf16.msra.mxu0 %v2104_v50  ;;  %876 = vmatpush1.bf16.msra.mxu1 %v2110_v51 }
 0x14a   :  { %931 = vmatprep.subr.bf16.mxu0 %v1992_v14  ;;  %972 = vmatprep.subr.bf16.mxu1 %v1997_v18 }
 0x1ec   :  { %v743_v10 = vpop.f32.mrf.mxu0  ;;  %v784_v0 = vpop.f32.mrf.mxu1 }
 0x1ed   :  { %v795_v11 = vadd.f32 %v791_v61, %v743_v10  ;;  %v797_v35 = vadd.f32 %v793_v2, %v784_v0 }
 0x1ee   :  { %v745_v13 = vpop.f32.mrf.mxu0  ;;  %v786_v4 = vpop.f32.mrf.mxu1 }
 0x1ef   :  { %1809 = vtanh.f32 %v795_v11  ;;  %v796_v26 = vadd.f32 %v792_v7, %v745_v13  ;;  %v798_v6 = vadd.f32 %v794_v55, %v786_v4  ;;  %v903_v55 = vunpack.c.h.bf16 %v2178_v53 }
 0x1f0   :  { %v747_v8 = vpop.f32.mrf.mxu0  ;;  %v788_v16 = vpop.f32.mrf.mxu1 }
 0x1f1   :  { %1811 = vtanh.f32 %v796_v26 }
 0x1f2   :  { %v748_v62 = vpop.f32.mrf.mxu0  ;;  %v789_v60 = vpop.f32.mrf.mxu1  ;;  %1813 = vtanh.f32 %v797_v35 }
 0x1f3   :  { %1815 = vtanh.f32 %v798_v6  ;;  %v904_v60 = vunpack.c.l.bf16 %v2182_v63 }
 0x1fc   :  { %v1810_v52 = vpop.eup %1809 }
 0x1fd   :  { %v803_v58 = vmul.f32 0.5, %v1810_v52 }
 0x1fe   :  { %v1812_v59 = vpop.eup %1811 }
 0x1ff   :  { %v804_v5 = vadd.f32 0.5, %v803_v58  ;;  %v805_v61 = vmul.f32 0.5, %v1812_v59  ;;  %v1814_v12 = vpop.eup %1813 }
 0x200   :  { %v1816_v7 = vpop.eup %1815 }
 0x201   :  { %v806_v10 = vadd.f32 0.5, %v805_v61  ;;  %v810_v11 = vmul.f32 %v1814_v12, %v804_v5  ;;  %v807_v13 = vmul.f32 0.5, %v1816_v7 }
 0x203   :  { %v809_v0 = vmul.f32 %v806_v10, %v2227_v56  ;;  %v808_v35 = vadd.f32 0.5, %v807_v13  ;;  %v902_v56 = vunpack.c.l.bf16 %v2178_v53 }
 0x205   :  { %v2269_v2 = vadd.f32 %v810_v11, %v809_v0  ;;  %v905_v11 = vunpack.c.h.bf16 %v2182_v63 }
 0x207   :  { %1817 = vtanh.f32 %v2269_v2 }
 0x214   :  { %v1818_v17 = vpop.eup %1817 }
 0x215   :  { %v813_v4 = vmul.f32 %v1818_v17, %v808_v35 }
 0x217   :  { %v814_v26 = vpack.c.bf16 %v813_v4, %v813_v4 }
 0x219   :  { %853 = vmatmul.mubr.bf16.vlgmr.msra.gmra.mxu0 %v814_v26  ;;  %894 = vmatmul.mubr.bf16.vlgmr.msra.gmra.mxu1 %v814_v26 }
 0x21a   :  { %932 = vmatpush1.bf16.msra.mxu0 %v1999_v19  ;;  %973 = vmatpush1.bf16.msra.mxu1 %v2004_v21 }
 0x21b   :  { %933 = vmatprep.subr.bf16.mxu0 %v2002_v20  ;;  %974 = vmatprep.subr.bf16.mxu1 %v2008_v22 }
 0x21c   :  { %963 = vmatprep.mubr.bf16.mxu0 %v2578_v1  ;;  %1004 = vmatprep.mubr.bf16.mxu1 %v2578_v1 }
 0x21e   :  { %934 = vmatpush1.bf16.msra.mxu0 %v2011_v23  ;;  %975 = vmatpush1.bf16.msra.mxu1 %v2019_v25 }
 0x21f   :  { %935 = vmatprep.subr.bf16.mxu0 %v2016_v24  ;;  %976 = vmatprep.subr.bf16.mxu1 %v2026_v27 }
 0x222   :  { %936 = vmatpush1.bf16.msra.mxu0 %v2029_v28  ;;  %977 = vmatpush1.bf16.msra.mxu1 %v2035_v30 }
 0x223   :  { %937 = vmatprep.subr.bf16.mxu0 %v2032_v29  ;;  %978 = vmatprep.subr.bf16.mxu1 %v2039_v31 }
 0x226   :  { %938 = vmatpush1.bf16.msra.mxu0 %v2042_v32  ;;  %979 = vmatpush1.bf16.msra.mxu1 %v2050_v34 }
 0x227   :  { %939 = vmatprep.subr.bf16.mxu0 %v2047_v33  ;;  %980 = vmatprep.subr.bf16.mxu1 %v2057_v36 }
 0x22a   :  { %940 = vmatpush1.bf16.msra.mxu0 %v2060_v37  ;;  %981 = vmatpush1.bf16.msra.mxu1 %v2066_v39 }
 0x22b   :  { %941 = vmatprep.subr.bf16.mxu0 %v2063_v38  ;;  %982 = vmatprep.subr.bf16.mxu1 %v2072_v41 }
 0x22e   :  { %942 = vmatpush1.bf16.msra.mxu0 %v2070_v40  ;;  %983 = vmatpush1.bf16.msra.mxu1 %v2076_v42 }
 0x22f   :  { %943 = vmatprep.subr.bf16.mxu0 %v2078_v43  ;;  %984 = vmatprep.subr.bf16.mxu1 %v2085_v45 }
 0x232   :  { %944 = vmatpush1.bf16.msra.mxu0 %v2089_v46  ;;  %985 = vmatpush1.bf16.msra.mxu1 %v2097_v48 }
 0x233   :  { %945 = vmatprep.subr.bf16.mxu0 %v2094_v47  ;;  %986 = vmatprep.subr.bf16.mxu1 %v2101_v49 }
 0x236   :  { %946 = vmatpush1.bf16.msra.mxu0 %v2104_v50  ;;  %987 = vmatpush1.bf16.msra.mxu1 %v2110_v51 }
 0x237   :  { %1042 = vmatprep.subr.bf16.mxu0 %v1992_v14  ;;  %1083 = vmatprep.subr.bf16.mxu1 %v1997_v18 }
 0x2d9   :  { %v854_v8 = vpop.f32.mrf.mxu0  ;;  %v895_v16 = vpop.f32.mrf.mxu1 }
 0x2da   :  { %v906_v62 = vadd.f32 %v902_v56, %v854_v8  ;;  %v908_v58 = vadd.f32 %v904_v60, %v895_v16 }
 0x2db   :  { %v856_v6 = vpop.f32.mrf.mxu0  ;;  %v897_v52 = vpop.f32.mrf.mxu1 }
 0x2dc   :  { %1819 = vtanh.f32 %v906_v62  ;;  %v907_v59 = vadd.f32 %v903_v55, %v856_v6  ;;  %v909_v0 = vadd.f32 %v905_v11, %v897_v52 }
 0x2dd   :  { %v858_v5 = vpop.f32.mrf.mxu0  ;;  %v899_v61 = vpop.f32.mrf.mxu1 }
 0x2de   :  { %1821 = vtanh.f32 %v907_v59  ;;  %v1015_v59 = vunpack.c.l.bf16 %v2190_v15  ;;  %v1014_v5 = vunpack.c.h.bf16 %v2186_v9 }
 0x2df   :  { %v859_v12 = vpop.f32.mrf.mxu0  ;;  %v900_v10 = vpop.f32.mrf.mxu1  ;;  %1823 = vtanh.f32 %v908_v58 }
 0x2e0   :  { %1825 = vtanh.f32 %v909_v0 }
 0x2e9   :  { %v1820_v7 = vpop.eup %1819 }
 0x2ea   :  { %v914_v13 = vmul.f32 0.5, %v1820_v7 }
 0x2eb   :  { %v1822_v35 = vpop.eup %1821 }
 0x2ec   :  { %v915_v17 = vadd.f32 0.5, %v914_v13  ;;  %v916_v4 = vmul.f32 0.5, %v1822_v35  ;;  %v1824_v53 = vpop.eup %1823 }
 0x2ed   :  { %v1826_v62 = vpop.eup %1825 }
 0x2ee   :  { %v917_v26 = vadd.f32 0.5, %v916_v4  ;;  %v921_v56 = vmul.f32 %v1824_v53, %v915_v17  ;;  %v918_v60 = vmul.f32 0.5, %v1826_v62 }
 0x2f0   :  { %v920_v8 = vmul.f32 %v917_v26, %v2269_v2  ;;  %v919_v55 = vadd.f32 0.5, %v918_v60 }
 0x2f2   :  { %v2311_v16 = vadd.f32 %v921_v56, %v920_v8 }
 0x2f4   :  { %1827 = vtanh.f32 %v2311_v16 }
 0x301   :  { %v1828_v63 = vpop.eup %1827 }
 0x302   :  { %v924_v6 = vmul.f32 %v1828_v63, %v919_v55 }
 0x304   :  { %v925_v52 = vpack.c.bf16 %v924_v6, %v924_v6 }
 0x306   :  { %964 = vmatmul.mubr.bf16.vlgmr.msra.gmra.mxu0 %v925_v52  ;;  %1005 = vmatmul.mubr.bf16.vlgmr.msra.gmra.mxu1 %v925_v52 }
 0x307   :  { %1043 = vmatpush1.bf16.msra.mxu0 %v1999_v19  ;;  %1084 = vmatpush1.bf16.msra.mxu1 %v2004_v21  ;;  %v1013_v19 = vunpack.c.l.bf16 %v2186_v9 }
 0x308   :  { %1044 = vmatprep.subr.bf16.mxu0 %v2002_v20  ;;  %1085 = vmatprep.subr.bf16.mxu1 %v2008_v22 }
 0x309   :  { %1074 = vmatprep.mubr.bf16.mxu0 %v2578_v1  ;;  %1115 = vmatprep.mubr.bf16.mxu1 %v2578_v1 }
 0x30b   :  { %1045 = vmatpush1.bf16.msra.mxu0 %v2011_v23  ;;  %1086 = vmatpush1.bf16.msra.mxu1 %v2019_v25 }
 0x30c   :  { %1046 = vmatprep.subr.bf16.mxu0 %v2016_v24  ;;  %1087 = vmatprep.subr.bf16.mxu1 %v2026_v27 }
 0x30f   :  { %1047 = vmatpush1.bf16.msra.mxu0 %v2029_v28  ;;  %1088 = vmatpush1.bf16.msra.mxu1 %v2035_v30 }
 0x310   :  { %1048 = vmatprep.subr.bf16.mxu0 %v2032_v29  ;;  %1089 = vmatprep.subr.bf16.mxu1 %v2039_v31 }
 0x313   :  { %1049 = vmatpush1.bf16.msra.mxu0 %v2042_v32  ;;  %1090 = vmatpush1.bf16.msra.mxu1 %v2050_v34 }
 0x314   :  { %1050 = vmatprep.subr.bf16.mxu0 %v2047_v33  ;;  %1091 = vmatprep.subr.bf16.mxu1 %v2057_v36 }
 0x317   :  { %1051 = vmatpush1.bf16.msra.mxu0 %v2060_v37  ;;  %1092 = vmatpush1.bf16.msra.mxu1 %v2066_v39 }
 0x318   :  { %1052 = vmatprep.subr.bf16.mxu0 %v2063_v38  ;;  %1093 = vmatprep.subr.bf16.mxu1 %v2072_v41 }
 0x31b   :  { %1053 = vmatpush1.bf16.msra.mxu0 %v2070_v40  ;;  %1094 = vmatpush1.bf16.msra.mxu1 %v2076_v42 }
 0x31c   :  { %1054 = vmatprep.subr.bf16.mxu0 %v2078_v43  ;;  %1095 = vmatprep.subr.bf16.mxu1 %v2085_v45 }
 0x31f   :  { %1055 = vmatpush1.bf16.msra.mxu0 %v2089_v46  ;;  %1096 = vmatpush1.bf16.msra.mxu1 %v2097_v48 }
 0x320   :  { %1056 = vmatprep.subr.bf16.mxu0 %v2094_v47  ;;  %1097 = vmatprep.subr.bf16.mxu1 %v2101_v49 }
 0x323   :  { %1057 = vmatpush1.bf16.msra.mxu0 %v2104_v50  ;;  %1098 = vmatpush1.bf16.msra.mxu1 %v2110_v51 }
 0x324   :  { %1153 = vmatprep.subr.bf16.mxu0 %v1992_v14  ;;  %1194 = vmatprep.subr.bf16.mxu1 %v1997_v18  ;;  %v1016_v18 = vunpack.c.h.bf16 %v2190_v15 }
 0x3c6   :  { %v965_v20 = vpop.f32.mrf.mxu0  ;;  %v1006_v2 = vpop.f32.mrf.mxu1 }
 0x3c7   :  { %v1017_v58 = vadd.f32 %v1013_v19, %v965_v20  ;;  %v1019_v10 = vadd.f32 %v1015_v59, %v1006_v2  ;;  %v2356_v2 = vld [vmem:[#allocation6 + $0xe0] ss:$16 sps:$4 sm:$0xff]  }
 0x3c8   :  { %v967_v61 = vpop.f32.mrf.mxu0  ;;  %v1008_v12 = vpop.f32.mrf.mxu1 }
 0x3c9   :  { %1829 = vtanh.f32 %v1017_v58  ;;  %v1018_v11 = vadd.f32 %v1014_v5, %v967_v61  ;;  %v1020_v35 = vadd.f32 %v1016_v18, %v1008_v12  ;;  %v2360_v58 = vld [vmem:[#allocation6 + $0xc4] ss:$16 sps:$4 sm:$0xff]  }
 0x3ca   :  { %v969_v0 = vpop.f32.mrf.mxu0  ;;  %v1010_v7 = vpop.f32.mrf.mxu1 }
 0x3cb   :  { %1831 = vtanh.f32 %v1018_v11 }
 0x3cc   :  { %v970_v14 = vpop.f32.mrf.mxu0  ;;  %v1011_v13 = vpop.f32.mrf.mxu1  ;;  %1833 = vtanh.f32 %v1019_v10 }
 0x3cd   :  { %1835 = vtanh.f32 %v1020_v35 }
 0x3d6   :  { %v1830_v17 = vpop.eup %1829 }
 0x3d7   :  { %v1025_v4 = vmul.f32 0.5, %v1830_v17  ;;  %v2407_v17 = vld [vmem:[#allocation6 + $0xe8] ss:$16 sps:$4 sm:$0xff]  }
 0x3d8   :  { %v1832_v53 = vpop.eup %1831 }
 0x3d9   :  { %v1026_v26 = vadd.f32 0.5, %v1025_v4  ;;  %v1027_v56 = vmul.f32 0.5, %v1832_v53  ;;  %v1834_v9 = vpop.eup %1833  ;;  %v2411_v4 = vld [vmem:[#allocation6 + $0xcc] ss:$16 sps:$4 sm:$0xff]   ;;  %v2416_v53 = vld [vmem:[#allocation6 + $0xc0] ss:$16 sps:$4 sm:$0xff]  }
 0x3da   :  { %v1836_v63 = vpop.eup %1835 }
 0x3db   :  { %v1028_v8 = vadd.f32 0.5, %v1027_v56  ;;  %v1032_v62 = vmul.f32 %v1834_v9, %v1026_v26  ;;  %v1029_v6 = vmul.f32 0.5, %v1836_v63  ;;  %v2419_v26 = vld [vmem:[#allocation6 + $0xc8] ss:$16 sps:$4 sm:$0xff]   ;;  %v2422_v56 = vld [vmem:[#allocation6 + $0xa4] ss:$16 sps:$4 sm:$0xff]  }
 0x3dc   :  { %v2425_v9 = vld [vmem:[#allocation6 + $0xac] ss:$16 sps:$4 sm:$0xff]   ;;  %v2440_v63 = vld [vmem:[#allocation6 + $0x80] ss:$16 sps:$4 sm:$0xff]  }
 0x3dd   :  { %v1031_v60 = vmul.f32 %v1028_v8, %v2311_v16  ;;  %v1030_v52 = vadd.f32 0.5, %v1029_v6  ;;  %v2428_v8 = vld [vmem:[#allocation6 + $0xa0] ss:$16 sps:$4 sm:$0xff]   ;;  %v2443_v6 = vld [vmem:[#allocation6 + $0x88] ss:$16 sps:$4 sm:$0xff]  }
 0x3df   :  { %v2353_v55 = vadd.f32 %v1032_v62, %v1031_v60  ;;  %v2431_v62 = vld [vmem:[#allocation6 + $0xa8] ss:$16 sps:$4 sm:$0xff]   ;;  %v2434_v60 = vld [vmem:[#allocation6 + $0x84] ss:$16 sps:$4 sm:$0xff]  }
 0x3e1   :  { %1837 = vtanh.f32 %v2353_v55 }
 0x3ee   :  { %v1838_v15 = vpop.eup %1837 }
 0x3ef   :  { %v1035_v19 = vmul.f32 %v1838_v15, %v1030_v52  ;;  %v2446_v52 = vld [vmem:[#allocation6 + $0x64] ss:$16 sps:$4 sm:$0xff]   ;;  %v2449_v15 = vld [vmem:[#allocation6 + $0x6c] ss:$16 sps:$4 sm:$0xff]  }
 0x3f1   :  { %v1036_v20 = vpack.c.bf16 %v1035_v19, %v1035_v19  ;;  %v2452_v19 = vld [vmem:[#allocation6 + $0x60] ss:$16 sps:$4 sm:$0xff]  }
 0x3f3   :  { %1075 = vmatmul.mubr.bf16.vlgmr.msra.gmra.mxu0 %v1036_v20  ;;  %1116 = vmatmul.mubr.bf16.vlgmr.msra.gmra.mxu1 %v1036_v20  ;;  %v2455_v20 = vld [vmem:[#allocation6 + $0x68] ss:$16 sps:$4 sm:$0xff]  }
 0x3f4   :  { %1154 = vmatpush1.bf16.msra.mxu0 %v2356_v2  ;;  %1195 = vmatpush1.bf16.msra.mxu1 %v2004_v21  ;;  %v2392_v21 = vld [vmem:[#allocation6 + $0xe4] ss:$16 sps:$4 sm:$0xff]  }
 0x3f5   :  { %1155 = vmatprep.subr.bf16.mxu0 %v2360_v58  ;;  %1196 = vmatprep.subr.bf16.mxu1 %v2008_v22  ;;  %v2395_v22 = vld [vmem:[#allocation6 + $0xec] ss:$16 sps:$4 sm:$0xff]  }
 0x3f6   :  { %1185 = vmatprep.mubr.bf16.mxu0 %v2578_v1  ;;  %1226 = vmatprep.mubr.bf16.mxu1 %v2578_v1 }
 0x3f8   :  { %1156 = vmatpush1.bf16.msra.mxu0 %v2011_v23  ;;  %1197 = vmatpush1.bf16.msra.mxu1 %v2019_v25  ;;  %v2579_v23 = vld [vmem:[#allocation9_spill] sm:$0xff] }
 0x3f9   :  { %1157 = vmatprep.subr.bf16.mxu0 %v2016_v24  ;;  %1198 = vmatprep.subr.bf16.mxu1 %v2026_v27  ;;  %v1124_v24 = vunpack.c.l.bf16 %v2579_v23 }
 0x3fc   :  { %1158 = vmatpush1.bf16.msra.mxu0 %v2029_v28  ;;  %1199 = vmatpush1.bf16.msra.mxu1 %v2035_v30 }
 0x3fd   :  { %1159 = vmatprep.subr.bf16.mxu0 %v2032_v29  ;;  %1200 = vmatprep.subr.bf16.mxu1 %v2039_v31  ;;  %v2580_v29 = vld [vmem:[#allocation10_spill] sm:$0xff]  ;;  %v1125_v31 = vunpack.c.h.bf16 %v2579_v23  ;;  %v2458_v23 = vld [vmem:[#allocation6 + $0x44] ss:$16 sps:$4 sm:$0xff]  }
 0x3fe   :  { %v1126_v30 = vunpack.c.l.bf16 %v2580_v29 }
 0x400   :  { %1160 = vmatpush1.bf16.msra.mxu0 %v2042_v32  ;;  %1201 = vmatpush1.bf16.msra.mxu1 %v2050_v34 }
 0x401   :  { %1161 = vmatprep.subr.bf16.mxu0 %v2047_v33  ;;  %1202 = vmatprep.subr.bf16.mxu1 %v2057_v36 }
 0x404   :  { %1162 = vmatpush1.bf16.msra.mxu0 %v2060_v37  ;;  %1203 = vmatpush1.bf16.msra.mxu1 %v2066_v39 }
 0x405   :  { %1163 = vmatprep.subr.bf16.mxu0 %v2063_v38  ;;  %1204 = vmatprep.subr.bf16.mxu1 %v2072_v41  ;;  %v1127_v41 = vunpack.c.h.bf16 %v2580_v29  ;;  %v2473_v29 = vld [vmem:[#allocation6 + $0x2c] ss:$16 sps:$4 sm:$0xff]  }
 0x408   :  { %1164 = vmatpush1.bf16.msra.mxu0 %v2070_v40  ;;  %1205 = vmatpush1.bf16.msra.mxu1 %v2076_v42 }
 0x409   :  { %1165 = vmatprep.subr.bf16.mxu0 %v2078_v43  ;;  %1206 = vmatprep.subr.bf16.mxu1 %v2085_v45 }
 0x40c   :  { %1166 = vmatpush1.bf16.msra.mxu0 %v2089_v46  ;;  %1207 = vmatpush1.bf16.msra.mxu1 %v2097_v48 }
 0x40d   :  { %1167 = vmatprep.subr.bf16.mxu0 %v2094_v47  ;;  %1208 = vmatprep.subr.bf16.mxu1 %v2101_v49 }
 0x410   :  { %1168 = vmatpush1.bf16.msra.mxu0 %v2104_v50  ;;  %1209 = vmatpush1.bf16.msra.mxu1 %v2110_v51 }
 0x411   :  { %1264 = vmatprep.subr.bf16.mxu0 %v2392_v21  ;;  %1305 = vmatprep.subr.bf16.mxu1 %v2395_v22 }
 0x4b3   :  { %v1076_v25 = vpop.f32.mrf.mxu0  ;;  %v1117_v27 = vpop.f32.mrf.mxu1 }
 0x4b4   :  { %v1128_v28 = vadd.f32 %v1124_v24, %v1076_v25  ;;  %v1130_v34 = vadd.f32 %v1126_v30, %v1117_v27  ;;  %v2461_v24 = vld [vmem:[#allocation6 + $0x4c] ss:$16 sps:$4 sm:$0xff]   ;;  %v2464_v25 = vld [vmem:[#allocation6 + $0x40] ss:$16 sps:$4 sm:$0xff]   ;;  %v2467_v27 = vld [vmem:[#allocation6 + $0x48] ss:$16 sps:$4 sm:$0xff]  }
 0x4b5   :  { %v1078_v32 = vpop.f32.mrf.mxu0  ;;  %v1119_v33 = vpop.f32.mrf.mxu1  ;;  %v2476_v30 = vld [vmem:[#allocation6 + $0x20] ss:$16 sps:$4 sm:$0xff]  }
 0x4b6   :  { %1839 = vtanh.f32 %v1128_v28  ;;  %v1129_v36 = vadd.f32 %v1125_v31, %v1078_v32  ;;  %v1131_v42 = vadd.f32 %v1127_v41, %v1119_v33  ;;  %v2470_v28 = vld [vmem:[#allocation6 + $0x24] ss:$16 sps:$4 sm:$0xff]  }
 0x4b7   :  { %v1080_v37 = vpop.f32.mrf.mxu0  ;;  %v1121_v38 = vpop.f32.mrf.mxu1  ;;  %v2581_v31 = vld [vmem:[#allocation11_spill] sm:$0xff] }
 0x4b8   :  { %1841 = vtanh.f32 %v1129_v36  ;;  %v1235_v32 = vunpack.c.l.bf16 %v2581_v31  ;;  %v1237_v37 = vunpack.c.l.bf16 %v2210_v57 }
 0x4b9   :  { %v1081_v39 = vpop.f32.mrf.mxu0  ;;  %v1122_v40 = vpop.f32.mrf.mxu1  ;;  %1843 = vtanh.f32 %v1130_v34 }
 0x4ba   :  { %1845 = vtanh.f32 %v1131_v42 }
 0x4c3   :  { %v1840_v43 = vpop.eup %1839 }
 0x4c4   :  { %v1136_v45 = vmul.f32 0.5, %v1840_v43 }
 0x4c5   :  { %v1842_v46 = vpop.eup %1841 }
 0x4c6   :  { %v1137_v16 = vadd.f32 0.5, %v1136_v45  ;;  %v1138_v59 = vmul.f32 0.5, %v1842_v46  ;;  %v1844_v5 = vpop.eup %1843 }
 0x4c7   :  { %v1846_v0 = vpop.eup %1845 }
 0x4c8   :  { %v1139_v61 = vadd.f32 0.5, %v1138_v59  ;;  %v1143_v12 = vmul.f32 %v1844_v5, %v1137_v16  ;;  %v1140_v7 = vmul.f32 0.5, %v1846_v0 }
 0x4ca   :  { %v1142_v10 = vmul.f32 %v1139_v61, %v2353_v55  ;;  %v1141_v14 = vadd.f32 0.5, %v1140_v7  ;;  %v2437_v55 = vld [vmem:[#allocation6 + $0x8c] ss:$16 sps:$4 sm:$0xff]  }
 0x4cc   :  { %v2403_v11 = vadd.f32 %v1143_v12, %v1142_v10 }
 0x4ce   :  { %1847 = vtanh.f32 %v2403_v11 }
 0x4db   :  { %v1848_v13 = vpop.eup %1847 }
 0x4dc   :  { %v1146_v18 = vmul.f32 %v1848_v13, %v1141_v14 }
 0x4de   :  { %v1147_v35 = vpack.c.bf16 %v1146_v18, %v1146_v18 }
 0x4e0   :  { %1186 = vmatmul.mubr.bf16.vlgmr.msra.gmra.mxu0 %v1147_v35  ;;  %1227 = vmatmul.mubr.bf16.vlgmr.msra.gmra.mxu1 %v1147_v35  ;;  %v1912_v35 = vld [vmem:[#allocation6 + $0x8] ss:$16 sps:$4 sm:$0xff]  }
 0x4e1   :  { %1265 = vmatpush1.bf16.msra.mxu0 %v2356_v2  ;;  %1306 = vmatpush1.bf16.msra.mxu1 %v2407_v17 }
 0x4e2   :  { %1266 = vmatprep.subr.bf16.mxu0 %v2360_v58  ;;  %1307 = vmatprep.subr.bf16.mxu1 %v2411_v4 }
 0x4e3   :  { %1296 = vmatprep.mubr.bf16.mxu0 %v2578_v1  ;;  %1337 = vmatprep.mubr.bf16.mxu1 %v2578_v1 }
 0x4e5   :  { %1267 = vmatpush1.bf16.msra.mxu0 %v2416_v53  ;;  %1308 = vmatpush1.bf16.msra.mxu1 %v2419_v26 }
 0x4e6   :  { %1268 = vmatprep.subr.bf16.mxu0 %v2422_v56  ;;  %1309 = vmatprep.subr.bf16.mxu1 %v2425_v9 }
 0x4e9   :  { %1269 = vmatpush1.bf16.msra.mxu0 %v2428_v8  ;;  %1310 = vmatpush1.bf16.msra.mxu1 %v2431_v62 }
 0x4ea   :  { %1270 = vmatprep.subr.bf16.mxu0 %v2434_v60  ;;  %1311 = vmatprep.subr.bf16.mxu1 %v2437_v55 }
 0x4ed   :  { %1271 = vmatpush1.bf16.msra.mxu0 %v2440_v63  ;;  %1312 = vmatpush1.bf16.msra.mxu1 %v2443_v6 }
 0x4ee   :  { %1272 = vmatprep.subr.bf16.mxu0 %v2446_v52  ;;  %1313 = vmatprep.subr.bf16.mxu1 %v2449_v15 }
 0x4f1   :  { %1273 = vmatpush1.bf16.msra.mxu0 %v2452_v19  ;;  %1314 = vmatpush1.bf16.msra.mxu1 %v2455_v20 }
 0x4f2   :  { %1274 = vmatprep.subr.bf16.mxu0 %v2458_v23  ;;  %1315 = vmatprep.subr.bf16.mxu1 %v2461_v24 }
 0x4f5   :  { %1275 = vmatpush1.bf16.msra.mxu0 %v2464_v25  ;;  %1316 = vmatpush1.bf16.msra.mxu1 %v2467_v27 }
 0x4f6   :  { %1276 = vmatprep.subr.bf16.mxu0 %v2470_v28  ;;  %1317 = vmatprep.subr.bf16.mxu1 %v2473_v29 }
 0x4f9   :  { %1277 = vmatpush1.bf16.msra.mxu0 %v2476_v30  ;;  %1318 = vmatpush1.bf16.msra.mxu1 %v2097_v48  ;;  %v1236_v48 = vunpack.c.h.bf16 %v2581_v31 }
 0x4fa   :  { %1278 = vmatprep.subr.bf16.mxu0 %v2094_v47  ;;  %1319 = vmatprep.subr.bf16.mxu1 %v2101_v49 }
 0x4fd   :  { %1279 = vmatpush1.bf16.msra.mxu0 %v2104_v50  ;;  %1320 = vmatpush1.bf16.msra.mxu1 %v2110_v51 }
 0x4fe   :  { %1375 = vmatprep.subr.bf16.mxu0 %v2392_v21  ;;  %1416 = vmatprep.subr.bf16.mxu1 %v2395_v22  ;;  %v1238_v22 = vunpack.c.h.bf16 %v2210_v57 }
 0x5a0   :  { %v1187_v33 = vpop.f32.mrf.mxu0  ;;  %v1228_v34 = vpop.f32.mrf.mxu1 }
 0x5a1   :  { %v1239_v36 = vadd.f32 %v1235_v32, %v1187_v33  ;;  %v1241_v49 = vadd.f32 %v1237_v37, %v1228_v34 }
 0x5a2   :  { %v1189_v47 = vpop.f32.mrf.mxu0  ;;  %v1230_v38 = vpop.f32.mrf.mxu1 }
 0x5a3   :  { %1849 = vtanh.f32 %v1239_v36  ;;  %v1240_v50 = vadd.f32 %v1236_v48, %v1189_v47  ;;  %v1242_v41 = vadd.f32 %v1238_v22, %v1230_v38  ;;  %v1796_v22 = vld [vmem:[%s2565_s4 + $0x10] sm:$0xff]  }
 0x5a4   :  { %v1191_v39 = vpop.f32.mrf.mxu0  ;;  %v1232_v51 = vpop.f32.mrf.mxu1 }
 0x5a5   :  { %1851 = vtanh.f32 %v1240_v50  ;;  %v1940_v50 = vmov 0.0   ;;  %v1792_v39 = vld [vmem:[%s2565_s4 + $0x30] sm:$0xff]   ;;  %v1793_v51 = vld [vmem:[%s2565_s4 + $0x28] sm:$0xff]  }
 0x5a6   :  { %v1192_v21 = vpop.f32.mrf.mxu0  ;;  %v1233_v40 = vpop.f32.mrf.mxu1  ;;  %1853 = vtanh.f32 %v1241_v49  ;;  %v1791_v49 = vld [vmem:[%s2565_s4 + $0x38] sm:$0xff]  }
 0x5a7   :  { %1855 = vtanh.f32 %v1242_v41  ;;  %v1794_v21 = vld [vmem:[%s2565_s4 + $0x20] sm:$0xff]   ;;  %v1795_v40 = vld [vmem:[%s2565_s4 + $0x18] sm:$0xff]   ;;  %v1797_v41 = vld [vmem:[%s2565_s4 + $0x8] sm:$0xff]  }
 0x5b0   :  { %v1850_v42 = vpop.eup %1849 }
 0x5b1   :  { %v1247_v43 = vmul.f32 0.5, %v1850_v42  ;;  %v1798_v42 = vld [vmem:[%s2565_s4] sm:$0xff]  }
 0x5b2   :  { %v1852_v45 = vpop.eup %1851 }
 0x5b3   :  { %v1248_v46 = vadd.f32 0.5, %v1247_v43  ;;  %v1249_v16 = vmul.f32 0.5, %v1852_v45  ;;  %v1854_v59 = vpop.eup %1853  ;;  %v1457_v43 = vunpack.c.l.bf16 %v2222_v54 }
 0x5b4   :  { %v1856_v0 = vpop.eup %1855 }
 0x5b5   :  { %v1250_v5 = vadd.f32 0.5, %v1249_v16  ;;  %v1254_v61 = vmul.f32 %v1854_v59, %v1248_v46  ;;  %v1251_v7 = vmul.f32 0.5, %v1856_v0  ;;  %v1459_v59 = vunpack.c.l.bf16 %v2225_v44 }
 0x5b7   :  { %v1253_v12 = vmul.f32 %v1250_v5, %v2403_v11  ;;  %v1252_v14 = vadd.f32 0.5, %v1251_v7  ;;  %v1911_v11 = vld [vmem:[#allocation6] ss:$16 sps:$4 sm:$0xff]   ;;  %v1458_v5 = vunpack.c.h.bf16 %v2222_v54 }
 0x5b9   :  { %v2491_v10 = vadd.f32 %v1254_v61, %v1253_v12 }
 0x5bb   :  { %1857 = vtanh.f32 %v2491_v10 }
 0x5c8   :  { %v1858_v57 = vpop.eup %1857 }
 0x5c9   :  { %v1257_v13 = vmul.f32 %v1858_v57, %v1252_v14 }
 0x5cb   :  { %v1258_v18 = vpack.c.bf16 %v1257_v13, %v1257_v13 }
 0x5cd   :  { %1297 = vmatmul.mubr.bf16.vlgmr.msra.gmra.mxu0 %v1258_v18  ;;  %1338 = vmatmul.mubr.bf16.vlgmr.msra.gmra.mxu1 %v1258_v18  ;;  %v1460_v18 = vunpack.c.h.bf16 %v2225_v44 }
 0x5ce   :  { %1376 = vmatpush1.bf16.msra.mxu0 %v2356_v2  ;;  %1417 = vmatpush1.bf16.msra.mxu1 %v2407_v17  ;;  %v1909_v2 = vld [vmem:[#allocation6 + $0x4] ss:$16 sps:$4 sm:$0xff]   ;;  %v1346_v17 = vunpack.c.l.bf16 %v2214_v3 }
 0x5cf   :  { %1377 = vmatprep.subr.bf16.mxu0 %v2360_v58  ;;  %1418 = vmatprep.subr.bf16.mxu1 %v2411_v4  ;;  %v1910_v58 = vld [vmem:[#allocation6 + $0xc] ss:$16 sps:$4 sm:$0xff]  }
 0x5d0   :  { %1407 = vmatprep.mubr.bf16.mxu0 %v2578_v1  ;;  %1448 = vmatprep.mubr.bf16.mxu1 %v2578_v1  ;;  %v1908_v1 = vld [vmem:[#allocation6 + $0x28] ss:$16 sps:$4 sm:$0xff]  }
 0x5d2   :  { %1378 = vmatpush1.bf16.msra.mxu0 %v2416_v53  ;;  %1419 = vmatpush1.bf16.msra.mxu1 %v2419_v26 }
 0x5d3   :  { %1379 = vmatprep.subr.bf16.mxu0 %v2422_v56  ;;  %1420 = vmatprep.subr.bf16.mxu1 %v2425_v9  ;;  %v2582_v56 = vld [vmem:[#allocation12_spill] sm:$0xff] }
 0x5d4   :  { %v1348_v9 = vunpack.c.l.bf16 %v2582_v56 }
 0x5d6   :  { %1380 = vmatpush1.bf16.msra.mxu0 %v2428_v8  ;;  %1421 = vmatpush1.bf16.msra.mxu1 %v2431_v62  ;;  %v1347_v8 = vunpack.c.h.bf16 %v2214_v3 }
 0x5d7   :  { %1381 = vmatprep.subr.bf16.mxu0 %v2434_v60  ;;  %1422 = vmatprep.subr.bf16.mxu1 %v2437_v55 }
 0x5da   :  { %1382 = vmatpush1.bf16.msra.mxu0 %v2440_v63  ;;  %1423 = vmatpush1.bf16.msra.mxu1 %v2443_v6 }
 0x5db   :  { %1383 = vmatprep.subr.bf16.mxu0 %v2446_v52  ;;  %1424 = vmatprep.subr.bf16.mxu1 %v2449_v15 }
 0x5de   :  { %1384 = vmatpush1.bf16.msra.mxu0 %v2452_v19  ;;  %1425 = vmatpush1.bf16.msra.mxu1 %v2455_v20  ;;  %v1349_v20 = vunpack.c.h.bf16 %v2582_v56 }
 0x5df   :  { %1385 = vmatprep.subr.bf16.mxu0 %v2458_v23  ;;  %1426 = vmatprep.subr.bf16.mxu1 %v2461_v24 }
 0x5e2   :  { %1386 = vmatpush1.bf16.msra.mxu0 %v2464_v25  ;;  %1427 = vmatpush1.bf16.msra.mxu1 %v2467_v27 }
 0x5e3   :  { %1387 = vmatprep.subr.bf16.mxu0 %v2470_v28  ;;  %1428 = vmatprep.subr.bf16.mxu1 %v2473_v29 }
 0x5e6   :  { %1388 = vmatpush1.bf16.msra.mxu0 %v2476_v30  ;;  %1429 = vmatpush1.bf16.msra.mxu1 %v1908_v1 }
 0x5e7   :  { %1389 = vmatprep.subr.bf16.mxu0 %v1909_v2  ;;  %1430 = vmatprep.subr.bf16.mxu1 %v1910_v58 }
 0x5ea   :  { %1390 = vmatpush1.bf16.msra.mxu0 %v1911_v11  ;;  %1431 = vmatpush1.bf16.msra.mxu1 %v1912_v35 }
 0x5eb   :  { %1711 = vmatprep.subr.bf16.mxu0 %v1940_v50 }
 0x68d   :  { %v1298_v4 = vpop.f32.mrf.mxu0  ;;  %v1339_v53 = vpop.f32.mrf.mxu1 }
 0x68e   :  { %v1350_v26 = vadd.f32 %v1346_v17, %v1298_v4  ;;  %v1352_v55 = vadd.f32 %v1348_v9, %v1339_v53 }
 0x68f   :  { %v1300_v62 = vpop.f32.mrf.mxu0  ;;  %v1341_v60 = vpop.f32.mrf.mxu1 }
 0x690   :  { %1859 = vtanh.f32 %v1350_v26  ;;  %v1351_v63 = vadd.f32 %v1347_v8, %v1300_v62  ;;  %v1353_v23 = vadd.f32 %v1349_v20, %v1341_v60 }
 0x691   :  { %v1302_v6 = vpop.f32.mrf.mxu0  ;;  %v1343_v52 = vpop.f32.mrf.mxu1 }
 0x692   :  { %1861 = vtanh.f32 %v1351_v63  ;;  %v1677_v63 = vld [vmem:[#allocation5] ss:$0 sm:$0xff] }
 0x693   :  { %v1303_v15 = vpop.f32.mrf.mxu0  ;;  %v1344_v19 = vpop.f32.mrf.mxu1  ;;  %1863 = vtanh.f32 %v1352_v55 }
 0x694   :  { %1865 = vtanh.f32 %v1353_v23 }
 0x69d   :  { %v1860_v24 = vpop.eup %1859 }
 0x69e   :  { %v1358_v25 = vmul.f32 0.5, %v1860_v24 }
 0x69f   :  { %v1862_v27 = vpop.eup %1861 }
 0x6a0   :  { %v1359_v28 = vadd.f32 0.5, %v1358_v25  ;;  %v1360_v29 = vmul.f32 0.5, %v1862_v27  ;;  %v1864_v3 = vpop.eup %1863 }
 0x6a1   :  { %v1866_v34 = vpop.eup %1865 }
 0x6a2   :  { %v1361_v30 = vadd.f32 0.5, %v1360_v29  ;;  %v1365_v31 = vmul.f32 %v1864_v3, %v1359_v28  ;;  %v1362_v36 = vmul.f32 0.5, %v1866_v34 }
 0x6a4   :  { %v1364_v32 = vmul.f32 %v1361_v30, %v2491_v10  ;;  %v1363_v37 = vadd.f32 0.5, %v1362_v36 }
 0x6a6   :  { %v2526_v33 = vadd.f32 %v1365_v31, %v1364_v32 }
 0x6a8   :  { %1867 = vtanh.f32 %v2526_v33 }
 0x6b5   :  { %v1868_v48 = vpop.eup %1867 }
 0x6b6   :  { %v1368_v47 = vmul.f32 %v1868_v48, %v1363_v37 }
 0x6b8   :  { %v1369_v38 = vpack.c.bf16 %v1368_v47, %v1368_v47 }
 0x6ba   :  { %1408 = vmatmul.mubr.bf16.vlgmr.msra.gmra.mxu0 %v1369_v38  ;;  %1449 = vmatmul.mubr.bf16.vlgmr.msra.gmra.mxu1 %v1369_v38 }
 0x6bb   :  { %1712 = vmatpush3.bf16.msra.mxu0 %v1791_v49  ;;  %1727 = vmatprep.mubr.msk.bf16.mxu0 %vm1941_vm2, %v1940_v50 }
 0x6bc   :  { %1713 = vmatprep.subr.bf16.mxu0 %v1940_v50 }
 0x6bf   :  { %1714 = vmatpush3.bf16.msra.mxu0 %v1792_v39 }
 0x6c0   :  { %1715 = vmatprep.subr.bf16.mxu0 %v1940_v50 }
 0x6c3   :  { %1716 = vmatpush3.bf16.msra.mxu0 %v1793_v51 }
 0x6c4   :  { %1717 = vmatprep.subr.bf16.mxu0 %v1940_v50 }
 0x6c7   :  { %1718 = vmatpush3.bf16.msra.mxu0 %v1794_v21 }
 0x6c8   :  { %1719 = vmatprep.subr.bf16.mxu0 %v1940_v50 }
 0x6cb   :  { %1720 = vmatpush3.bf16.msra.mxu0 %v1795_v40 }
 0x6cc   :  { %1721 = vmatprep.subr.bf16.mxu0 %v1940_v50 }
 0x6cf   :  { %1722 = vmatpush3.bf16.msra.mxu0 %v1796_v22 }
 0x6d0   :  { %1723 = vmatprep.subr.bf16.mxu0 %v1940_v50 }
 0x6d3   :  { %1724 = vmatpush3.bf16.msra.mxu0 %v1797_v41 }
 0x6d4   :  { %1725 = vmatprep.subr.bf16.mxu0 %v1940_v50 }
 0x6d7   :  { %1726 = vmatpush3.bf16.msra.mxu0 %v1798_v42 }
 0x77a   :  { %v1409_v45 = vpop.f32.mrf.mxu0  ;;  %v1450_v46 = vpop.f32.mrf.mxu1 }
 0x77b   :  { %v1461_v16 = vadd.f32 %v1457_v43, %v1409_v45  ;;  %v1463_v10 = vadd.f32 %v1459_v59, %v1450_v46 }
 0x77c   :  { %v1411_v61 = vpop.f32.mrf.mxu0  ;;  %v1452_v12 = vpop.f32.mrf.mxu1 }
 0x77d   :  { %1869 = vtanh.f32 %v1461_v16  ;;  %v1462_v0 = vadd.f32 %v1458_v5, %v1411_v61  ;;  %v1464_v1 = vadd.f32 %v1460_v18, %v1452_v12 }
 0x77e   :  { %v1413_v7 = vpop.f32.mrf.mxu0  ;;  %v1454_v14 = vpop.f32.mrf.mxu1 }
 0x77f   :  { %1871 = vtanh.f32 %v1462_v0 }
 0x780   :  { %v1414_v57 = vpop.f32.mrf.mxu0  ;;  %v1455_v13 = vpop.f32.mrf.mxu1  ;;  %1873 = vtanh.f32 %v1463_v10 }
 0x781   :  { %1875 = vtanh.f32 %v1464_v1 }
 0x78a   :  { %v1870_v2 = vpop.eup %1869 }
 0x78b   :  { %v1469_v58 = vmul.f32 0.5, %v1870_v2 }
 0x78c   :  { %v1872_v11 = vpop.eup %1871 }
 0x78d   :  { %v1470_v35 = vadd.f32 0.5, %v1469_v58  ;;  %v1471_v17 = vmul.f32 0.5, %v1872_v11  ;;  %v1874_v54 = vpop.eup %1873 }
 0x78e   :  { %v1876_v9 = vpop.eup %1875 }
 0x78f   :  { %v1472_v4 = vadd.f32 0.5, %v1471_v17  ;;  %v1476_v53 = vmul.f32 %v1874_v54, %v1470_v35  ;;  %v1473_v8 = vmul.f32 0.5, %v1876_v9 }
 0x791   :  { %v1475_v26 = vmul.f32 %v1472_v4, %v2526_v33  ;;  %v1474_v62 = vadd.f32 0.5, %v1473_v8 }
 0x793   :  { %v1477_v56 = vadd.f32 %v1476_v53, %v1475_v26 }
 0x795   :  { %1877 = vtanh.f32 %v1477_v56 }
 0x7a2   :  { %v1878_v60 = vpop.eup %1877 }
 0x7a3   :  { %v1479_v55 = vmul.f32 %v1878_v60, %v1474_v62 }
 0x7a5   :  { %v1480_v44 = vpack.c.bf16 %v1479_v55, %v1479_v55 }
 0x7a7   :  { %1481 = vst [vmem:[#allocation2] sm:$0xf] %v1480_v44  ;;  %1728 = vmatmul.mubr.bf16.vlgmr.msra.gmra.mxu0 %v1480_v44 }
 0x867   :  { %v1591_v6 = vpop.f32.mrf.mxu0 }
 0x868   :  { %v1592_v52 = vadd.f32 %v1677_v63, %v1591_v6 }
 0x869   :  { %v1729_v15 = vpop.f32.mrf.mxu0 }
 0x86a   :  { %v1597_v19 = vmul.f32 0.5, %v1592_v52 }
 0x86b   :  { %v1594_v20 = vpop.f32.mrf.mxu0 }
 0x86c   :  { %1879 = vtanh.f32 %v1597_v19 }
 0x86d   :  { %v1730_v23 = vpop.f32.mrf.mxu0 }
 0x879   :  { %v1880_v24 = vpop.eup %1879 }
 0x87a   :  { %v1599_v25 = vmul.f32 0.5, %v1880_v24 }
 0x87c   :  { %v1600_v27 = vadd.f32 0.5, %v1599_v25 }
 0x87e   :  { %1602 = vst.msk [vmem:[%s2567_s6] sm:$0xff] %vm1601_vm3, %v1600_v27 }
 0x87f   :  { %1607 = vsyncpa [#allocation7], 1 }

</bundles_post_ra>
